<compile_context>
chip_gen: v7x
topology: tpu7x:2x2x1
jax: 0.10.0
libtpu: 0.0.40
codegen_flags: <defaults>
</compile_context>

<pallas_src>
import functools

import numpy as np

import jax
import jax.numpy as jnp
from jax.experimental import pallas as pl
from jax.experimental.pallas import tpu as pltpu


KERNEL_SIZES = (1, 3, 5)
_MASK_SHIFTS = (-2, -1, 1, 2)     # flattened-tap column shifts that can wrap a row
_EPS = 1e-5


def _round_up(v, m):
    return ((v + m - 1) // m) * m


def _branch_convs(xf, w_list, masks, *, W, HW, pad):
    """Depthwise conv at k = 1, 3, 5 on the flattened (lane-dense) layout.

    xf     : (C, H*W)            flat input for one batch element, f32
    w_list : [(C,1),(C,9),(C,25)] per-channel taps (row-major k x k)
    masks  : (4, H*W + 4W)       0/1 column-validity masks for b = -2,-1,+1,+2
    returns [y1, y3, y5], each (C, H*W) f32 (branch order k = 1, 3, 5).
    """
    C = xf.shape[0]
    L = HW + 4 * W
    zeros = jnp.zeros((C, pad), dtype=xf.dtype)
    # in-VMEM zero extension replaces the old HBM-materialized jnp.pad
    xr = jnp.concatenate([zeros, xf, zeros], axis=1)
    base = pad - 2 * W
    # b-shifted, column-masked source copies shared by every tap with the same
    # dj offset: 4 extra multiplies/elem instead of one select per masked tap.
    src = {0: xr[:, base:base + L]}
    for r, b in enumerate(_MASK_SHIFTS):
        src[b] = xr[:, base + b:base + b + L] * masks[r:r + 1, :]
    ys = []
    for k, w in zip(KERNEL_SIZES, w_list):
        half = k // 2
        acc = None
        for di in range(k):
            for dj in range(k):
                a, b = di - half, dj - half
                s = (a + 2) * W
                t = di * k + dj
                tap = w[:, t:t + 1] * src[b][:, s:s + HW]
                acc = tap if acc is None else acc + tap
        ys.append(acc)
    return ys


def _stats_kernel(mask_ref, x_ref, w1_ref, w3_ref, w5_ref, stat_ref,
                  *, W, HW, C, pad):
    """Per-batch-element BN partials: per concat channel (mean, centered M2)."""
    ys = _branch_convs(x_ref[0],
                       [w1_ref[...], w3_ref[...], w5_ref[...]],
                       mask_ref[...], W=W, HW=HW, pad=pad)
    inv_hw = 1.0 / HW
    for k_idx, y in enumerate(ys):
        mean = jnp.sum(y, axis=1, keepdims=True) * inv_hw           # (C, 1)
        d = y - mean
        m2 = jnp.sum(d * d, axis=1, keepdims=True)                  # (C, 1)
        stat_ref[0, k_idx * C:(k_idx + 1) * C, 0:1] = mean
        stat_ref[0, k_idx * C:(k_idx + 1) * C, 1:2] = m2


def _fused_kernel(mask_ref, x_ref, w1_ref, w3_ref, w5_ref, shift_ref, out_ref,
                  *, W, HW, C, pad):
    """Fused depthwise conv (BN scale pre-folded) + shift + ReLU + shuffle."""
    ys = _branch_convs(x_ref[0],
                       [w1_ref[...], w3_ref[...], w5_ref[...]],
                       mask_ref[...], W=W, HW=HW, pad=pad)
    for k_idx, y in enumerate(ys):
        shift = shift_ref[k_idx * C:(k_idx + 1) * C, :]              # (C, 1)
        act = jnp.maximum(y + shift, 0.0)                            # BN shift + ReLU
        # channel shuffle (groups = C): concat channel cc -> output channel
        # (cc % 3)*C + cc//3.  Static row stores into the resident VMEM output
        # block; the HBM writeback remains one dense DMA.
        # TODO(synk): at large C replace with residue-grouped block stores or a
        # DMA-time index_map permutation to avoid O(3C) store statements.
        for c in range(C):
            cc = k_idx * C + c
            out_ref[0, (cc % 3) * C + cc // 3, :] = act[c, :]


@jax.jit
def mspdc_forward(x, dw_w1, dw_w3, dw_w5, gammas, betas):
    """x: (N, C, H, W) f32 -> (N, 3C, H, W) f32 (MSPDC, mode='parallel')."""
    N, C, H, W = x.shape
    C3 = 3 * C
    HW = H * W
    L = HW + 4 * W
    pad = _round_up(2 * W + 2, 128)   # flat zero-extension, lane-aligned

    xf = x.reshape(N, C, HW).astype(jnp.float32)
    w1 = dw_w1.reshape(C, 1).astype(jnp.float32)
    w3 = dw_w3.reshape(C, 9).astype(jnp.float32)
    w5 = dw_w5.reshape(C, 25).astype(jnp.float32)

    # column-validity masks for the flattened tap shifts (tiny constant input)
    col = np.arange(L) % W
    masks = jnp.asarray(np.stack(
        [((col + b >= 0) & (col + b < W)).astype(np.float32)
         for b in _MASK_SHIFTS]))                                    # (4, L)

    x_spec = pl.BlockSpec((1, C, HW), lambda n: (n, 0, 0))
    mask_spec = pl.BlockSpec((4, L), lambda n: (0, 0))
    w_specs = [pl.BlockSpec((C, 1), lambda n: (0, 0)),
               pl.BlockSpec((C, 9), lambda n: (0, 0)),
               pl.BlockSpec((C, 25), lambda n: (0, 0))]
    cparams = pltpu.CompilerParams(
        dimension_semantics=("parallel",),
        vmem_limit_bytes=64 * 1024 * 1024)

    # ---- pass 1: per-batch-element BN partials (parallel over N) ------------
    stats = pl.pallas_call(
        functools.partial(_stats_kernel, W=W, HW=HW, C=C, pad=pad),
        out_shape=jax.ShapeDtypeStruct((N, C3, 2), jnp.float32),
        grid=(N,),
        in_specs=[mask_spec, x_spec] + w_specs,
        out_specs=pl.BlockSpec((1, C3, 2), lambda n: (n, 0, 0)),
        compiler_params=cparams,
    )(masks, xf, w1, w3, w5)

    # combine partials with Chan's parallel-variance formula (biased var)
    means = stats[..., 0]                                            # (N, 3C)
    m2s = stats[..., 1]                                              # (N, 3C)
    mean = jnp.mean(means, axis=0)
    m2 = jnp.sum(m2s, axis=0) + HW * jnp.sum((means - mean) ** 2, axis=0)
    var = m2 / (N * HW)

    gamma = gammas.reshape(C3).astype(jnp.float32)
    beta = betas.reshape(C3).astype(jnp.float32)
    scale = gamma * jax.lax.rsqrt(var + _EPS)
    shift = (beta - mean * scale).reshape(C3, 1)
    # fold BN scale into the depthwise taps (tiny wrapper-side op, frees a
    # per-element multiply + (3C,1,1) broadcast in the hot kernel)
    w1s = w1 * scale[0:C, None]
    w3s = w3 * scale[C:2 * C, None]
    w5s = w5 * scale[2 * C:3 * C, None]

    # ---- pass 2: fused conv + BN shift + ReLU + channel shuffle -------------
    out = pl.pallas_call(
        functools.partial(_fused_kernel, W=W, HW=HW, C=C, pad=pad),
        out_shape=jax.ShapeDtypeStruct((N, C3, HW), jnp.float32),
        grid=(N,),
        in_specs=[mask_spec, x_spec] + w_specs
                 + [pl.BlockSpec((C3, 1), lambda n: (0, 0))],
        out_specs=pl.BlockSpec((1, C3, HW), lambda n: (n, 0, 0)),
        compiler_params=cparams,
    )(masks, xf, w1s, w3s, w5s, shift)

    return out.reshape(N, C3, H, W)


def _reference(x, dw_w1, dw_w3, dw_w5, gammas, betas):
    """Pure-JAX NCHW reference: DWConv + training-mode BN + ReLU + shuffle."""
    N, C, H, W = x.shape
    feats = []
    for idx, (k, w) in enumerate(zip(KERNEL_SIZES, (dw_w1, dw_w3, dw_w5))):
        p = k // 2
        xp = jnp.pad(x, ((0, 0), (0, 0), (p, p), (p, p)))
        wf = w.reshape(C, k * k)
        y = 0.0
        for di in range(k):
            for dj in range(k):
                y = y + (wf[:, di * k + dj][None, :, None, None]
                         * xp[:, :, di:di + H, dj:dj + W])
        mean = jnp.mean(y, axis=(0, 2, 3))
        var = jnp.var(y, axis=(0, 2, 3))                 # biased, like torch BN
        yn = (y - mean[None, :, None, None]) * jax.lax.rsqrt(
            var[None, :, None, None] + _EPS)
        yn = yn * gammas[idx][None, :, None, None] + betas[idx][None, :, None, None]
        feats.append(jnp.maximum(yn, 0.0))
    cat = jnp.concatenate(feats, axis=1)
    # channel shuffle with groups = gcd(3C, C) = C
    return cat.reshape(N, C, 3, H, W).transpose(0, 2, 1, 3, 4).reshape(N, 3 * C, H, W)


if __name__ == "__main__":
    # small deterministic example: N=2, C=4, H=W=16 -> output (2, 12, 16, 16)
    N, C, H, W = 2, 4, 16, 16

    key = jax.random.PRNGKey(0)
    k_x, k1, k3, k5, kg, kb = jax.random.split(key, 6)

    x = jax.random.normal(k_x, (N, C, H, W), dtype=jnp.float32)
    # depthwise Conv2d weights, PyTorch shape (C, 1, k, k), bias=False
    dw_w1 = 0.5 * jax.random.normal(k1, (C, 1, 1, 1), dtype=jnp.float32)
    dw_w3 = 0.2 * jax.random.normal(k3, (C, 1, 3, 3), dtype=jnp.float32)
    dw_w5 = 0.1 * jax.random.normal(k5, (C, 1, 5, 5), dtype=jnp.float32)
    bn_gamma = 1.0 + 0.1 * jax.random.normal(kg, (3, C), dtype=jnp.float32)
    bn_beta = 0.1 * jax.random.normal(kb, (3, C), dtype=jnp.float32)

    out = mspdc_forward(x, dw_w1, dw_w3, dw_w5, bn_gamma, bn_beta)
    out = jax.block_until_ready(out)

    ref = jax.block_until_ready(
        _reference(x, dw_w1, dw_w3, dw_w5, bn_gamma, bn_beta))

    assert out.shape == (N, 3 * C, H, W)
    assert bool(jnp.all(jnp.isfinite(out)))
    max_err = float(jnp.max(jnp.abs(out - ref)))
    assert max_err < 1e-3, f"mismatch vs reference: max abs err = {max_err}"
    print("KERNEL_OK")
</pallas_src>

<mosaic_0001>
module attributes {stable_mosaic.version = 11 : i64} {
  func.func @_stats_kernel(%arg0: i32, %arg1: memref<4x320xf32, #tpu.memory_space<vmem>>, %arg2: memref<1x4x256xf32, #tpu.memory_space<vmem>>, %arg3: memref<4x1xf32, #tpu.memory_space<vmem>>, %arg4: memref<4x9xf32, #tpu.memory_space<vmem>>, %arg5: memref<4x25xf32, #tpu.memory_space<vmem>>, %arg6: memref<1x12x2xf32, #tpu.memory_space<vmem>>) attributes {dimension_semantics = [#tpu.dimension_semantics<parallel>], iteration_bounds = array<i64: 2>, scalar_prefetch = 0 : i64, scratch_operands = 0 : i64, tpu.core_type = #tpu.core_type<tc>, window_params = [{pipeline_mode = #tpu.pipeline_mode<synchronous>, transform_indices = @transform_0, window_bounds = array<i64: 4, 320>}, {transform_indices = @transform_1, window_bounds = array<i64: 1, 4, 256>}, {pipeline_mode = #tpu.pipeline_mode<synchronous>, transform_indices = @transform_2, window_bounds = array<i64: 4, 1>}, {pipeline_mode = #tpu.pipeline_mode<synchronous>, transform_indices = @transform_3, window_bounds = array<i64: 4, 9>}, {pipeline_mode = #tpu.pipeline_mode<synchronous>, transform_indices = @transform_4, window_bounds = array<i64: 4, 25>}, {transform_indices = @transform_5, window_bounds = array<i64: 1, 12, 2>}]} {
    %c0 = arith.constant 0 : index
    %c0_0 = arith.constant 0 : index
    %c0_1 = arith.constant 0 : index
    %0 = vector.load %arg2[%c0, %c0_0, %c0_1] : memref<1x4x256xf32, #tpu.memory_space<vmem>>, vector<1x4x256xf32>
    %1 = vector.shape_cast %0 : vector<1x4x256xf32> to vector<4x256xf32>
    %c0_2 = arith.constant 0 : index
    %c0_3 = arith.constant 0 : index
    %2 = vector.load %arg3[%c0_2, %c0_3] : memref<4x1xf32, #tpu.memory_space<vmem>>, vector<4x1xf32>
    %c0_4 = arith.constant 0 : index
    %c0_5 = arith.constant 0 : index
    %3 = vector.load %arg4[%c0_4, %c0_5] : memref<4x9xf32, #tpu.memory_space<vmem>>, vector<4x9xf32>
    %c0_6 = arith.constant 0 : index
    %c0_7 = arith.constant 0 : index
    %4 = vector.load %arg5[%c0_6, %c0_7] : memref<4x25xf32, #tpu.memory_space<vmem>>, vector<4x25xf32>
    %c0_8 = arith.constant 0 : index
    %c0_9 = arith.constant 0 : index
    %5 = vector.load %arg1[%c0_8, %c0_9] : memref<4x320xf32, #tpu.memory_space<vmem>>, vector<4x320xf32>
    %cst = arith.constant 0.000000e+00 : f32
    %6 = vector.broadcast %cst : f32 to vector<4x128xf32>
    %7 = tpu.concatenate %6, %1, %6 in 1 : vector<4x128xf32>, vector<4x256xf32>, vector<4x128xf32> -> vector<4x512xf32>
    %8 = vector.extract_strided_slice %7 {offsets = [0, 96], sizes = [4, 320], strides = [1, 1]} : vector<4x512xf32> to vector<4x320xf32>
    %9 = vector.extract_strided_slice %7 {offsets = [0, 94], sizes = [4, 320], strides = [1, 1]} : vector<4x512xf32> to vector<4x320xf32>
    %10 = vector.extract_strided_slice %5 {offsets = [0, 0], sizes = [1, 320], strides = [1, 1]} : vector<4x320xf32> to vector<1x320xf32>
    %11 = vector.broadcast %10 : vector<1x320xf32> to vector<4x320xf32>
    %12 = arith.mulf %9, %11 : vector<4x320xf32>
    %13 = vector.extract_strided_slice %7 {offsets = [0, 95], sizes = [4, 320], strides = [1, 1]} : vector<4x512xf32> to vector<4x320xf32>
    %14 = vector.extract_strided_slice %5 {offsets = [1, 0], sizes = [1, 320], strides = [1, 1]} : vector<4x320xf32> to vector<1x320xf32>
    %15 = vector.broadcast %14 : vector<1x320xf32> to vector<4x320xf32>
    %16 = arith.mulf %13, %15 : vector<4x320xf32>
    %17 = vector.extract_strided_slice %7 {offsets = [0, 97], sizes = [4, 320], strides = [1, 1]} : vector<4x512xf32> to vector<4x320xf32>
    %18 = vector.extract_strided_slice %5 {offsets = [2, 0], sizes = [1, 320], strides = [1, 1]} : vector<4x320xf32> to vector<1x320xf32>
    %19 = vector.broadcast %18 : vector<1x320xf32> to vector<4x320xf32>
    %20 = arith.mulf %17, %19 : vector<4x320xf32>
    %21 = vector.extract_strided_slice %7 {offsets = [0, 98], sizes = [4, 320], strides = [1, 1]} : vector<4x512xf32> to vector<4x320xf32>
    %22 = vector.extract_strided_slice %5 {offsets = [3, 0], sizes = [1, 320], strides = [1, 1]} : vector<4x320xf32> to vector<1x320xf32>
    %23 = vector.broadcast %22 : vector<1x320xf32> to vector<4x320xf32>
    %24 = arith.mulf %21, %23 : vector<4x320xf32>
    %25 = vector.extract_strided_slice %8 {offsets = [0, 32], sizes = [4, 256], strides = [1, 1]} : vector<4x320xf32> to vector<4x256xf32>
    %26 = vector.broadcast %2 : vector<4x1xf32> to vector<4x256xf32>
    %27 = arith.mulf %26, %25 : vector<4x256xf32>
    %28 = vector.extract_strided_slice %3 {offsets = [0, 0], sizes = [4, 1], strides = [1, 1]} : vector<4x9xf32> to vector<4x1xf32>
    %29 = vector.extract_strided_slice %16 {offsets = [0, 16], sizes = [4, 256], strides = [1, 1]} : vector<4x320xf32> to vector<4x256xf32>
    %30 = vector.broadcast %28 : vector<4x1xf32> to vector<4x256xf32>
    %31 = arith.mulf %30, %29 : vector<4x256xf32>
    %32 = vector.extract_strided_slice %3 {offsets = [0, 1], sizes = [4, 1], strides = [1, 1]} : vector<4x9xf32> to vector<4x1xf32>
    %33 = vector.extract_strided_slice %8 {offsets = [0, 16], sizes = [4, 256], strides = [1, 1]} : vector<4x320xf32> to vector<4x256xf32>
    %34 = vector.broadcast %32 : vector<4x1xf32> to vector<4x256xf32>
    %35 = arith.mulf %34, %33 : vector<4x256xf32>
    %36 = arith.addf %31, %35 : vector<4x256xf32>
    %37 = vector.extract_strided_slice %3 {offsets = [0, 2], sizes = [4, 1], strides = [1, 1]} : vector<4x9xf32> to vector<4x1xf32>
    %38 = vector.extract_strided_slice %20 {offsets = [0, 16], sizes = [4, 256], strides = [1, 1]} : vector<4x320xf32> to vector<4x256xf32>
    %39 = vector.broadcast %37 : vector<4x1xf32> to vector<4x256xf32>
    %40 = arith.mulf %39, %38 : vector<4x256xf32>
    %41 = arith.addf %36, %40 : vector<4x256xf32>
    %42 = vector.extract_strided_slice %3 {offsets = [0, 3], sizes = [4, 1], strides = [1, 1]} : vector<4x9xf32> to vector<4x1xf32>
    %43 = vector.extract_strided_slice %16 {offsets = [0, 32], sizes = [4, 256], strides = [1, 1]} : vector<4x320xf32> to vector<4x256xf32>
    %44 = vector.broadcast %42 : vector<4x1xf32> to vector<4x256xf32>
    %45 = arith.mulf %44, %43 : vector<4x256xf32>
    %46 = arith.addf %41, %45 : vector<4x256xf32>
    %47 = vector.extract_strided_slice %3 {offsets = [0, 4], sizes = [4, 1], strides = [1, 1]} : vector<4x9xf32> to vector<4x1xf32>
    %48 = vector.extract_strided_slice %8 {offsets = [0, 32], sizes = [4, 256], strides = [1, 1]} : vector<4x320xf32> to vector<4x256xf32>
    %49 = vector.broadcast %47 : vector<4x1xf32> to vector<4x256xf32>
    %50 = arith.mulf %49, %48 : vector<4x256xf32>
    %51 = arith.addf %46, %50 : vector<4x256xf32>
    %52 = vector.extract_strided_slice %3 {offsets = [0, 5], sizes = [4, 1], strides = [1, 1]} : vector<4x9xf32> to vector<4x1xf32>
    %53 = vector.extract_strided_slice %20 {offsets = [0, 32], sizes = [4, 256], strides = [1, 1]} : vector<4x320xf32> to vector<4x256xf32>
    %54 = vector.broadcast %52 : vector<4x1xf32> to vector<4x256xf32>
    %55 = arith.mulf %54, %53 : vector<4x256xf32>
    %56 = arith.addf %51, %55 : vector<4x256xf32>
    %57 = vector.extract_strided_slice %3 {offsets = [0, 6], sizes = [4, 1], strides = [1, 1]} : vector<4x9xf32> to vector<4x1xf32>
    %58 = vector.extract_strided_slice %16 {offsets = [0, 48], sizes = [4, 256], strides = [1, 1]} : vector<4x320xf32> to vector<4x256xf32>
    %59 = vector.broadcast %57 : vector<4x1xf32> to vector<4x256xf32>
    %60 = arith.mulf %59, %58 : vector<4x256xf32>
    %61 = arith.addf %56, %60 : vector<4x256xf32>
    %62 = vector.extract_strided_slice %3 {offsets = [0, 7], sizes = [4, 1], strides = [1, 1]} : vector<4x9xf32> to vector<4x1xf32>
    %63 = vector.extract_strided_slice %8 {offsets = [0, 48], sizes = [4, 256], strides = [1, 1]} : vector<4x320xf32> to vector<4x256xf32>
    %64 = vector.broadcast %62 : vector<4x1xf32> to vector<4x256xf32>
    %65 = arith.mulf %64, %63 : vector<4x256xf32>
    %66 = arith.addf %61, %65 : vector<4x256xf32>
    %67 = vector.extract_strided_slice %3 {offsets = [0, 8], sizes = [4, 1], strides = [1, 1]} : vector<4x9xf32> to vector<4x1xf32>
    %68 = vector.extract_strided_slice %20 {offsets = [0, 48], sizes = [4, 256], strides = [1, 1]} : vector<4x320xf32> to vector<4x256xf32>
    %69 = vector.broadcast %67 : vector<4x1xf32> to vector<4x256xf32>
    %70 = arith.mulf %69, %68 : vector<4x256xf32>
    %71 = arith.addf %66, %70 : vector<4x256xf32>
    %72 = vector.extract_strided_slice %4 {offsets = [0, 0], sizes = [4, 1], strides = [1, 1]} : vector<4x25xf32> to vector<4x1xf32>
    %73 = vector.extract_strided_slice %12 {offsets = [0, 0], sizes = [4, 256], strides = [1, 1]} : vector<4x320xf32> to vector<4x256xf32>
    %74 = vector.broadcast %72 : vector<4x1xf32> to vector<4x256xf32>
    %75 = arith.mulf %74, %73 : vector<4x256xf32>
    %76 = vector.extract_strided_slice %4 {offsets = [0, 1], sizes = [4, 1], strides = [1, 1]} : vector<4x25xf32> to vector<4x1xf32>
    %77 = vector.extract_strided_slice %16 {offsets = [0, 0], sizes = [4, 256], strides = [1, 1]} : vector<4x320xf32> to vector<4x256xf32>
    %78 = vector.broadcast %76 : vector<4x1xf32> to vector<4x256xf32>
    %79 = arith.mulf %78, %77 : vector<4x256xf32>
    %80 = arith.addf %75, %79 : vector<4x256xf32>
    %81 = vector.extract_strided_slice %4 {offsets = [0, 2], sizes = [4, 1], strides = [1, 1]} : vector<4x25xf32> to vector<4x1xf32>
    %82 = vector.extract_strided_slice %8 {offsets = [0, 0], sizes = [4, 256], strides = [1, 1]} : vector<4x320xf32> to vector<4x256xf32>
    %83 = vector.broadcast %81 : vector<4x1xf32> to vector<4x256xf32>
    %84 = arith.mulf %83, %82 : vector<4x256xf32>
    %85 = arith.addf %80, %84 : vector<4x256xf32>
    %86 = vector.extract_strided_slice %4 {offsets = [0, 3], sizes = [4, 1], strides = [1, 1]} : vector<4x25xf32> to vector<4x1xf32>
    %87 = vector.extract_strided_slice %20 {offsets = [0, 0], sizes = [4, 256], strides = [1, 1]} : vector<4x320xf32> to vector<4x256xf32>
    %88 = vector.broadcast %86 : vector<4x1xf32> to vector<4x256xf32>
    %89 = arith.mulf %88, %87 : vector<4x256xf32>
    %90 = arith.addf %85, %89 : vector<4x256xf32>
    %91 = vector.extract_strided_slice %4 {offsets = [0, 4], sizes = [4, 1], strides = [1, 1]} : vector<4x25xf32> to vector<4x1xf32>
    %92 = vector.extract_strided_slice %24 {offsets = [0, 0], sizes = [4, 256], strides = [1, 1]} : vector<4x320xf32> to vector<4x256xf32>
    %93 = vector.broadcast %91 : vector<4x1xf32> to vector<4x256xf32>
    %94 = arith.mulf %93, %92 : vector<4x256xf32>
    %95 = arith.addf %90, %94 : vector<4x256xf32>
    %96 = vector.extract_strided_slice %4 {offsets = [0, 5], sizes = [4, 1], strides = [1, 1]} : vector<4x25xf32> to vector<4x1xf32>
    %97 = vector.extract_strided_slice %12 {offsets = [0, 16], sizes = [4, 256], strides = [1, 1]} : vector<4x320xf32> to vector<4x256xf32>
    %98 = vector.broadcast %96 : vector<4x1xf32> to vector<4x256xf32>
    %99 = arith.mulf %98, %97 : vector<4x256xf32>
    %100 = arith.addf %95, %99 : vector<4x256xf32>
    %101 = vector.extract_strided_slice %4 {offsets = [0, 6], sizes = [4, 1], strides = [1, 1]} : vector<4x25xf32> to vector<4x1xf32>
    %102 = vector.extract_strided_slice %16 {offsets = [0, 16], sizes = [4, 256], strides = [1, 1]} : vector<4x320xf32> to vector<4x256xf32>
    %103 = vector.broadcast %101 : vector<4x1xf32> to vector<4x256xf32>
    %104 = arith.mulf %103, %102 : vector<4x256xf32>
    %105 = arith.addf %100, %104 : vector<4x256xf32>
    %106 = vector.extract_strided_slice %4 {offsets = [0, 7], sizes = [4, 1], strides = [1, 1]} : vector<4x25xf32> to vector<4x1xf32>
    %107 = vector.extract_strided_slice %8 {offsets = [0, 16], sizes = [4, 256], strides = [1, 1]} : vector<4x320xf32> to vector<4x256xf32>
    %108 = vector.broadcast %106 : vector<4x1xf32> to vector<4x256xf32>
    %109 = arith.mulf %108, %107 : vector<4x256xf32>
    %110 = arith.addf %105, %109 : vector<4x256xf32>
    %111 = vector.extract_strided_slice %4 {offsets = [0, 8], sizes = [4, 1], strides = [1, 1]} : vector<4x25xf32> to vector<4x1xf32>
    %112 = vector.extract_strided_slice %20 {offsets = [0, 16], sizes = [4, 256], strides = [1, 1]} : vector<4x320xf32> to vector<4x256xf32>
    %113 = vector.broadcast %111 : vector<4x1xf32> to vector<4x256xf32>
    %114 = arith.mulf %113, %112 : vector<4x256xf32>
    %115 = arith.addf %110, %114 : vector<4x256xf32>
    %116 = vector.extract_strided_slice %4 {offsets = [0, 9], sizes = [4, 1], strides = [1, 1]} : vector<4x25xf32> to vector<4x1xf32>
    %117 = vector.extract_strided_slice %24 {offsets = [0, 16], sizes = [4, 256], strides = [1, 1]} : vector<4x320xf32> to vector<4x256xf32>
    %118 = vector.broadcast %116 : vector<4x1xf32> to vector<4x256xf32>
    %119 = arith.mulf %118, %117 : vector<4x256xf32>
    %120 = arith.addf %115, %119 : vector<4x256xf32>
    %121 = vector.extract_strided_slice %4 {offsets = [0, 10], sizes = [4, 1], strides = [1, 1]} : vector<4x25xf32> to vector<4x1xf32>
    %122 = vector.extract_strided_slice %12 {offsets = [0, 32], sizes = [4, 256], strides = [1, 1]} : vector<4x320xf32> to vector<4x256xf32>
    %123 = vector.broadcast %121 : vector<4x1xf32> to vector<4x256xf32>
    %124 = arith.mulf %123, %122 : vector<4x256xf32>
    %125 = arith.addf %120, %124 : vector<4x256xf32>
    %126 = vector.extract_strided_slice %4 {offsets = [0, 11], sizes = [4, 1], strides = [1, 1]} : vector<4x25xf32> to vector<4x1xf32>
    %127 = vector.extract_strided_slice %16 {offsets = [0, 32], sizes = [4, 256], strides = [1, 1]} : vector<4x320xf32> to vector<4x256xf32>
    %128 = vector.broadcast %126 : vector<4x1xf32> to vector<4x256xf32>
    %129 = arith.mulf %128, %127 : vector<4x256xf32>
    %130 = arith.addf %125, %129 : vector<4x256xf32>
    %131 = vector.extract_strided_slice %4 {offsets = [0, 12], sizes = [4, 1], strides = [1, 1]} : vector<4x25xf32> to vector<4x1xf32>
    %132 = vector.extract_strided_slice %8 {offsets = [0, 32], sizes = [4, 256], strides = [1, 1]} : vector<4x320xf32> to vector<4x256xf32>
    %133 = vector.broadcast %131 : vector<4x1xf32> to vector<4x256xf32>
    %134 = arith.mulf %133, %132 : vector<4x256xf32>
    %135 = arith.addf %130, %134 : vector<4x256xf32>
    %136 = vector.extract_strided_slice %4 {offsets = [0, 13], sizes = [4, 1], strides = [1, 1]} : vector<4x25xf32> to vector<4x1xf32>
    %137 = vector.extract_strided_slice %20 {offsets = [0, 32], sizes = [4, 256], strides = [1, 1]} : vector<4x320xf32> to vector<4x256xf32>
    %138 = vector.broadcast %136 : vector<4x1xf32> to vector<4x256xf32>
    %139 = arith.mulf %138, %137 : vector<4x256xf32>
    %140 = arith.addf %135, %139 : vector<4x256xf32>
    %141 = vector.extract_strided_slice %4 {offsets = [0, 14], sizes = [4, 1], strides = [1, 1]} : vector<4x25xf32> to vector<4x1xf32>
    %142 = vector.extract_strided_slice %24 {offsets = [0, 32], sizes = [4, 256], strides = [1, 1]} : vector<4x320xf32> to vector<4x256xf32>
    %143 = vector.broadcast %141 : vector<4x1xf32> to vector<4x256xf32>
    %144 = arith.mulf %143, %142 : vector<4x256xf32>
    %145 = arith.addf %140, %144 : vector<4x256xf32>
    %146 = vector.extract_strided_slice %4 {offsets = [0, 15], sizes = [4, 1], strides = [1, 1]} : vector<4x25xf32> to vector<4x1xf32>
    %147 = vector.extract_strided_slice %12 {offsets = [0, 48], sizes = [4, 256], strides = [1, 1]} : vector<4x320xf32> to vector<4x256xf32>
    %148 = vector.broadcast %146 : vector<4x1xf32> to vector<4x256xf32>
    %149 = arith.mulf %148, %147 : vector<4x256xf32>
    %150 = arith.addf %145, %149 : vector<4x256xf32>
    %151 = vector.extract_strided_slice %4 {offsets = [0, 16], sizes = [4, 1], strides = [1, 1]} : vector<4x25xf32> to vector<4x1xf32>
    %152 = vector.extract_strided_slice %16 {offsets = [0, 48], sizes = [4, 256], strides = [1, 1]} : vector<4x320xf32> to vector<4x256xf32>
    %153 = vector.broadcast %151 : vector<4x1xf32> to vector<4x256xf32>
    %154 = arith.mulf %153, %152 : vector<4x256xf32>
    %155 = arith.addf %150, %154 : vector<4x256xf32>
    %156 = vector.extract_strided_slice %4 {offsets = [0, 17], sizes = [4, 1], strides = [1, 1]} : vector<4x25xf32> to vector<4x1xf32>
    %157 = vector.extract_strided_slice %8 {offsets = [0, 48], sizes = [4, 256], strides = [1, 1]} : vector<4x320xf32> to vector<4x256xf32>
    %158 = vector.broadcast %156 : vector<4x1xf32> to vector<4x256xf32>
    %159 = arith.mulf %158, %157 : vector<4x256xf32>
    %160 = arith.addf %155, %159 : vector<4x256xf32>
    %161 = vector.extract_strided_slice %4 {offsets = [0, 18], sizes = [4, 1], strides = [1, 1]} : vector<4x25xf32> to vector<4x1xf32>
    %162 = vector.extract_strided_slice %20 {offsets = [0, 48], sizes = [4, 256], strides = [1, 1]} : vector<4x320xf32> to vector<4x256xf32>
    %163 = vector.broadcast %161 : vector<4x1xf32> to vector<4x256xf32>
    %164 = arith.mulf %163, %162 : vector<4x256xf32>
    %165 = arith.addf %160, %164 : vector<4x256xf32>
    %166 = vector.extract_strided_slice %4 {offsets = [0, 19], sizes = [4, 1], strides = [1, 1]} : vector<4x25xf32> to vector<4x1xf32>
    %167 = vector.extract_strided_slice %24 {offsets = [0, 48], sizes = [4, 256], strides = [1, 1]} : vector<4x320xf32> to vector<4x256xf32>
    %168 = vector.broadcast %166 : vector<4x1xf32> to vector<4x256xf32>
    %169 = arith.mulf %168, %167 : vector<4x256xf32>
    %170 = arith.addf %165, %169 : vector<4x256xf32>
    %171 = vector.extract_strided_slice %4 {offsets = [0, 20], sizes = [4, 1], strides = [1, 1]} : vector<4x25xf32> to vector<4x1xf32>
    %172 = vector.extract_strided_slice %12 {offsets = [0, 64], sizes = [4, 256], strides = [1, 1]} : vector<4x320xf32> to vector<4x256xf32>
    %173 = vector.broadcast %171 : vector<4x1xf32> to vector<4x256xf32>
    %174 = arith.mulf %173, %172 : vector<4x256xf32>
    %175 = arith.addf %170, %174 : vector<4x256xf32>
    %176 = vector.extract_strided_slice %4 {offsets = [0, 21], sizes = [4, 1], strides = [1, 1]} : vector<4x25xf32> to vector<4x1xf32>
    %177 = vector.extract_strided_slice %16 {offsets = [0, 64], sizes = [4, 256], strides = [1, 1]} : vector<4x320xf32> to vector<4x256xf32>
    %178 = vector.broadcast %176 : vector<4x1xf32> to vector<4x256xf32>
    %179 = arith.mulf %178, %177 : vector<4x256xf32>
    %180 = arith.addf %175, %179 : vector<4x256xf32>
    %181 = vector.extract_strided_slice %4 {offsets = [0, 22], sizes = [4, 1], strides = [1, 1]} : vector<4x25xf32> to vector<4x1xf32>
    %182 = vector.extract_strided_slice %8 {offsets = [0, 64], sizes = [4, 256], strides = [1, 1]} : vector<4x320xf32> to vector<4x256xf32>
    %183 = vector.broadcast %181 : vector<4x1xf32> to vector<4x256xf32>
    %184 = arith.mulf %183, %182 : vector<4x256xf32>
    %185 = arith.addf %180, %184 : vector<4x256xf32>
    %186 = vector.extract_strided_slice %4 {offsets = [0, 23], sizes = [4, 1], strides = [1, 1]} : vector<4x25xf32> to vector<4x1xf32>
    %187 = vector.extract_strided_slice %20 {offsets = [0, 64], sizes = [4, 256], strides = [1, 1]} : vector<4x320xf32> to vector<4x256xf32>
    %188 = vector.broadcast %186 : vector<4x1xf32> to vector<4x256xf32>
    %189 = arith.mulf %188, %187 : vector<4x256xf32>
    %190 = arith.addf %185, %189 : vector<4x256xf32>
    %191 = vector.extract_strided_slice %4 {offsets = [0, 24], sizes = [4, 1], strides = [1, 1]} : vector<4x25xf32> to vector<4x1xf32>
    %192 = vector.extract_strided_slice %24 {offsets = [0, 64], sizes = [4, 256], strides = [1, 1]} : vector<4x320xf32> to vector<4x256xf32>
    %193 = vector.broadcast %191 : vector<4x1xf32> to vector<4x256xf32>
    %194 = arith.mulf %193, %192 : vector<4x256xf32>
    %195 = arith.addf %190, %194 : vector<4x256xf32>
    %cst_10 = arith.constant dense<0.000000e+00> : vector<4xf32>
    %196 = vector.multi_reduction <add>, %27, %cst_10 [1] : vector<4x256xf32> to vector<4xf32>
    %197 = vector.shape_cast %196 : vector<4xf32> to vector<4x1xf32>
    %cst_11 = arith.constant 3.906250e-03 : f32
    %198 = vector.broadcast %cst_11 : f32 to vector<4x1xf32>
    %199 = arith.mulf %197, %198 : vector<4x1xf32>
    %200 = vector.broadcast %199 : vector<4x1xf32> to vector<4x256xf32>
    %201 = arith.subf %27, %200 : vector<4x256xf32>
    %202 = arith.mulf %201, %201 : vector<4x256xf32>
    %cst_12 = arith.constant dense<0.000000e+00> : vector<4xf32>
    %203 = vector.multi_reduction <add>, %202, %cst_12 [1] : vector<4x256xf32> to vector<4xf32>
    %204 = vector.shape_cast %203 : vector<4xf32> to vector<4x1xf32>
    %c0_13 = arith.constant 0 : index
    %c0_14 = arith.constant 0 : index
    %c0_15 = arith.constant 0 : index
    %205 = vector.load %arg6[%c0_13, %c0_14, %c0_15] : memref<1x12x2xf32, #tpu.memory_space<vmem>>, vector<1x4x1xf32>
    %206 = vector.shape_cast %205 : vector<1x4x1xf32> to vector<4x1xf32>
    %207 = vector.shape_cast %199 : vector<4x1xf32> to vector<1x4x1xf32>
    tpu.vector_store %arg6[%c0_13, %c0_14, %c0_15], %207 {strides = array<i32>} : memref<1x12x2xf32, #tpu.memory_space<vmem>>, vector<1x4x1xf32>,
    %c0_16 = arith.constant 0 : index
    %c0_17 = arith.constant 0 : index
    %c1 = arith.constant 1 : index
    %208 = vector.load %arg6[%c0_16, %c0_17, %c1] : memref<1x12x2xf32, #tpu.memory_space<vmem>>, vector<1x4x1xf32>
    %209 = vector.shape_cast %208 : vector<1x4x1xf32> to vector<4x1xf32>
    %210 = vector.shape_cast %204 : vector<4x1xf32> to vector<1x4x1xf32>
    tpu.vector_store %arg6[%c0_16, %c0_17, %c1], %210 {strides = array<i32>} : memref<1x12x2xf32, #tpu.memory_space<vmem>>, vector<1x4x1xf32>,
    %cst_18 = arith.constant dense<0.000000e+00> : vector<4xf32>
    %211 = vector.multi_reduction <add>, %71, %cst_18 [1] : vector<4x256xf32> to vector<4xf32>
    %212 = vector.shape_cast %211 : vector<4xf32> to vector<4x1xf32>
    %cst_19 = arith.constant 3.906250e-03 : f32
    %213 = vector.broadcast %cst_19 : f32 to vector<4x1xf32>
    %214 = arith.mulf %212, %213 : vector<4x1xf32>
    %215 = vector.broadcast %214 : vector<4x1xf32> to vector<4x256xf32>
    %216 = arith.subf %71, %215 : vector<4x256xf32>
    %217 = arith.mulf %216, %216 : vector<4x256xf32>
    %cst_20 = arith.constant dense<0.000000e+00> : vector<4xf32>
    %218 = vector.multi_reduction <add>, %217, %cst_20 [1] : vector<4x256xf32> to vector<4xf32>
    %219 = vector.shape_cast %218 : vector<4xf32> to vector<4x1xf32>
    %c0_21 = arith.constant 0 : index
    %c4 = arith.constant 4 : index
    %c0_22 = arith.constant 0 : index
    %220 = vector.load %arg6[%c0_21, %c4, %c0_22] : memref<1x12x2xf32, #tpu.memory_space<vmem>>, vector<1x4x1xf32>
    %221 = vector.shape_cast %220 : vector<1x4x1xf32> to vector<4x1xf32>
    %222 = vector.shape_cast %214 : vector<4x1xf32> to vector<1x4x1xf32>
    tpu.vector_store %arg6[%c0_21, %c4, %c0_22], %222 {strides = array<i32>} : memref<1x12x2xf32, #tpu.memory_space<vmem>>, vector<1x4x1xf32>,
    %c0_23 = arith.constant 0 : index
    %c4_24 = arith.constant 4 : index
    %c1_25 = arith.constant 1 : index
    %223 = vector.load %arg6[%c0_23, %c4_24, %c1_25] : memref<1x12x2xf32, #tpu.memory_space<vmem>>, vector<1x4x1xf32>
    %224 = vector.shape_cast %223 : vector<1x4x1xf32> to vector<4x1xf32>
    %225 = vector.shape_cast %219 : vector<4x1xf32> to vector<1x4x1xf32>
    tpu.vector_store %arg6[%c0_23, %c4_24, %c1_25], %225 {strides = array<i32>} : memref<1x12x2xf32, #tpu.memory_space<vmem>>, vector<1x4x1xf32>,
    %cst_26 = arith.constant dense<0.000000e+00> : vector<4xf32>
    %226 = vector.multi_reduction <add>, %195, %cst_26 [1] : vector<4x256xf32> to vector<4xf32>
    %227 = vector.shape_cast %226 : vector<4xf32> to vector<4x1xf32>
    %cst_27 = arith.constant 3.906250e-03 : f32
    %228 = vector.broadcast %cst_27 : f32 to vector<4x1xf32>
    %229 = arith.mulf %227, %228 : vector<4x1xf32>
    %230 = vector.broadcast %229 : vector<4x1xf32> to vector<4x256xf32>
    %231 = arith.subf %195, %230 : vector<4x256xf32>
    %232 = arith.mulf %231, %231 : vector<4x256xf32>
    %cst_28 = arith.constant dense<0.000000e+00> : vector<4xf32>
    %233 = vector.multi_reduction <add>, %232, %cst_28 [1] : vector<4x256xf32> to vector<4xf32>
    %234 = vector.shape_cast %233 : vector<4xf32> to vector<4x1xf32>
    %c0_29 = arith.constant 0 : index
    %c8 = arith.constant 8 : index
    %c0_30 = arith.constant 0 : index
    %235 = vector.load %arg6[%c0_29, %c8, %c0_30] : memref<1x12x2xf32, #tpu.memory_space<vmem>>, vector<1x4x1xf32>
    %236 = vector.shape_cast %235 : vector<1x4x1xf32> to vector<4x1xf32>
    %237 = vector.shape_cast %229 : vector<4x1xf32> to vector<1x4x1xf32>
    tpu.vector_store %arg6[%c0_29, %c8, %c0_30], %237 {strides = array<i32>} : memref<1x12x2xf32, #tpu.memory_space<vmem>>, vector<1x4x1xf32>,
    %c0_31 = arith.constant 0 : index
    %c8_32 = arith.constant 8 : index
    %c1_33 = arith.constant 1 : index
    %238 = vector.load %arg6[%c0_31, %c8_32, %c1_33] : memref<1x12x2xf32, #tpu.memory_space<vmem>>, vector<1x4x1xf32>
    %239 = vector.shape_cast %238 : vector<1x4x1xf32> to vector<4x1xf32>
    %240 = vector.shape_cast %234 : vector<4x1xf32> to vector<1x4x1xf32>
    tpu.vector_store %arg6[%c0_31, %c8_32, %c1_33], %240 {strides = array<i32>} : memref<1x12x2xf32, #tpu.memory_space<vmem>>, vector<1x4x1xf32>,
    return
  }
  func.func @transform_0(%arg0: i32) -> (i32, i32) {
    %c0_i32 = arith.constant 0 : i32
    %c0_i32_0 = arith.constant 0 : i32
    %c0_i32_1 = arith.constant 0 : i32
    return %c0_i32, %c0_i32_0 : i32, i32
  }
  func.func @transform_1(%arg0: i32) -> (i32, i32, i32) {
    %c0_i32 = arith.constant 0 : i32
    %c0_i32_0 = arith.constant 0 : i32
    %c0_i32_1 = arith.constant 0 : i32
    return %arg0, %c0_i32, %c0_i32_0 : i32, i32, i32
  }
  func.func @transform_2(%arg0: i32) -> (i32, i32) {
    %c0_i32 = arith.constant 0 : i32
    %c0_i32_0 = arith.constant 0 : i32
    %c0_i32_1 = arith.constant 0 : i32
    return %c0_i32, %c0_i32_0 : i32, i32
  }
  func.func @transform_3(%arg0: i32) -> (i32, i32) {
    %c0_i32 = arith.constant 0 : i32
    %c0_i32_0 = arith.constant 0 : i32
    %c0_i32_1 = arith.constant 0 : i32
    return %c0_i32, %c0_i32_0 : i32, i32
  }
  func.func @transform_4(%arg0: i32) -> (i32, i32) {
    %c0_i32 = arith.constant 0 : i32
    %c0_i32_0 = arith.constant 0 : i32
    %c0_i32_1 = arith.constant 0 : i32
    return %c0_i32, %c0_i32_0 : i32, i32
  }
  func.func @transform_5(%arg0: i32) -> (i32, i32, i32) {
    %c0_i32 = arith.constant 0 : i32
    %c0_i32_0 = arith.constant 0 : i32
    %c0_i32_1 = arith.constant 0 : i32
    return %arg0, %c0_i32, %c0_i32_0 : i32, i32, i32
  }
}

module attributes {stable_mosaic.version = 11 : i64} {
  func.func @_fused_kernel(%arg0: i32, %arg1: memref<4x320xf32, #tpu.memory_space<vmem>>, %arg2: memref<1x4x256xf32, #tpu.memory_space<vmem>>, %arg3: memref<4x1xf32, #tpu.memory_space<vmem>>, %arg4: memref<4x9xf32, #tpu.memory_space<vmem>>, %arg5: memref<4x25xf32, #tpu.memory_space<vmem>>, %arg6: memref<12x1xf32, #tpu.memory_space<vmem>>, %arg7: memref<1x12x256xf32, #tpu.memory_space<vmem>>) attributes {dimension_semantics = [#tpu.dimension_semantics<parallel>], iteration_bounds = array<i64: 2>, scalar_prefetch = 0 : i64, scratch_operands = 0 : i64, tpu.core_type = #tpu.core_type<tc>, window_params = [{pipeline_mode = #tpu.pipeline_mode<synchronous>, transform_indices = @transform_0, window_bounds = array<i64: 4, 320>}, {transform_indices = @transform_1, window_bounds = array<i64: 1, 4, 256>}, {pipeline_mode = #tpu.pipeline_mode<synchronous>, transform_indices = @transform_2, window_bounds = array<i64: 4, 1>}, {pipeline_mode = #tpu.pipeline_mode<synchronous>, transform_indices = @transform_3, window_bounds = array<i64: 4, 9>}, {pipeline_mode = #tpu.pipeline_mode<synchronous>, transform_indices = @transform_4, window_bounds = array<i64: 4, 25>}, {pipeline_mode = #tpu.pipeline_mode<synchronous>, transform_indices = @transform_5, window_bounds = array<i64: 12, 1>}, {transform_indices = @transform_6, window_bounds = array<i64: 1, 12, 256>}]} {
    %c0 = arith.constant 0 : index
    %c0_0 = arith.constant 0 : index
    %c0_1 = arith.constant 0 : index
    %0 = vector.load %arg2[%c0, %c0_0, %c0_1] : memref<1x4x256xf32, #tpu.memory_space<vmem>>, vector<1x4x256xf32>
    %1 = vector.shape_cast %0 : vector<1x4x256xf32> to vector<4x256xf32>
    %c0_2 = arith.constant 0 : index
    %c0_3 = arith.constant 0 : index
    %2 = vector.load %arg3[%c0_2, %c0_3] : memref<4x1xf32, #tpu.memory_space<vmem>>, vector<4x1xf32>
    %c0_4 = arith.constant 0 : index
    %c0_5 = arith.constant 0 : index
    %3 = vector.load %arg4[%c0_4, %c0_5] : memref<4x9xf32, #tpu.memory_space<vmem>>, vector<4x9xf32>
    %c0_6 = arith.constant 0 : index
    %c0_7 = arith.constant 0 : index
    %4 = vector.load %arg5[%c0_6, %c0_7] : memref<4x25xf32, #tpu.memory_space<vmem>>, vector<4x25xf32>
    %c0_8 = arith.constant 0 : index
    %c0_9 = arith.constant 0 : index
    %5 = vector.load %arg1[%c0_8, %c0_9] : memref<4x320xf32, #tpu.memory_space<vmem>>, vector<4x320xf32>
    %cst = arith.constant 0.000000e+00 : f32
    %6 = vector.broadcast %cst : f32 to vector<4x128xf32>
    %7 = tpu.concatenate %6, %1, %6 in 1 : vector<4x128xf32>, vector<4x256xf32>, vector<4x128xf32> -> vector<4x512xf32>
    %8 = vector.extract_strided_slice %7 {offsets = [0, 96], sizes = [4, 320], strides = [1, 1]} : vector<4x512xf32> to vector<4x320xf32>
    %9 = vector.extract_strided_slice %7 {offsets = [0, 94], sizes = [4, 320], strides = [1, 1]} : vector<4x512xf32> to vector<4x320xf32>
    %10 = vector.extract_strided_slice %5 {offsets = [0, 0], sizes = [1, 320], strides = [1, 1]} : vector<4x320xf32> to vector<1x320xf32>
    %11 = vector.broadcast %10 : vector<1x320xf32> to vector<4x320xf32>
    %12 = arith.mulf %9, %11 : vector<4x320xf32>
    %13 = vector.extract_strided_slice %7 {offsets = [0, 95], sizes = [4, 320], strides = [1, 1]} : vector<4x512xf32> to vector<4x320xf32>
    %14 = vector.extract_strided_slice %5 {offsets = [1, 0], sizes = [1, 320], strides = [1, 1]} : vector<4x320xf32> to vector<1x320xf32>
    %15 = vector.broadcast %14 : vector<1x320xf32> to vector<4x320xf32>
    %16 = arith.mulf %13, %15 : vector<4x320xf32>
    %17 = vector.extract_strided_slice %7 {offsets = [0, 97], sizes = [4, 320], strides = [1, 1]} : vector<4x512xf32> to vector<4x320xf32>
    %18 = vector.extract_strided_slice %5 {offsets = [2, 0], sizes = [1, 320], strides = [1, 1]} : vector<4x320xf32> to vector<1x320xf32>
    %19 = vector.broadcast %18 : vector<1x320xf32> to vector<4x320xf32>
    %20 = arith.mulf %17, %19 : vector<4x320xf32>
    %21 = vector.extract_strided_slice %7 {offsets = [0, 98], sizes = [4, 320], strides = [1, 1]} : vector<4x512xf32> to vector<4x320xf32>
    %22 = vector.extract_strided_slice %5 {offsets = [3, 0], sizes = [1, 320], strides = [1, 1]} : vector<4x320xf32> to vector<1x320xf32>
    %23 = vector.broadcast %22 : vector<1x320xf32> to vector<4x320xf32>
    %24 = arith.mulf %21, %23 : vector<4x320xf32>
    %25 = vector.extract_strided_slice %8 {offsets = [0, 32], sizes = [4, 256], strides = [1, 1]} : vector<4x320xf32> to vector<4x256xf32>
    %26 = vector.broadcast %2 : vector<4x1xf32> to vector<4x256xf32>
    %27 = arith.mulf %26, %25 : vector<4x256xf32>
    %28 = vector.extract_strided_slice %3 {offsets = [0, 0], sizes = [4, 1], strides = [1, 1]} : vector<4x9xf32> to vector<4x1xf32>
    %29 = vector.extract_strided_slice %16 {offsets = [0, 16], sizes = [4, 256], strides = [1, 1]} : vector<4x320xf32> to vector<4x256xf32>
    %30 = vector.broadcast %28 : vector<4x1xf32> to vector<4x256xf32>
    %31 = arith.mulf %30, %29 : vector<4x256xf32>
    %32 = vector.extract_strided_slice %3 {offsets = [0, 1], sizes = [4, 1], strides = [1, 1]} : vector<4x9xf32> to vector<4x1xf32>
    %33 = vector.extract_strided_slice %8 {offsets = [0, 16], sizes = [4, 256], strides = [1, 1]} : vector<4x320xf32> to vector<4x256xf32>
    %34 = vector.broadcast %32 : vector<4x1xf32> to vector<4x256xf32>
    %35 = arith.mulf %34, %33 : vector<4x256xf32>
    %36 = arith.addf %31, %35 : vector<4x256xf32>
    %37 = vector.extract_strided_slice %3 {offsets = [0, 2], sizes = [4, 1], strides = [1, 1]} : vector<4x9xf32> to vector<4x1xf32>
    %38 = vector.extract_strided_slice %20 {offsets = [0, 16], sizes = [4, 256], strides = [1, 1]} : vector<4x320xf32> to vector<4x256xf32>
    %39 = vector.broadcast %37 : vector<4x1xf32> to vector<4x256xf32>
    %40 = arith.mulf %39, %38 : vector<4x256xf32>
    %41 = arith.addf %36, %40 : vector<4x256xf32>
    %42 = vector.extract_strided_slice %3 {offsets = [0, 3], sizes = [4, 1], strides = [1, 1]} : vector<4x9xf32> to vector<4x1xf32>
    %43 = vector.extract_strided_slice %16 {offsets = [0, 32], sizes = [4, 256], strides = [1, 1]} : vector<4x320xf32> to vector<4x256xf32>
    %44 = vector.broadcast %42 : vector<4x1xf32> to vector<4x256xf32>
    %45 = arith.mulf %44, %43 : vector<4x256xf32>
    %46 = arith.addf %41, %45 : vector<4x256xf32>
    %47 = vector.extract_strided_slice %3 {offsets = [0, 4], sizes = [4, 1], strides = [1, 1]} : vector<4x9xf32> to vector<4x1xf32>
    %48 = vector.extract_strided_slice %8 {offsets = [0, 32], sizes = [4, 256], strides = [1, 1]} : vector<4x320xf32> to vector<4x256xf32>
    %49 = vector.broadcast %47 : vector<4x1xf32> to vector<4x256xf32>
    %50 = arith.mulf %49, %48 : vector<4x256xf32>
    %51 = arith.addf %46, %50 : vector<4x256xf32>
    %52 = vector.extract_strided_slice %3 {offsets = [0, 5], sizes = [4, 1], strides = [1, 1]} : vector<4x9xf32> to vector<4x1xf32>
    %53 = vector.extract_strided_slice %20 {offsets = [0, 32], sizes = [4, 256], strides = [1, 1]} : vector<4x320xf32> to vector<4x256xf32>
    %54 = vector.broadcast %52 : vector<4x1xf32> to vector<4x256xf32>
    %55 = arith.mulf %54, %53 : vector<4x256xf32>
    %56 = arith.addf %51, %55 : vector<4x256xf32>
    %57 = vector.extract_strided_slice %3 {offsets = [0, 6], sizes = [4, 1], strides = [1, 1]} : vector<4x9xf32> to vector<4x1xf32>
    %58 = vector.extract_strided_slice %16 {offsets = [0, 48], sizes = [4, 256], strides = [1, 1]} : vector<4x320xf32> to vector<4x256xf32>
    %59 = vector.broadcast %57 : vector<4x1xf32> to vector<4x256xf32>
    %60 = arith.mulf %59, %58 : vector<4x256xf32>
    %61 = arith.addf %56, %60 : vector<4x256xf32>
    %62 = vector.extract_strided_slice %3 {offsets = [0, 7], sizes = [4, 1], strides = [1, 1]} : vector<4x9xf32> to vector<4x1xf32>
    %63 = vector.extract_strided_slice %8 {offsets = [0, 48], sizes = [4, 256], strides = [1, 1]} : vector<4x320xf32> to vector<4x256xf32>
    %64 = vector.broadcast %62 : vector<4x1xf32> to vector<4x256xf32>
    %65 = arith.mulf %64, %63 : vector<4x256xf32>
    %66 = arith.addf %61, %65 : vector<4x256xf32>
    %67 = vector.extract_strided_slice %3 {offsets = [0, 8], sizes = [4, 1], strides = [1, 1]} : vector<4x9xf32> to vector<4x1xf32>
    %68 = vector.extract_strided_slice %20 {offsets = [0, 48], sizes = [4, 256], strides = [1, 1]} : vector<4x320xf32> to vector<4x256xf32>
    %69 = vector.broadcast %67 : vector<4x1xf32> to vector<4x256xf32>
    %70 = arith.mulf %69, %68 : vector<4x256xf32>
    %71 = arith.addf %66, %70 : vector<4x256xf32>
    %72 = vector.extract_strided_slice %4 {offsets = [0, 0], sizes = [4, 1], strides = [1, 1]} : vector<4x25xf32> to vector<4x1xf32>
    %73 = vector.extract_strided_slice %12 {offsets = [0, 0], sizes = [4, 256], strides = [1, 1]} : vector<4x320xf32> to vector<4x256xf32>
    %74 = vector.broadcast %72 : vector<4x1xf32> to vector<4x256xf32>
    %75 = arith.mulf %74, %73 : vector<4x256xf32>
    %76 = vector.extract_strided_slice %4 {offsets = [0, 1], sizes = [4, 1], strides = [1, 1]} : vector<4x25xf32> to vector<4x1xf32>
    %77 = vector.extract_strided_slice %16 {offsets = [0, 0], sizes = [4, 256], strides = [1, 1]} : vector<4x320xf32> to vector<4x256xf32>
    %78 = vector.broadcast %76 : vector<4x1xf32> to vector<4x256xf32>
    %79 = arith.mulf %78, %77 : vector<4x256xf32>
    %80 = arith.addf %75, %79 : vector<4x256xf32>
    %81 = vector.extract_strided_slice %4 {offsets = [0, 2], sizes = [4, 1], strides = [1, 1]} : vector<4x25xf32> to vector<4x1xf32>
    %82 = vector.extract_strided_slice %8 {offsets = [0, 0], sizes = [4, 256], strides = [1, 1]} : vector<4x320xf32> to vector<4x256xf32>
    %83 = vector.broadcast %81 : vector<4x1xf32> to vector<4x256xf32>
    %84 = arith.mulf %83, %82 : vector<4x256xf32>
    %85 = arith.addf %80, %84 : vector<4x256xf32>
    %86 = vector.extract_strided_slice %4 {offsets = [0, 3], sizes = [4, 1], strides = [1, 1]} : vector<4x25xf32> to vector<4x1xf32>
    %87 = vector.extract_strided_slice %20 {offsets = [0, 0], sizes = [4, 256], strides = [1, 1]} : vector<4x320xf32> to vector<4x256xf32>
    %88 = vector.broadcast %86 : vector<4x1xf32> to vector<4x256xf32>
    %89 = arith.mulf %88, %87 : vector<4x256xf32>
    %90 = arith.addf %85, %89 : vector<4x256xf32>
    %91 = vector.extract_strided_slice %4 {offsets = [0, 4], sizes = [4, 1], strides = [1, 1]} : vector<4x25xf32> to vector<4x1xf32>
    %92 = vector.extract_strided_slice %24 {offsets = [0, 0], sizes = [4, 256], strides = [1, 1]} : vector<4x320xf32> to vector<4x256xf32>
    %93 = vector.broadcast %91 : vector<4x1xf32> to vector<4x256xf32>
    %94 = arith.mulf %93, %92 : vector<4x256xf32>
    %95 = arith.addf %90, %94 : vector<4x256xf32>
    %96 = vector.extract_strided_slice %4 {offsets = [0, 5], sizes = [4, 1], strides = [1, 1]} : vector<4x25xf32> to vector<4x1xf32>
    %97 = vector.extract_strided_slice %12 {offsets = [0, 16], sizes = [4, 256], strides = [1, 1]} : vector<4x320xf32> to vector<4x256xf32>
    %98 = vector.broadcast %96 : vector<4x1xf32> to vector<4x256xf32>
    %99 = arith.mulf %98, %97 : vector<4x256xf32>
    %100 = arith.addf %95, %99 : vector<4x256xf32>
    %101 = vector.extract_strided_slice %4 {offsets = [0, 6], sizes = [4, 1], strides = [1, 1]} : vector<4x25xf32> to vector<4x1xf32>
    %102 = vector.extract_strided_slice %16 {offsets = [0, 16], sizes = [4, 256], strides = [1, 1]} : vector<4x320xf32> to vector<4x256xf32>
    %103 = vector.broadcast %101 : vector<4x1xf32> to vector<4x256xf32>
    %104 = arith.mulf %103, %102 : vector<4x256xf32>
    %105 = arith.addf %100, %104 : vector<4x256xf32>
    %106 = vector.extract_strided_slice %4 {offsets = [0, 7], sizes = [4, 1], strides = [1, 1]} : vector<4x25xf32> to vector<4x1xf32>
    %107 = vector.extract_strided_slice %8 {offsets = [0, 16], sizes = [4, 256], strides = [1, 1]} : vector<4x320xf32> to vector<4x256xf32>
    %108 = vector.broadcast %106 : vector<4x1xf32> to vector<4x256xf32>
    %109 = arith.mulf %108, %107 : vector<4x256xf32>
    %110 = arith.addf %105, %109 : vector<4x256xf32>
    %111 = vector.extract_strided_slice %4 {offsets = [0, 8], sizes = [4, 1], strides = [1, 1]} : vector<4x25xf32> to vector<4x1xf32>
    %112 = vector.extract_strided_slice %20 {offsets = [0, 16], sizes = [4, 256], strides = [1, 1]} : vector<4x320xf32> to vector<4x256xf32>
    %113 = vector.broadcast %111 : vector<4x1xf32> to vector<4x256xf32>
    %114 = arith.mulf %113, %112 : vector<4x256xf32>
    %115 = arith.addf %110, %114 : vector<4x256xf32>
    %116 = vector.extract_strided_slice %4 {offsets = [0, 9], sizes = [4, 1], strides = [1, 1]} : vector<4x25xf32> to vector<4x1xf32>
    %117 = vector.extract_strided_slice %24 {offsets = [0, 16], sizes = [4, 256], strides = [1, 1]} : vector<4x320xf32> to vector<4x256xf32>
    %118 = vector.broadcast %116 : vector<4x1xf32> to vector<4x256xf32>
    %119 = arith.mulf %118, %117 : vector<4x256xf32>
    %120 = arith.addf %115, %119 : vector<4x256xf32>
    %121 = vector.extract_strided_slice %4 {offsets = [0, 10], sizes = [4, 1], strides = [1, 1]} : vector<4x25xf32> to vector<4x1xf32>
    %122 = vector.extract_strided_slice %12 {offsets = [0, 32], sizes = [4, 256], strides = [1, 1]} : vector<4x320xf32> to vector<4x256xf32>
    %123 = vector.broadcast %121 : vector<4x1xf32> to vector<4x256xf32>
    %124 = arith.mulf %123, %122 : vector<4x256xf32>
    %125 = arith.addf %120, %124 : vector<4x256xf32>
    %126 = vector.extract_strided_slice %4 {offsets = [0, 11], sizes = [4, 1], strides = [1, 1]} : vector<4x25xf32> to vector<4x1xf32>
    %127 = vector.extract_strided_slice %16 {offsets = [0, 32], sizes = [4, 256], strides = [1, 1]} : vector<4x320xf32> to vector<4x256xf32>
    %128 = vector.broadcast %126 : vector<4x1xf32> to vector<4x256xf32>
    %129 = arith.mulf %128, %127 : vector<4x256xf32>
    %130 = arith.addf %125, %129 : vector<4x256xf32>
    %131 = vector.extract_strided_slice %4 {offsets = [0, 12], sizes = [4, 1], strides = [1, 1]} : vector<4x25xf32> to vector<4x1xf32>
    %132 = vector.extract_strided_slice %8 {offsets = [0, 32], sizes = [4, 256], strides = [1, 1]} : vector<4x320xf32> to vector<4x256xf32>
    %133 = vector.broadcast %131 : vector<4x1xf32> to vector<4x256xf32>
    %134 = arith.mulf %133, %132 : vector<4x256xf32>
    %135 = arith.addf %130, %134 : vector<4x256xf32>
    %136 = vector.extract_strided_slice %4 {offsets = [0, 13], sizes = [4, 1], strides = [1, 1]} : vector<4x25xf32> to vector<4x1xf32>
    %137 = vector.extract_strided_slice %20 {offsets = [0, 32], sizes = [4, 256], strides = [1, 1]} : vector<4x320xf32> to vector<4x256xf32>
    %138 = vector.broadcast %136 : vector<4x1xf32> to vector<4x256xf32>
    %139 = arith.mulf %138, %137 : vector<4x256xf32>
    %140 = arith.addf %135, %139 : vector<4x256xf32>
    %141 = vector.extract_strided_slice %4 {offsets = [0, 14], sizes = [4, 1], strides = [1, 1]} : vector<4x25xf32> to vector<4x1xf32>
    %142 = vector.extract_strided_slice %24 {offsets = [0, 32], sizes = [4, 256], strides = [1, 1]} : vector<4x320xf32> to vector<4x256xf32>
    %143 = vector.broadcast %141 : vector<4x1xf32> to vector<4x256xf32>
    %144 = arith.mulf %143, %142 : vector<4x256xf32>
    %145 = arith.addf %140, %144 : vector<4x256xf32>
    %146 = vector.extract_strided_slice %4 {offsets = [0, 15], sizes = [4, 1], strides = [1, 1]} : vector<4x25xf32> to vector<4x1xf32>
    %147 = vector.extract_strided_slice %12 {offsets = [0, 48], sizes = [4, 256], strides = [1, 1]} : vector<4x320xf32> to vector<4x256xf32>
    %148 = vector.broadcast %146 : vector<4x1xf32> to vector<4x256xf32>
    %149 = arith.mulf %148, %147 : vector<4x256xf32>
    %150 = arith.addf %145, %149 : vector<4x256xf32>
    %151 = vector.extract_strided_slice %4 {offsets = [0, 16], sizes = [4, 1], strides = [1, 1]} : vector<4x25xf32> to vector<4x1xf32>
    %152 = vector.extract_strided_slice %16 {offsets = [0, 48], sizes = [4, 256], strides = [1, 1]} : vector<4x320xf32> to vector<4x256xf32>
    %153 = vector.broadcast %151 : vector<4x1xf32> to vector<4x256xf32>
    %154 = arith.mulf %153, %152 : vector<4x256xf32>
    %155 = arith.addf %150, %154 : vector<4x256xf32>
    %156 = vector.extract_strided_slice %4 {offsets = [0, 17], sizes = [4, 1], strides = [1, 1]} : vector<4x25xf32> to vector<4x1xf32>
    %157 = vector.extract_strided_slice %8 {offsets = [0, 48], sizes = [4, 256], strides = [1, 1]} : vector<4x320xf32> to vector<4x256xf32>
    %158 = vector.broadcast %156 : vector<4x1xf32> to vector<4x256xf32>
    %159 = arith.mulf %158, %157 : vector<4x256xf32>
    %160 = arith.addf %155, %159 : vector<4x256xf32>
    %161 = vector.extract_strided_slice %4 {offsets = [0, 18], sizes = [4, 1], strides = [1, 1]} : vector<4x25xf32> to vector<4x1xf32>
    %162 = vector.extract_strided_slice %20 {offsets = [0, 48], sizes = [4, 256], strides = [1, 1]} : vector<4x320xf32> to vector<4x256xf32>
    %163 = vector.broadcast %161 : vector<4x1xf32> to vector<4x256xf32>
    %164 = arith.mulf %163, %162 : vector<4x256xf32>
    %165 = arith.addf %160, %164 : vector<4x256xf32>
    %166 = vector.extract_strided_slice %4 {offsets = [0, 19], sizes = [4, 1], strides = [1, 1]} : vector<4x25xf32> to vector<4x1xf32>
    %167 = vector.extract_strided_slice %24 {offsets = [0, 48], sizes = [4, 256], strides = [1, 1]} : vector<4x320xf32> to vector<4x256xf32>
    %168 = vector.broadcast %166 : vector<4x1xf32> to vector<4x256xf32>
    %169 = arith.mulf %168, %167 : vector<4x256xf32>
    %170 = arith.addf %165, %169 : vector<4x256xf32>
    %171 = vector.extract_strided_slice %4 {offsets = [0, 20], sizes = [4, 1], strides = [1, 1]} : vector<4x25xf32> to vector<4x1xf32>
    %172 = vector.extract_strided_slice %12 {offsets = [0, 64], sizes = [4, 256], strides = [1, 1]} : vector<4x320xf32> to vector<4x256xf32>
    %173 = vector.broadcast %171 : vector<4x1xf32> to vector<4x256xf32>
    %174 = arith.mulf %173, %172 : vector<4x256xf32>
    %175 = arith.addf %170, %174 : vector<4x256xf32>
    %176 = vector.extract_strided_slice %4 {offsets = [0, 21], sizes = [4, 1], strides = [1, 1]} : vector<4x25xf32> to vector<4x1xf32>
    %177 = vector.extract_strided_slice %16 {offsets = [0, 64], sizes = [4, 256], strides = [1, 1]} : vector<4x320xf32> to vector<4x256xf32>
    %178 = vector.broadcast %176 : vector<4x1xf32> to vector<4x256xf32>
    %179 = arith.mulf %178, %177 : vector<4x256xf32>
    %180 = arith.addf %175, %179 : vector<4x256xf32>
    %181 = vector.extract_strided_slice %4 {offsets = [0, 22], sizes = [4, 1], strides = [1, 1]} : vector<4x25xf32> to vector<4x1xf32>
    %182 = vector.extract_strided_slice %8 {offsets = [0, 64], sizes = [4, 256], strides = [1, 1]} : vector<4x320xf32> to vector<4x256xf32>
    %183 = vector.broadcast %181 : vector<4x1xf32> to vector<4x256xf32>
    %184 = arith.mulf %183, %182 : vector<4x256xf32>
    %185 = arith.addf %180, %184 : vector<4x256xf32>
    %186 = vector.extract_strided_slice %4 {offsets = [0, 23], sizes = [4, 1], strides = [1, 1]} : vector<4x25xf32> to vector<4x1xf32>
    %187 = vector.extract_strided_slice %20 {offsets = [0, 64], sizes = [4, 256], strides = [1, 1]} : vector<4x320xf32> to vector<4x256xf32>
    %188 = vector.broadcast %186 : vector<4x1xf32> to vector<4x256xf32>
    %189 = arith.mulf %188, %187 : vector<4x256xf32>
    %190 = arith.addf %185, %189 : vector<4x256xf32>
    %191 = vector.extract_strided_slice %4 {offsets = [0, 24], sizes = [4, 1], strides = [1, 1]} : vector<4x25xf32> to vector<4x1xf32>
    %192 = vector.extract_strided_slice %24 {offsets = [0, 64], sizes = [4, 256], strides = [1, 1]} : vector<4x320xf32> to vector<4x256xf32>
    %193 = vector.broadcast %191 : vector<4x1xf32> to vector<4x256xf32>
    %194 = arith.mulf %193, %192 : vector<4x256xf32>
    %195 = arith.addf %190, %194 : vector<4x256xf32>
    %c0_10 = arith.constant 0 : index
    %c0_11 = arith.constant 0 : index
    %196 = vector.load %arg6[%c0_10, %c0_11] : memref<12x1xf32, #tpu.memory_space<vmem>>, vector<4x1xf32>
    %197 = vector.broadcast %196 : vector<4x1xf32> to vector<4x256xf32>
    %198 = arith.addf %27, %197 : vector<4x256xf32>
    %cst_12 = arith.constant 0.000000e+00 : f32
    %199 = vector.broadcast %cst_12 : f32 to vector<4x256xf32>
    %200 = arith.maximumf %198, %199 : vector<4x256xf32>
    %201 = vector.extract_strided_slice %200 {offsets = [0, 0], sizes = [1, 256], strides = [1, 1]} : vector<4x256xf32> to vector<1x256xf32>
    %202 = vector.shape_cast %201 : vector<1x256xf32> to vector<256xf32>
    %c0_13 = arith.constant 0 : index
    %c0_14 = arith.constant 0 : index
    %c0_15 = arith.constant 0 : index
    %203 = vector.load %arg7[%c0_13, %c0_14, %c0_15] : memref<1x12x256xf32, #tpu.memory_space<vmem>>, vector<1x1x256xf32>
    %204 = vector.shape_cast %203 : vector<1x1x256xf32> to vector<256xf32>
    %205 = vector.shape_cast %202 : vector<256xf32> to vector<1x1x256xf32>
    tpu.vector_store %arg7[%c0_13, %c0_14, %c0_15], %205 {strides = array<i32>} : memref<1x12x256xf32, #tpu.memory_space<vmem>>, vector<1x1x256xf32>,
    %206 = vector.extract_strided_slice %200 {offsets = [1, 0], sizes = [1, 256], strides = [1, 1]} : vector<4x256xf32> to vector<1x256xf32>
    %207 = vector.shape_cast %206 : vector<1x256xf32> to vector<256xf32>
    %c0_16 = arith.constant 0 : index
    %c4 = arith.constant 4 : index
    %c0_17 = arith.constant 0 : index
    %208 = vector.load %arg7[%c0_16, %c4, %c0_17] : memref<1x12x256xf32, #tpu.memory_space<vmem>>, vector<1x1x256xf32>
    %209 = vector.shape_cast %208 : vector<1x1x256xf32> to vector<256xf32>
    %210 = vector.shape_cast %207 : vector<256xf32> to vector<1x1x256xf32>
    tpu.vector_store %arg7[%c0_16, %c4, %c0_17], %210 {strides = array<i32>} : memref<1x12x256xf32, #tpu.memory_space<vmem>>, vector<1x1x256xf32>,
    %211 = vector.extract_strided_slice %200 {offsets = [2, 0], sizes = [1, 256], strides = [1, 1]} : vector<4x256xf32> to vector<1x256xf32>
    %212 = vector.shape_cast %211 : vector<1x256xf32> to vector<256xf32>
    %c0_18 = arith.constant 0 : index
    %c8 = arith.constant 8 : index
    %c0_19 = arith.constant 0 : index
    %213 = vector.load %arg7[%c0_18, %c8, %c0_19] : memref<1x12x256xf32, #tpu.memory_space<vmem>>, vector<1x1x256xf32>
    %214 = vector.shape_cast %213 : vector<1x1x256xf32> to vector<256xf32>
    %215 = vector.shape_cast %212 : vector<256xf32> to vector<1x1x256xf32>
    tpu.vector_store %arg7[%c0_18, %c8, %c0_19], %215 {strides = array<i32>} : memref<1x12x256xf32, #tpu.memory_space<vmem>>, vector<1x1x256xf32>,
    %216 = vector.extract_strided_slice %200 {offsets = [3, 0], sizes = [1, 256], strides = [1, 1]} : vector<4x256xf32> to vector<1x256xf32>
    %217 = vector.shape_cast %216 : vector<1x256xf32> to vector<256xf32>
    %c0_20 = arith.constant 0 : index
    %c1 = arith.constant 1 : index
    %c0_21 = arith.constant 0 : index
    %218 = vector.load %arg7[%c0_20, %c1, %c0_21] : memref<1x12x256xf32, #tpu.memory_space<vmem>>, vector<1x1x256xf32>
    %219 = vector.shape_cast %218 : vector<1x1x256xf32> to vector<256xf32>
    %220 = vector.shape_cast %217 : vector<256xf32> to vector<1x1x256xf32>
    tpu.vector_store %arg7[%c0_20, %c1, %c0_21], %220 {strides = array<i32>} : memref<1x12x256xf32, #tpu.memory_space<vmem>>, vector<1x1x256xf32>,
    %c4_22 = arith.constant 4 : index
    %c0_23 = arith.constant 0 : index
    %221 = vector.load %arg6[%c4_22, %c0_23] : memref<12x1xf32, #tpu.memory_space<vmem>>, vector<4x1xf32>
    %222 = vector.broadcast %221 : vector<4x1xf32> to vector<4x256xf32>
    %223 = arith.addf %71, %222 : vector<4x256xf32>
    %cst_24 = arith.constant 0.000000e+00 : f32
    %224 = vector.broadcast %cst_24 : f32 to vector<4x256xf32>
    %225 = arith.maximumf %223, %224 : vector<4x256xf32>
    %226 = vector.extract_strided_slice %225 {offsets = [0, 0], sizes = [1, 256], strides = [1, 1]} : vector<4x256xf32> to vector<1x256xf32>
    %227 = vector.shape_cast %226 : vector<1x256xf32> to vector<256xf32>
    %c0_25 = arith.constant 0 : index
    %c5 = arith.constant 5 : index
    %c0_26 = arith.constant 0 : index
    %228 = vector.load %arg7[%c0_25, %c5, %c0_26] : memref<1x12x256xf32, #tpu.memory_space<vmem>>, vector<1x1x256xf32>
    %229 = vector.shape_cast %228 : vector<1x1x256xf32> to vector<256xf32>
    %230 = vector.shape_cast %227 : vector<256xf32> to vector<1x1x256xf32>
    tpu.vector_store %arg7[%c0_25, %c5, %c0_26], %230 {strides = array<i32>} : memref<1x12x256xf32, #tpu.memory_space<vmem>>, vector<1x1x256xf32>,
    %231 = vector.extract_strided_slice %225 {offsets = [1, 0], sizes = [1, 256], strides = [1, 1]} : vector<4x256xf32> to vector<1x256xf32>
    %232 = vector.shape_cast %231 : vector<1x256xf32> to vector<256xf32>
    %c0_27 = arith.constant 0 : index
    %c9 = arith.constant 9 : index
    %c0_28 = arith.constant 0 : index
    %233 = vector.load %arg7[%c0_27, %c9, %c0_28] : memref<1x12x256xf32, #tpu.memory_space<vmem>>, vector<1x1x256xf32>
    %234 = vector.shape_cast %233 : vector<1x1x256xf32> to vector<256xf32>
    %235 = vector.shape_cast %232 : vector<256xf32> to vector<1x1x256xf32>
    tpu.vector_store %arg7[%c0_27, %c9, %c0_28], %235 {strides = array<i32>} : memref<1x12x256xf32, #tpu.memory_space<vmem>>, vector<1x1x256xf32>,
    %236 = vector.extract_strided_slice %225 {offsets = [2, 0], sizes = [1, 256], strides = [1, 1]} : vector<4x256xf32> to vector<1x256xf32>
    %237 = vector.shape_cast %236 : vector<1x256xf32> to vector<256xf32>
    %c0_29 = arith.constant 0 : index
    %c2 = arith.constant 2 : index
    %c0_30 = arith.constant 0 : index
    %238 = vector.load %arg7[%c0_29, %c2, %c0_30] : memref<1x12x256xf32, #tpu.memory_space<vmem>>, vector<1x1x256xf32>
    %239 = vector.shape_cast %238 : vector<1x1x256xf32> to vector<256xf32>
    %240 = vector.shape_cast %237 : vector<256xf32> to vector<1x1x256xf32>
    tpu.vector_store %arg7[%c0_29, %c2, %c0_30], %240 {strides = array<i32>} : memref<1x12x256xf32, #tpu.memory_space<vmem>>, vector<1x1x256xf32>,
    %241 = vector.extract_strided_slice %225 {offsets = [3, 0], sizes = [1, 256], strides = [1, 1]} : vector<4x256xf32> to vector<1x256xf32>
    %242 = vector.shape_cast %241 : vector<1x256xf32> to vector<256xf32>
    %c0_31 = arith.constant 0 : index
    %c6 = arith.constant 6 : index
    %c0_32 = arith.constant 0 : index
    %243 = vector.load %arg7[%c0_31, %c6, %c0_32] : memref<1x12x256xf32, #tpu.memory_space<vmem>>, vector<1x1x256xf32>
    %244 = vector.shape_cast %243 : vector<1x1x256xf32> to vector<256xf32>
    %245 = vector.shape_cast %242 : vector<256xf32> to vector<1x1x256xf32>
    tpu.vector_store %arg7[%c0_31, %c6, %c0_32], %245 {strides = array<i32>} : memref<1x12x256xf32, #tpu.memory_space<vmem>>, vector<1x1x256xf32>,
    %c8_33 = arith.constant 8 : index
    %c0_34 = arith.constant 0 : index
    %246 = vector.load %arg6[%c8_33, %c0_34] : memref<12x1xf32, #tpu.memory_space<vmem>>, vector<4x1xf32>
    %247 = vector.broadcast %246 : vector<4x1xf32> to vector<4x256xf32>
    %248 = arith.addf %195, %247 : vector<4x256xf32>
    %cst_35 = arith.constant 0.000000e+00 : f32
    %249 = vector.broadcast %cst_35 : f32 to vector<4x256xf32>
    %250 = arith.maximumf %248, %249 : vector<4x256xf32>
    %251 = vector.extract_strided_slice %250 {offsets = [0, 0], sizes = [1, 256], strides = [1, 1]} : vector<4x256xf32> to vector<1x256xf32>
    %252 = vector.shape_cast %251 : vector<1x256xf32> to vector<256xf32>
    %c0_36 = arith.constant 0 : index
    %c10 = arith.constant 10 : index
    %c0_37 = arith.constant 0 : index
    %253 = vector.load %arg7[%c0_36, %c10, %c0_37] : memref<1x12x256xf32, #tpu.memory_space<vmem>>, vector<1x1x256xf32>
    %254 = vector.shape_cast %253 : vector<1x1x256xf32> to vector<256xf32>
    %255 = vector.shape_cast %252 : vector<256xf32> to vector<1x1x256xf32>
    tpu.vector_store %arg7[%c0_36, %c10, %c0_37], %255 {strides = array<i32>} : memref<1x12x256xf32, #tpu.memory_space<vmem>>, vector<1x1x256xf32>,
    %256 = vector.extract_strided_slice %250 {offsets = [1, 0], sizes = [1, 256], strides = [1, 1]} : vector<4x256xf32> to vector<1x256xf32>
    %257 = vector.shape_cast %256 : vector<1x256xf32> to vector<256xf32>
    %c0_38 = arith.constant 0 : index
    %c3 = arith.constant 3 : index
    %c0_39 = arith.constant 0 : index
    %258 = vector.load %arg7[%c0_38, %c3, %c0_39] : memref<1x12x256xf32, #tpu.memory_space<vmem>>, vector<1x1x256xf32>
    %259 = vector.shape_cast %258 : vector<1x1x256xf32> to vector<256xf32>
    %260 = vector.shape_cast %257 : vector<256xf32> to vector<1x1x256xf32>
    tpu.vector_store %arg7[%c0_38, %c3, %c0_39], %260 {strides = array<i32>} : memref<1x12x256xf32, #tpu.memory_space<vmem>>, vector<1x1x256xf32>,
    %261 = vector.extract_strided_slice %250 {offsets = [2, 0], sizes = [1, 256], strides = [1, 1]} : vector<4x256xf32> to vector<1x256xf32>
    %262 = vector.shape_cast %261 : vector<1x256xf32> to vector<256xf32>
    %c0_40 = arith.constant 0 : index
    %c7 = arith.constant 7 : index
    %c0_41 = arith.constant 0 : index
    %263 = vector.load %arg7[%c0_40, %c7, %c0_41] : memref<1x12x256xf32, #tpu.memory_space<vmem>>, vector<1x1x256xf32>
    %264 = vector.shape_cast %263 : vector<1x1x256xf32> to vector<256xf32>
    %265 = vector.shape_cast %262 : vector<256xf32> to vector<1x1x256xf32>
    tpu.vector_store %arg7[%c0_40, %c7, %c0_41], %265 {strides = array<i32>} : memref<1x12x256xf32, #tpu.memory_space<vmem>>, vector<1x1x256xf32>,
    %266 = vector.extract_strided_slice %250 {offsets = [3, 0], sizes = [1, 256], strides = [1, 1]} : vector<4x256xf32> to vector<1x256xf32>
    %267 = vector.shape_cast %266 : vector<1x256xf32> to vector<256xf32>
    %c0_42 = arith.constant 0 : index
    %c11 = arith.constant 11 : index
    %c0_43 = arith.constant 0 : index
    %268 = vector.load %arg7[%c0_42, %c11, %c0_43] : memref<1x12x256xf32, #tpu.memory_space<vmem>>, vector<1x1x256xf32>
    %269 = vector.shape_cast %268 : vector<1x1x256xf32> to vector<256xf32>
    %270 = vector.shape_cast %267 : vector<256xf32> to vector<1x1x256xf32>
    tpu.vector_store %arg7[%c0_42, %c11, %c0_43], %270 {strides = array<i32>} : memref<1x12x256xf32, #tpu.memory_space<vmem>>, vector<1x1x256xf32>,
    return
  }
  func.func @transform_0(%arg0: i32) -> (i32, i32) {
    %c0_i32 = arith.constant 0 : i32
    %c0_i32_0 = arith.constant 0 : i32
    %c0_i32_1 = arith.constant 0 : i32
    return %c0_i32, %c0_i32_0 : i32, i32
  }
  func.func @transform_1(%arg0: i32) -> (i32, i32, i32) {
    %c0_i32 = arith.constant 0 : i32
    %c0_i32_0 = arith.constant 0 : i32
    %c0_i32_1 = arith.constant 0 : i32
    return %arg0, %c0_i32, %c0_i32_0 : i32, i32, i32
  }
  func.func @transform_2(%arg0: i32) -> (i32, i32) {
    %c0_i32 = arith.constant 0 : i32
    %c0_i32_0 = arith.constant 0 : i32
    %c0_i32_1 = arith.constant 0 : i32
    return %c0_i32, %c0_i32_0 : i32, i32
  }
  func.func @transform_3(%arg0: i32) -> (i32, i32) {
    %c0_i32 = arith.constant 0 : i32
    %c0_i32_0 = arith.constant 0 : i32
    %c0_i32_1 = arith.constant 0 : i32
    return %c0_i32, %c0_i32_0 : i32, i32
  }
  func.func @transform_4(%arg0: i32) -> (i32, i32) {
    %c0_i32 = arith.constant 0 : i32
    %c0_i32_0 = arith.constant 0 : i32
    %c0_i32_1 = arith.constant 0 : i32
    return %c0_i32, %c0_i32_0 : i32, i32
  }
  func.func @transform_5(%arg0: i32) -> (i32, i32) {
    %c0_i32 = arith.constant 0 : i32
    %c0_i32_0 = arith.constant 0 : i32
    %c0_i32_1 = arith.constant 0 : i32
    return %c0_i32, %c0_i32_0 : i32, i32
  }
  func.func @transform_6(%arg0: i32) -> (i32, i32, i32) {
    %c0_i32 = arith.constant 0 : i32
    %c0_i32_0 = arith.constant 0 : i32
    %c0_i32_1 = arith.constant 0 : i32
    return %arg0, %c0_i32, %c0_i32_0 : i32, i32, i32
  }
}

</mosaic_0001>

<bundles_post_ra>
// kernel: mspdc_forward.2
= control target key start
LH: loop header
LB: loop body
LE: loop exit
PB: predicated region body
PF: predicated region fallthrough
CT: control target
= control target key end

     0   :  { %10 = vsyncpa [#allocation3], 0  ;;  %s2831_s0 = inlined_call_operand.hbm [shape: f32[4,320], index: 0, kind: input, shape index: {}]   ;;  %s2832_s1 = inlined_call_operand.hbm [shape: f32[2,4,256], index: 1, kind: input, shape index: {}]   ;;  %s2833_s2 = inlined_call_operand.hbm [shape: f32[4,1], index: 2, kind: input, shape index: {}]   ;;  %s2834_s3 = inlined_call_operand.hbm [shape: f32[4,9], index: 3, kind: input, shape index: {}]   ;;  %s2835_s4 = inlined_call_operand.hbm [shape: f32[4,25], index: 4, kind: input, shape index: {}]   ;;  %s2836_s5 = inlined_call_operand.hbm [shape: f32[2,12,2], index: 5, kind: output, shape index: {}]  }
   0x1   :  { %11 = vsyncpa [#allocation6], 0 }
   0x2   :  { %13 = vsyncpa [#allocation6 + $0x1], 0 }
   0x3   :  { %14 = vsyncpa [#allocation9], 0 }
   0x4   :  { %15 = vsyncpa [#allocation4], 0 }
   0x5   :  { %17 = vsyncpa [#allocation4 + $0x1], 0  ;;  %s2047_s18 = smov 0   ;;  %s2049_s19 = smov 0  }
   0x6   :  { %s2051_s20 = smov 0   ;;  %s2053_s21 = smov 0  }
   0x7 LB: > { %s1956_s22 = smov [#allocation7]   ;;  %s2068_s24 = sadd.s32 4294967295, %s1954_s21   ;;  %s1954_s21 = sphi %s2053_s21, %s2861_s21   ;;  %s1950_s20 = sphi %s2051_s20, %s2860_s20   ;;  %s1946_s19 = sphi %s2049_s19, %s2859_s19   ;;  %s1942_s18 = sphi %s2047_s18, %s2858_s18  }
   0x8   : > { %s188_s23 = sshll.u32 %s1956_s22, 4  ;;  %p1533_p0 = scmp.ge.s32.totalorder %s1954_s21, 1  ;;  %s2074_s23 = int_to_ptr.vmem [resolvable:$true] %s188_s23 }
   0x9   : > { %p2837_p1 = scmp.eq.s32.totalorder %s2068_s24, 0  ;;  %p151_p2 = scmp.eq.s32.totalorder %s2068_s24, 1 }
   0xa   : > { %p164_p3 = scmp.lt.s32.totalorder %s1954_s21, 3  ;;  %s1957_s26 = smov [#allocation8]  }
   0xb   : > { %s199_s27 = sshll.u32 %s1957_s26, 4  ;;  %s1958_s28 = smov [#allocation2]   ;;  %s2083_s27 = int_to_ptr.vmem [resolvable:$true] %s199_s27 }
   0xc   : > { %p2077_p5 = pnand %p1533_p0, %p164_p3  ;;  %s177_s29 = sshll.u32 %s1958_s28, 4  ;;  %s2091_s29 = int_to_ptr.vmem [resolvable:$true] %s177_s29 }
   0xd   : > { %s1959_s6 = smov [#allocation10]   ;;  %s1734_s10 = scalar_lea.hbm %s2833_s2, 64 }
   0xe   : > { %p1576_p6 = pneg %p2077_p5  ;;  %s210_s7 = sshll.u32 %s1959_s6, 4  ;;  %s2093_s7 = int_to_ptr.vmem [resolvable:$true] %s210_s7 }
   0xf   : > { %p1735_p8 = scmp.ne.s32.totalorder %s2833_s2, %s1734_s10  ;;  %p1741_p12 = scmp.lt.u32.totalorder %s1734_s10, %s2833_s2 }
  0x10   : > { %p2087_p7 = pnand %p1576_p6, %p2837_p1 }
  0x12   : > { %p2103_p9 = pneg %p2087_p7 }
  0x14   : > { %p1737_p10 = pnand %p2103_p9, %p1735_p8 }
  0x16   : > { %p1738_p11 = pneg %p1737_p10 }
  0x18   : > { %p1743_p13 = pnand %p1741_p12, %p1738_p11 }
  0x1a   : > { %1746 = shalt.err (!%p1743_p13)
}
  0x1b   : > { %s1747_s16 = scalar_lea.vmem %s2074_s23, 64  ;;  %p1755_p4 = scmp.lt.s32.totalorder %s2074_s23, %s2074_s23 }
  0x1c   : > { %p1748_p0 = scmp.ne.s32.totalorder %s2074_s23, %s1747_s16  ;;  %p1756_p1 = scmp.lt.s32.totalorder %s1747_s16, %s1747_s16 }
  0x1e   : > { %p1750_p3 = pnand %p1748_p0, %p2103_p9  ;;  %p1757_p8 = por %p1756_p1, %p1755_p4 }
  0x20   : > { %p1751_p6 = pneg %p1750_p3 }
  0x22   : > { %p1758_p10 = pnand %p1757_p8, %p1751_p6 }
  0x24   : > { %1761 = shalt.err (!%p1758_p10)
}
  0x25   : > { %1582 = dma.hbm_to_vmem [thread:$0]  (!%p2087_p7), %s2833_s2, 64, %s2074_s23, [#allocation6]  }
  0x26   : > { %s1762_s6 = scalar_lea.hbm %s2834_s3, 64 }
  0x27   : > { %p1763_p11 = scmp.ne.s32.totalorder %s2834_s3, %s1762_s6  ;;  %p1769_p12 = scmp.lt.u32.totalorder %s1762_s6, %s2834_s3 }
  0x29   : > { %p1765_p1 = pnand %p1763_p11, %p2103_p9 }
  0x2b   : > { %p1766_p4 = pneg %p1765_p1 }
  0x2d   : > { %p1771_p13 = pnand %p1769_p12, %p1766_p4 }
  0x2f   : > { %1774 = shalt.err (!%p1771_p13)
}
  0x30   : > { %s1775_s23 = scalar_lea.vmem %s2083_s27, 64  ;;  %p1783_p8 = scmp.lt.s32.totalorder %s2083_s27, %s2083_s27 }
  0x31   : > { %p1776_p0 = scmp.ne.s32.totalorder %s2083_s27, %s1775_s23  ;;  %p1784_p10 = scmp.lt.s32.totalorder %s1775_s23, %s1775_s23 }
  0x33   : > { %p1778_p3 = pnand %p1776_p0, %p2103_p9  ;;  %p1785_p11 = por %p1784_p10, %p1783_p8 }
  0x35   : > { %p1779_p6 = pneg %p1778_p3 }
  0x37   : > { %p1786_p1 = pnand %p1785_p11, %p1779_p6 }
  0x39   : > { %1789 = shalt.err (!%p1786_p1)
}
  0x3a   : > { %1585 = dma.hbm_to_vmem [thread:$0]  (!%p2087_p7), %s2834_s3, 64, %s2083_s27, [#allocation9]  }
  0x3b   : > { %s1790_s17 = scalar_lea.hbm %s2831_s0, 192 }
  0x3c   : > { %p1791_p4 = scmp.ne.s32.totalorder %s2831_s0, %s1790_s17  ;;  %p1797_p0 = scmp.lt.u32.totalorder %s1790_s17, %s2831_s0 }
  0x3e   : > { %p1793_p12 = pnand %p1791_p4, %p2103_p9 }
  0x40   : > { %p1794_p13 = pneg %p1793_p12 }
  0x42   : > { %p1799_p3 = pnand %p1797_p0, %p1794_p13 }
  0x44   : > { %1802 = shalt.err (!%p1799_p3)
}
  0x45   : > { %s1803_s27 = scalar_lea.vmem %s2091_s29, 192  ;;  %p1811_p11 = scmp.lt.s32.totalorder %s2091_s29, %s2091_s29 }
  0x46   : > { %p1804_p6 = scmp.ne.s32.totalorder %s2091_s29, %s1803_s27  ;;  %p1812_p1 = scmp.lt.s32.totalorder %s1803_s27, %s1803_s27 }
  0x48   : > { %p1806_p8 = pnand %p1804_p6, %p2103_p9  ;;  %p1813_p4 = por %p1812_p1, %p1811_p11 }
  0x4a   : > { %p1807_p10 = pneg %p1806_p8 }
  0x4c   : > { %p1814_p12 = pnand %p1813_p4, %p1807_p10 }
  0x4e   : > { %1817 = shalt.err (!%p1814_p12)
}
  0x4f   : > { %1579 = dma.hbm_to_vmem [thread:$0]  (!%p2087_p7), %s2831_s0, 192, %s2091_s29, [#allocation3]  }
  0x50   : > { %s1818_s23 = scalar_lea.hbm %s2835_s4, 64 }
  0x51   : > { %p1819_p13 = scmp.ne.s32.totalorder %s2835_s4, %s1818_s23  ;;  %p1825_p6 = scmp.lt.u32.totalorder %s1818_s23, %s2835_s4 }
  0x53   : > { %p1821_p0 = pnand %p1819_p13, %p2103_p9 }
  0x55   : > { %p1822_p3 = pneg %p1821_p0 }
  0x57   : > { %p1827_p8 = pnand %p1825_p6, %p1822_p3 }
  0x59   : > { %1830 = shalt.err (!%p1827_p8)
}
  0x5a   : > { %s1831_s29 = scalar_lea.vmem %s2093_s7, 64  ;;  %p1839_p4 = scmp.lt.s32.totalorder %s2093_s7, %s2093_s7 }
  0x5b   : > { %p1832_p10 = scmp.ne.s32.totalorder %s2093_s7, %s1831_s29  ;;  %p1840_p12 = scmp.lt.s32.totalorder %s1831_s29, %s1831_s29 }
  0x5d   : > { %p1834_p11 = pnand %p1832_p10, %p2103_p9  ;;  %p1841_p13 = por %p1840_p12, %p1839_p4 }
  0x5f   : > { %p1835_p1 = pneg %p1834_p11 }
  0x61   : > { %p1842_p0 = pnand %p1841_p13, %p1835_p1 }
  0x63   : > { %1845 = shalt.err (!%p1842_p0)
}
  0x64   : > { %1588 = dma.hbm_to_vmem [thread:$0]  (!%p2087_p7), %s2835_s4, 64, %s2093_s7, [#allocation9]  }
  0x65   : > { %s1532_s30 = sadd.s32 4294967294, %s1954_s21   ;;  %s2195_s13 = sadd.s32 1, %s1954_s21  }
  0x66   : > { %s51_s26 = sadd.s32 1, %s1950_s20  ;;  %s48_s28 = ssub.s32 %s1954_s21, %s2195_s13 }
  0x67   : > { %p58_p9 = scmp.ne.s32.totalorder %s1950_s20, %s1946_s19  ;;  %p49_p3 = scmp.eq.s32.totalorder %s48_s28, 0 }
  0x68   : > { %p59_p6 = scmp.eq.s32.totalorder %s1954_s21, 0  ;;  %p64_p8 = scmp.ne.s32.totalorder %s1946_s19, %s1942_s18 }
  0x69   : > { %p2207_p10 = por %p151_p2, %p58_p9  ;;  %p2844_p11 = scmp.eq.s32.totalorder %s2068_s24, 0 }
  0x6a   : > { %s2212_s27 = scalar_select %p49_p3, %s1950_s20, %s51_s26  }
  0x6b   : > { %s2843_s6 = scalar_select %p2207_p10, 1, 0 }
  0x6c   : > { %p60_p7 = por %p59_p6, %p58_p9  ;;  %p2216_p1 = por %p2844_p11, %p64_p8 }
  0x6d   : > { %p157_p4 = scmp.eq.s32.totalorder %s1532_s30, 1  ;;  %p1601_p12 = scmp.lt.s32.totalorder %s1954_s21, 2 }
  0x6e   : > { %s2845_s7 = scalar_select %p2216_p1, 1, 0 }
  0x6f   : > { %s221_s8 = sand.u32 1, %s1954_s21   ;;  %s223_s9 = sand.u32 1, %s1950_s20  }
  0x70   : > { %p2223_p13 = por %p157_p4, %p64_p8  ;;  %s1539_s11 = sshll.u32 %s223_s9, 3 }
  0x71   : > { %s1554_s23 = sshll.u32 %s1954_s21, 7  ;;  %s225_s16 = scalar_lea.vmem [#allocation5], %s1539_s11 }
  0x72   : > { %s2846_s10 = scalar_select %p2223_p13, 1, 0 }
  0x73   : > { %s2231_s15 = scalar_lea.hbm %s2832_s1, %s1554_s23  ;;  %s233_s29 = sshll.u32 %s225_s16, 4  ;;  %s2237_s29 = int_to_ptr.vmem [resolvable:$true] %s233_s29 }
  0x74   : > { %p2233_p2 = pnand %p1601_p12, %p60_p7  ;;  %s222_s22 = scalar_lea.sflag [#allocation6], %s221_s8 }
  0x75   : > { %s1846_s30 = scalar_lea.hbm %s2231_s15, 128  ;;  %s1851_s9 = scalar_lea.hbm %s2832_s1, 256 }
  0x76   : > { %p1847_p0 = scmp.ne.s32.totalorder %s2231_s15, %s1846_s30  ;;  %p1848_p9 = pneg %p2233_p2 }
  0x77   : > { %p1852_p8 = scmp.lt.u32.totalorder %s2231_s15, %s2832_s1  ;;  %p1853_p7 = scmp.lt.u32.totalorder %s1851_s9, %s1846_s30 }
  0x78   : > { %p1849_p3 = pnand %p1848_p9, %p1847_p0  ;;  %p1855_p4 = scmp.lt.u32.totalorder %s1846_s30, %s2231_s15 }
  0x79   : > { %p1854_p11 = por %p1853_p7, %p1852_p8 }
  0x7a   : > { %p1850_p6 = pneg %p1849_p3 }
  0x7b   : > { %p1856_p12 = por %p1855_p4, %p1854_p11 }
  0x7d   : > { %p1857_p13 = pnand %p1856_p12, %p1850_p6 }
  0x7f   : > { %1860 = shalt.err (!%p1857_p13)
}
  0x80   : > { %s1861_s8 = scalar_lea.vmem %s2237_s29, 128  ;;  %s1960_s12 = smov [#allocation5]  }
  0x81   : > { %p1862_p0 = scmp.ne.s32.totalorder %s2237_s29, %s1861_s8  ;;  %s1866_s14 = sshll.u32 %s1960_s12, 4  ;;  %s1867_s14 = int_to_ptr.vmem [resolvable:$false] %s1866_s14 }
  0x82   : > { %s1868_s16 = scalar_lea.vmem %s1867_s14, 256  ;;  %p1869_p1 = scmp.lt.s32.totalorder %s2237_s29, %s1867_s14 }
  0x83   : > { %p1864_p3 = pnand %p1862_p0, %p1848_p9  ;;  %p1870_p8 = scmp.lt.s32.totalorder %s1868_s16, %s1861_s8 }
  0x85   : > { %p1865_p10 = pneg %p1864_p3  ;;  %p1871_p7 = por %p1870_p8, %p1869_p1 }
  0x87   : > { %p1872_p11 = pnand %p1871_p7, %p1865_p10 }
  0x89   : > { %1875 = shalt.err (!%p1872_p11)
}
  0x8a   : > { %1592 = dma.hbm_to_vmem [thread:$0]  (!%p2233_p2), %s2231_s15, 128, %s2237_s29, %s222_s22  }
  0x8b   : > { %242 = sbr.rel (%p2077_p5) target bundleno = 1181 (0x49d), region = 40  ;;  %p2848_p13 = scmp.eq.s32.totalorder (!%p2077_p5), %s2068_s24, 0 }
  0x92   : > { %1921 = dma.done.wait (%p2848_p13), [#allocation3], 192   ;;  %p2849_p9 = pmov %p2848_p13 }
  0x93   : > { %s248_s30 = sand.u32 1, %s2068_s24   ;;  %s2272_s26 = sand.u32 1, %s1946_s19  }
  0x94   : > { %1923 = vsyncadd (%p2849_p9), [#allocation3], 4294967104  ;;  %s1544_s17 = sshll.u32 %s2272_s26, 3  ;;  %s249_s28 = scalar_lea.sflag [#allocation6], %s248_s30 }
  0x95   : > { %s2275_s9 = scalar_lea.vmem [#allocation5], %s1544_s17  ;;  %p2850_p10 = scmp.ne.s32.totalorder %s2845_s7, 0 }
  0x97   : > { %1925 = dma.done.wait (%p2850_p10), %s249_s28, 128  }
  0x98   : > { %1927 = vsyncadd (%p2850_p10), %s249_s28, 4294967168  ;;  %p2851_p5 = pmov %p2849_p9 }
  0x9a   : > { %1929 = dma.done.wait (%p2851_p5), [#allocation6], 64   ;;  %p2852_p1 = pmov %p2851_p5 }
  0x9c   : > { %1931 = vsyncadd (%p2852_p1), [#allocation6], 4294967232  ;;  %p2853_p2 = pmov %p2852_p1 }
  0x9d   : > { %p2854_p6 = pmov %p2852_p1 }
  0x9e   : > { %1933 = dma.done.wait (%p2853_p2), [#allocation9], 128  }
  0x9f   : > { %1935 = vsyncadd (%p2854_p6), [#allocation9], 4294967168  ;;  %v302_v0 = vlaneseq  ;;  %v1961_v1 = vmov 1   ;;  %v1962_v2 = vmov 0   ;;  %v296_v7 = vld [vmem:[#allocation2 + $0x8] sm:$0xf] }
  0xa0   : > { %1701 = vset.pattern.permute.xlu0 %v1961_v1  ;;  %1698 = vset.pattern.permute.xlu1 %v1962_v2  ;;  %v295_v8 = vld [vmem:[#allocation2] sm:$0xff]  ;;  %s1963_s25 = smov 94   ;;  %s1964_s7 = smov 95   ;;  %v1967_v40 = vmov 4   ;;  %v1968_v41 = vmov 7   ;;  %v1969_v42 = vmov 2  }
  0xa1   : > { %v303_v3 = vshrl.u32 %v302_v0, 7  ;;  %s1965_s15 = smov 97   ;;  %s1966_s29 = smov 98   ;;  %v2296_v38 = vld [vmem:[#allocation10] sm:$0xf]  ;;  %v1970_v43 = vmov 10  }
  0xa2   : > { %v2298_v39 = vld [vmem:[#allocation8] sm:$0xf]  ;;  %v1971_v44 = vmov 3   ;;  %v1972_v45 = vmov 13   ;;  %v1973_v46 = vmov 5   ;;  %v1974_v47 = vmov 16  }
  0xa3   : > { %v304_v4 = vsub.s32 0, %v303_v3  ;;  %v351_v5 = vsub.s32 1, %v303_v3  ;;  %v308_v6 = vsub.s32 4, %v303_v3  ;;  %v355_v9 = vsub.s32 5, %v303_v3  ;;  %v292_v54 = vld [vmem:[#allocation7] sm:$0xf] }
  0xa4   : > { %v402_v17 = vsub.s32 6, %v303_v3  ;;  %v398_v21 = vsub.s32 2, %v303_v3  ;;  %v445_v26 = vsub.s32 3, %v303_v3  ;;  %v449_v31 = vsub.s32 7, %v303_v3  ;;  %s1990_s22 = smov 127   ;;  %s1991_s11 = smov 126  }
  0xa5   : > { %v313_v10 = vrot.slane %v296_v7, %v304_v4  ;;  %v305_v11 = vrot.slane %v295_v8, %v304_v4  ;;  %v352_v12 = vrot.slane %v295_v8, %v351_v5  ;;  %v309_v13 = vrot.slane %v295_v8, %v308_v6  ;;  %s1992_s23 = smov 125   ;;  %s1993_s8 = smov 124  }
  0xa6   : > { %v360_v16 = vrot.slane %v296_v7, %v351_v5  ;;  %v356_v20 = vrot.slane %v295_v8, %v355_v9  ;;  %v403_v22 = vrot.slane %v295_v8, %v402_v17  ;;  %v399_v25 = vrot.slane %v295_v8, %v398_v21  ;;  %s1994_s12 = smov 112   ;;  %s1995_s14 = smov 111  }
  0xa7   : > { %v328_v14 = vrot.slane %v313_v10, %v304_v4  ;;  %v320_v15 = vrot.slane %v305_v11, %v304_v4  ;;  %v367_v18 = vrot.slane %v352_v12, %v351_v5  ;;  %v324_v19 = vrot.slane %v309_v13, %v304_v4  ;;  %v2354_v13 = vld [vmem:[%s2275_s9] sm:$0xff]  ;;  %s1996_s16 = smov 110   ;;  %s1997_s30 = smov 109  }
  0xa8   : > { %v375_v23 = vrot.slane %v360_v16, %v351_v5  ;;  %v371_v24 = vrot.slane %v356_v20, %v351_v5  ;;  %v418_v27 = vrot.slane %v403_v22, %v398_v21  ;;  %v414_v28 = vrot.slane %v399_v25, %v398_v21  ;;  %s1998_s17 = smov 108   ;;  %s1999_s28 = smov 96  }
  0xa9   : > { %336 = vrot.lane.b32.xlu1 %v328_v14, %s1963_s25  ;;  %332 = vrot.lane.b32.xlu0 %v320_v15, %s1963_s25  ;;  %v446_v29 = vrot.slane %v295_v8, %v445_v26  ;;  %v407_v30 = vrot.slane %v296_v7, %v398_v21  ;;  %v454_v32 = vrot.slane %v296_v7, %v445_v26  ;;  %v1975_v48 = vmov 6   ;;  %p2855_p12 = scmp.ne.s32.totalorder %s2843_s6, 0 }
  0xaa   : > { %v450_v35 = vrot.slane %v295_v8, %v449_v31  ;;  %v1976_v49 = vmov 8   ;;  %v1977_v50 = vmov 20   ;;  %v1978_v51 = vmov 9  }
  0xab   : > { %v461_v33 = vrot.slane %v446_v29, %v445_v26  ;;  %v422_v34 = vrot.slane %v407_v30, %v398_v21  ;;  %v469_v36 = vrot.slane %v454_v32, %v445_v26  ;;  %v1979_v52 = vmov 11  }
  0xac   : > { %v465_v37 = vrot.slane %v450_v35, %v445_v26  ;;  %v1980_v53 = vmov 23   ;;  %v1981_v55 = vmov 12   ;;  %v1982_v56 = vmov 14  }
  0xad   : > { %379 = vrot.lane.b32.xlu1 %v367_v18, %s1964_s7  ;;  %334 = vrot.lane.b32.xlu0 %v324_v19, %s1963_s25  ;;  %v1983_v57 = vmov 15   ;;  %v1984_v58 = vmov 24   ;;  %v1985_v59 = vmov 17   ;;  %v1986_v60 = vmov 18  }
  0xae   : > { %v1987_v61 = vmov 19   ;;  %v1988_v62 = vmov 21   ;;  %v1989_v0 = vmov 22   ;;  %vm385_vm0 = vcmask 777216  }
  0xaf   : > { %v2361_v19 = vcombine.high %v2354_v13, %v2354_v13  ;;  %vm432_vm1 = vcmask 793600   ;;  %vm479_vm2 = vcmask 801792   ;;  %vm338_vm3 = vcmask 769024  }
  0xb0   : > { %vm521_vm4 = vcmask 1039360   ;;  %vm546_vm5 = vcmask 1031168   ;;  %vm770_vm6 = vcmask 1022976   ;;  %vm795_vm7 = vcmask 1014784  }
  0xb1   : > { %383 = vrot.lane.b32.xlu1 %v375_v23, %s1964_s7  ;;  %381 = vrot.lane.b32.xlu0 %v371_v24, %s1964_s7  ;;  %vm571_vm8 = vcmask 916480   ;;  %vm592_vm9 = vcmask 908288   ;;  %vm616_vm10 = vcmask 900096   ;;  %vm892_vm11 = vcmask 891904  }
  0xb2   : > { %vm917_vm12 = vcmask 883712   ;;  %vm641_vm13 = vcmask 785408   ;;  %vm1009_vm14 = vcmask 760832   ;;  %vm1034_vm15 = vcmask 752640  }
  0xb5   : > { %428 = vrot.lane.b32.xlu1 %v418_v27, %s1965_s15  ;;  %426 = vrot.lane.b32.xlu0 %v414_v28, %s1965_s15 }
  0xb9   : > { %473 = vrot.lane.b32.xlu1 %v461_v33, %s1966_s29  ;;  %430 = vrot.lane.b32.xlu0 %v422_v34, %s1965_s15  ;;  %s2000_s15 = smov 93  }
  0xbd   : > { %477 = vrot.lane.b32.xlu1 %v469_v36, %s1966_s29  ;;  %475 = vrot.lane.b32.xlu0 %v465_v37, %s1966_s29  ;;  %s2001_s29 = smov 92  }
  0xc1   : > { %707 = vperm.xlu0 %1701, %v2296_v38   ;;  %499 = vperm.xlu1 %1698, %v2298_v39  }
  0xc5   : > { %1703 = vset.pattern.permute.xlu0 %v1967_v40  ;;  %1699 = vset.pattern.permute.xlu1 %v1961_v1 }
  0xc6   : > { %780 = vperm.xlu0 %1703, %v2296_v38   ;;  %506 = vperm.xlu1 %1699, %v2298_v39  }
  0xca   : > { %1706 = vset.pattern.permute.xlu0 %v1968_v41  ;;  %1700 = vset.pattern.permute.xlu1 %v1969_v42 }
  0xcb   : > { %853 = vperm.xlu0 %1706, %v2296_v38   ;;  %531 = vperm.xlu1 %1700, %v2298_v39  }
  0xcf   : > { %1709 = vset.pattern.permute.xlu0 %v1970_v43  ;;  %731 = vperm.xlu1 %1700, %v2296_v38  }
  0xd0   : > { %927 = vperm.xlu0 %1709, %v2296_v38  }
  0xd3   : > { %1702 = vset.pattern.permute.xlu1 %v1971_v44 }
  0xd4   : > { %1712 = vset.pattern.permute.xlu0 %v1972_v45  ;;  %755 = vperm.xlu1 %1702, %v2296_v38  }
  0xd5   : > { %994 = vperm.xlu0 %1712, %v2296_v38  }
  0xd8   : > { %1704 = vset.pattern.permute.xlu1 %v1973_v46 }
  0xd9   : > { %1715 = vset.pattern.permute.xlu0 %v1974_v47  ;;  %805 = vperm.xlu1 %1704, %v2296_v38  }
  0xda   : > { %1069 = vperm.xlu0 %1715, %v2296_v38  }
  0xdd   : > { %1705 = vset.pattern.permute.xlu1 %v1975_v48 }
  0xde   : > { %1718 = vset.pattern.permute.xlu0 %v1971_v44  ;;  %829 = vperm.xlu1 %1705, %v2296_v38  }
  0xdf   : > { %556 = vperm.xlu0 %1718, %v2298_v39  }
  0xe2   : > { %1707 = vset.pattern.permute.xlu1 %v1976_v49 }
  0xe3   : > { %1721 = vset.pattern.permute.xlu0 %v1977_v50  ;;  %877 = vperm.xlu1 %1707, %v2296_v38  }
  0xe4   : > { %1169 = vperm.xlu0 %1721, %v2296_v38  }
  0xe7   : > { %1708 = vset.pattern.permute.xlu1 %v1978_v51 }
  0xe8   : > { %1724 = vset.pattern.permute.xlu0 %v1975_v48  ;;  %902 = vperm.xlu1 %1708, %v2296_v38  }
  0xe9   : > { %626 = vperm.xlu0 %1724, %v2298_v39  }
  0xec   : > { %1710 = vset.pattern.permute.xlu1 %v1979_v52 }
  0xed   : > { %1727 = vset.pattern.permute.xlu0 %v1980_v53  ;;  %951 = vperm.xlu1 %1710, %v2296_v38  }
  0xee   : > { %1244 = vperm.xlu0 %1727, %v2296_v38  }
  0xf1   : > { %1711 = vset.pattern.permute.xlu1 %v1981_v55 }
  0xf2   : > { %1728 = vset.pattern.permute.xlu0 %v1962_v2  ;;  %975 = vperm.xlu1 %1711, %v2296_v38  }
  0xf3   : > { %492 = vperm.xlu0 %1728, %v292_v54  }
  0xf6   : > { %1713 = vset.pattern.permute.xlu1 %v1982_v56 }
  0xf7   : > { %1019 = vperm.xlu1 %1713, %v2296_v38   ;;  %700 = vperm.xlu0 %1728, %v2296_v38  }
  0xfb   : > { %1714 = vset.pattern.permute.xlu1 %v1983_v57  ;;  %1731 = vset.pattern.permute.xlu0 %v1984_v58 }
  0xfc   : > { %1044 = vperm.xlu1 %1714, %v2296_v38  }
 0x100   : > { %1716 = vset.pattern.permute.xlu1 %v1985_v59 }
 0x101   : > { %1094 = vperm.xlu1 %1716, %v2296_v38  }
 0x105   : > { %1717 = vset.pattern.permute.xlu1 %v1986_v60 }
 0x106   : > { %1119 = vperm.xlu1 %1717, %v2296_v38  }
 0x10a   : > { %1719 = vset.pattern.permute.xlu1 %v1987_v61 }
 0x10b   : > { %1144 = vperm.xlu1 %1719, %v2296_v38  }
 0x10f   : > { %1720 = vset.pattern.permute.xlu1 %v1967_v40 }
 0x110   : > { %581 = vperm.xlu1 %1720, %v2298_v39  }
 0x114   : > { %1722 = vset.pattern.permute.xlu1 %v1973_v46 }
 0x115   : > { %601 = vperm.xlu1 %1722, %v2298_v39  }
 0x119   : > { %1723 = vset.pattern.permute.xlu1 %v1988_v62 }
 0x11a   : > { %1194 = vperm.xlu1 %1723, %v2296_v38  }
 0x11b   : > { %v2334_v63 = vpop.permute.xlu1 %336  ;;  %v2339_v2 = vpop.permute.xlu0 %332 }
 0x11c   : > { %v2403_v51 = vmul.f32 0.0, %v2339_v2 }
 0x11e   : > { %1725 = vset.pattern.permute.xlu1 %v1989_v0 }
 0x11f   : > { %1219 = vperm.xlu1 %1725, %v2296_v38   ;;  %v380_v1 = vpop.permute.xlu1 %379  ;;  %v2344_v4 = vpop.permute.xlu0 %334 }
 0x120   : > { %v2357_v18 = vmul.f32 0.0, %v380_v1  ;;  %v339_v53 = vsel %vm338_vm3, %v2339_v2, %v2344_v4  ;;  %v340_v54 = vsel %vm338_vm3, %v2344_v4, %v2334_v63 }
 0x121   : > { %v2417_v57 = vmul.f32 %v339_v53, %v2354_v13 }
 0x123   : > { %1726 = vset.pattern.permute.xlu1 %v1968_v41  ;;  %v2342_v3 = vpop.permute.xlu1 %383  ;;  %v382_v6 = vpop.permute.xlu0 %381 }
 0x124   : > { %651 = vperm.xlu1 %1726, %v2298_v39   ;;  %v386_v20 = vsel %vm385_vm0, %v380_v1, %v382_v6  ;;  %v387_v21 = vsel %vm385_vm0, %v382_v6, %v2342_v3 }
 0x125   : > { %v2371_v25 = vmul.f32 %v386_v20, %v2354_v13  ;;  %v2374_v26 = vmul.f32 %v387_v21, %v2361_v19 }
 0x127   : > { %v429_v5 = vpop.permute.xlu1 %428  ;;  %v427_v8 = vpop.permute.xlu0 %426 }
 0x128   : > { %1729 = vset.pattern.permute.xlu1 %v1976_v49  ;;  %v2379_v33 = vmul.f32 0.0, %v427_v8  ;;  %v433_v34 = vsel %vm432_vm1, %v427_v8, %v429_v5 }
 0x129   : > { %675 = vperm.xlu1 %1729, %v2298_v39  }
 0x12b   : > { %v474_v7 = vpop.permute.xlu1 %473  ;;  %v2349_v10 = vpop.permute.xlu0 %430 }
 0x12c   : > { %v434_v35 = vsel %vm432_vm1, %v429_v5, %v2349_v10  ;;  %v486_v45 = vmul.f32 0.0, %v474_v7  ;;  %vm1059_vm1 = vcmask 654336  }
 0x12d   : > { %1730 = vset.pattern.permute.xlu1 %v1984_v58  ;;  %v2390_v39 = vmul.f32 %v434_v35, %v2361_v19  ;;  %v2420_v58 = vmul.f32 %v340_v54, %v2361_v19 }
 0x12e   : > { %1269 = vperm.xlu1 %1730, %v2296_v38   ;;  %v2387_v38 = vmul.f32 %v433_v34, %v2354_v13 }
 0x12f   : > { %v2347_v9 = vpop.permute.xlu1 %477  ;;  %v476_v12 = vpop.permute.xlu0 %475 }
 0x130   : > { %v480_v41 = vsel %vm479_vm2, %v474_v7, %v476_v12  ;;  %v481_v47 = vsel %vm479_vm2, %v476_v12, %v2347_v9  ;;  %v2475_v53 = vmul.f32 0.0, %v2347_v9  ;;  %v2486_v9 = vmul.f32 0.0, %v2334_v63 }
 0x131   : > { %v2397_v46 = vmul.f32 %v480_v41, %v2354_v13  ;;  %v2406_v52 = vmul.f32 %v481_v47, %v2361_v19  ;;  %v2468_v47 = vmul.f32 0.0, %v2349_v10  ;;  %vm1084_vm2 = vcmask 646144  }
 0x140   : > { %v2351_v11 = vpop.permute.xlu1 %499  ;;  %v708_v17 = vpop.permute.xlu0 %707 }
 0x141   : > { %v710_v23 = vmul.f32 %v708_v17, %v2357_v18  ;;  %v711_v28 = vmul.f32 %v708_v17, %v2371_v25  ;;  %v712_v29 = vmul.f32 %v708_v17, %v2374_v26 }
 0x145   : > { %v507_v14 = vpop.permute.xlu1 %506  ;;  %v781_v44 = vpop.permute.xlu0 %780 }
 0x146   : > { %v509_v15 = vmul.f32 0.0, %v507_v14  ;;  %v510_v16 = vmul.f32 %v507_v14, %v2354_v13  ;;  %v511_v24 = vmul.f32 %v507_v14, %v2361_v19  ;;  %v783_v49 = vmul.f32 %v781_v44, %v486_v45 }
 0x147   : > { %v784_v50 = vmul.f32 %v781_v44, %v2397_v46  ;;  %v785_v55 = vmul.f32 %v781_v44, %v2406_v52 }
 0x148   : > { %515 = vrot.lane.b32.xlu0 %v509_v15, %s1990_s22  ;;  %517 = vrot.lane.b32.xlu1 %v510_v16, %s1990_s22 }
 0x14a   : > { %v2366_v22 = vpop.permute.xlu1 %531  ;;  %v854_v2 = vpop.permute.xlu0 %853 }
 0x14b   : > { %v856_v4 = vmul.f32 0.0, %v854_v2  ;;  %v857_v7 = vmul.f32 %v854_v2, %v2354_v13  ;;  %v858_v8 = vmul.f32 %v854_v2, %v2361_v19  ;;  %v2493_v2 = vmul.f32 0.0, %v2342_v3 }
 0x14c   : > { %716 = vrot.lane.b32.xlu1 %v710_v23, %s1990_s22  ;;  %519 = vrot.lane.b32.xlu0 %v511_v24, %s1990_s22 }
 0x14e   : > { %v732_v27 = vpop.permute.xlu1 %731 }
 0x14f   : > { %v734_v30 = vmul.f32 0.0, %v732_v27  ;;  %v735_v31 = vmul.f32 %v732_v27, %v2354_v13  ;;  %v736_v36 = vmul.f32 %v732_v27, %v2361_v19  ;;  %v928_v24 = vpop.permute.xlu0 %927 }
 0x150   : > { %718 = vrot.lane.b32.xlu1 %v711_v28, %s1990_s22  ;;  %720 = vrot.lane.b32.xlu0 %v712_v29, %s1990_s22  ;;  %v930_v28 = vmul.f32 %v928_v24, %v2403_v51  ;;  %v931_v29 = vmul.f32 %v928_v24, %v2417_v57  ;;  %s2002_s22 = smov 80  }
 0x153   : > { %v756_v32 = vpop.permute.xlu1 %755 }
 0x154   : > { %740 = vrot.lane.b32.xlu1 %v734_v30, %s1991_s11  ;;  %742 = vrot.lane.b32.xlu0 %v735_v31, %s1991_s11  ;;  %v758_v37 = vmul.f32 %v756_v32, %v2379_v33  ;;  %v759_v42 = vmul.f32 %v756_v32, %v2387_v38  ;;  %v760_v43 = vmul.f32 %v756_v32, %v2390_v39 }
 0x155   : > { %v932_v31 = vmul.f32 %v928_v24, %v2420_v58 }
 0x158   : > { %v806_v40 = vpop.permute.xlu1 %805  ;;  %744 = vrot.lane.b32.xlu1 %v736_v36, %s1991_s11  ;;  %764 = vrot.lane.b32.xlu0 %v758_v37, %s1992_s23  ;;  %v995_v37 = vpop.permute.xlu0 %994 }
 0x159   : > { %v808_v56 = vmul.f32 %v806_v40, %v2403_v51  ;;  %v809_v60 = vmul.f32 %v806_v40, %v2417_v57  ;;  %v810_v61 = vmul.f32 %v806_v40, %v2420_v58  ;;  %v997_v44 = vmul.f32 %v995_v37, %v2387_v38 }
 0x15c   : > { %766 = vrot.lane.b32.xlu1 %v759_v42, %s1992_s23  ;;  %768 = vrot.lane.b32.xlu0 %v760_v43, %s1992_s23  ;;  %v1070_v43 = vpop.permute.xlu0 %1069  ;;  %s2003_s23 = smov 79  }
 0x15d   : > { %v830_v48 = vpop.permute.xlu1 %829  ;;  %v1073_v63 = vmul.f32 %v1070_v43, %v2374_v26 }
 0x15e   : > { %v832_v0 = vmul.f32 %v830_v48, %v2357_v18  ;;  %v833_v1 = vmul.f32 %v830_v48, %v2371_v25  ;;  %v834_v5 = vmul.f32 %v830_v48, %v2374_v26 }
 0x160   : > { %789 = vrot.lane.b32.xlu1 %v783_v49, %s1993_s8  ;;  %791 = vrot.lane.b32.xlu0 %v784_v50, %s1993_s8  ;;  %v999_v49 = vmul.f32 %v995_v37, %v2468_v47  ;;  %v557_v54 = vpop.permute.xlu0 %556 }
 0x162   : > { %v878_v59 = vpop.permute.xlu1 %877 }
 0x163   : > { %v880_v14 = vmul.f32 %v878_v59, %v2379_v33  ;;  %v881_v15 = vmul.f32 %v878_v59, %v2387_v38  ;;  %v882_v17 = vmul.f32 %v878_v59, %v2390_v39 }
 0x164   : > { %793 = vrot.lane.b32.xlu1 %v785_v55, %s1993_s8  ;;  %814 = vrot.lane.b32.xlu0 %v808_v56, %s1994_s12  ;;  %v2481_v59 = vpop.permute.xlu0 %1169  ;;  %s2004_s8 = smov 78  }
 0x167   : > { %v903_v62 = vpop.permute.xlu1 %902 }
 0x168   : > { %816 = vrot.lane.b32.xlu1 %v809_v60, %s1994_s12  ;;  %818 = vrot.lane.b32.xlu0 %v810_v61, %s1994_s12  ;;  %v905_v20 = vmul.f32 %v903_v62, %v486_v45  ;;  %v906_v21 = vmul.f32 %v903_v62, %v2397_v46  ;;  %v907_v23 = vmul.f32 %v903_v62, %v2406_v52 }
 0x169   : > { %v998_v45 = vmul.f32 %v995_v37, %v2390_v39 }
 0x16c   : > { %838 = vrot.lane.b32.xlu1 %v832_v0, %s1995_s14  ;;  %840 = vrot.lane.b32.xlu0 %v833_v1, %s1995_s14  ;;  %v952_v6 = vpop.permute.xlu1 %951  ;;  %v1072_v1 = vmul.f32 %v1070_v43, %v2371_v25 }
 0x16d   : > { %v954_v32 = vmul.f32 %v952_v6, %v2357_v18  ;;  %v955_v35 = vmul.f32 %v952_v6, %v2371_v25  ;;  %v956_v36 = vmul.f32 %v952_v6, %v2374_v26  ;;  %v1074_v6 = vmul.f32 %v1070_v43, %v2493_v2 }
 0x170   : > { %842 = vrot.lane.b32.xlu1 %v834_v5, %s1995_s14  ;;  %862 = vrot.lane.b32.xlu0 %v856_v4, %s1996_s16  ;;  %v2495_v4 = vpop.permute.xlu0 %626 }
 0x171   : > { %v976_v12 = vpop.permute.xlu1 %975 }
 0x172   : > { %v978_v40 = vmul.f32 %v976_v12, %v2354_v13  ;;  %v979_v41 = vmul.f32 %v976_v12, %v2361_v19 }
 0x174   : > { %864 = vrot.lane.b32.xlu1 %v857_v7, %s1996_s16  ;;  %866 = vrot.lane.b32.xlu0 %v858_v8, %s1996_s16  ;;  %v2501_v7 = vpop.permute.xlu0 %1244 }
 0x176   : > { %v1020_v16 = vpop.permute.xlu1 %1019 }
 0x177   : > { %v1022_v50 = vmul.f32 %v1020_v16, %v2397_v46  ;;  %v1023_v55 = vmul.f32 %v1020_v16, %v2406_v52  ;;  %v1024_v56 = vmul.f32 %v1020_v16, %v2475_v53 }
 0x178   : > { %886 = vrot.lane.b32.xlu1 %v880_v14, %s1997_s30  ;;  %888 = vrot.lane.b32.xlu0 %v881_v15, %s1997_s30  ;;  %v534_v15 = vmul.f32 %v2366_v22, %v2379_v33  ;;  %v2512_v16 = vpop.permute.xlu0 %492 }
 0x17b   : > { %v1045_v27 = vpop.permute.xlu1 %1044 }
 0x17c   : > { %890 = vrot.lane.b32.xlu1 %v882_v17, %s1997_s30  ;;  %911 = vrot.lane.b32.xlu0 %v905_v20, %s1998_s17  ;;  %v1047_v60 = vmul.f32 %v1045_v27, %v2417_v57  ;;  %v1048_v61 = vmul.f32 %v1045_v27, %v2420_v58  ;;  %v1049_v0 = vmul.f32 %v1045_v27, %v2486_v9  ;;  %s2005_s30 = smov 77  }
 0x17d   : > { %v535_v20 = vmul.f32 %v2366_v22, %v2387_v38 }
 0x180   : > { %913 = vrot.lane.b32.xlu1 %v906_v21, %s1998_s17  ;;  %915 = vrot.lane.b32.xlu0 %v907_v23, %s1998_s17  ;;  %v2445_v30 = vpop.permute.xlu1 %1094  ;;  %v536_v21 = vmul.f32 %v2366_v22, %v2390_v39  ;;  %v701_v23 = vpop.permute.xlu0 %700  ;;  %s2010_s17 = smov 61  }
 0x181   : > { %v1097_v8 = vmul.f32 %v2445_v30, %v2354_v13  ;;  %v1098_v12 = vmul.f32 %v2445_v30, %v2361_v19  ;;  %v1099_v14 = vmul.f32 0.0, %v2445_v30  ;;  %v559_v30 = vmul.f32 %v557_v54, %v2357_v18 }
 0x184   : > { %936 = vrot.lane.b32.xlu1 %v930_v28, %s1999_s28  ;;  %938 = vrot.lane.b32.xlu0 %v931_v29, %s1999_s28 }
 0x185   : > { %v2453_v34 = vpop.permute.xlu1 %1119 }
 0x186   : > { %v1122_v33 = vmul.f32 %v2453_v34, %v2387_v38  ;;  %v1123_v27 = vmul.f32 %v2453_v34, %v2390_v39  ;;  %v1124_v28 = vmul.f32 %v2453_v34, %v2468_v47 }
 0x188   : > { %940 = vrot.lane.b32.xlu1 %v932_v31, %s1999_s28  ;;  %960 = vrot.lane.b32.xlu0 %v954_v32, %s1964_s7  ;;  %v560_v31 = vmul.f32 %v557_v54, %v2371_v25 }
 0x18a   : > { %v2461_v42 = vpop.permute.xlu1 %1144 }
 0x18b   : > { %v1147_v34 = vmul.f32 %v2461_v42, %v2397_v46  ;;  %v1148_v37 = vmul.f32 %v2461_v42, %v2406_v52  ;;  %v1149_v43 = vmul.f32 %v2461_v42, %v2475_v53  ;;  %v1173_v42 = vmul.f32 %v2481_v59, %v2420_v58 }
 0x18c   : > { %962 = vrot.lane.b32.xlu1 %v955_v35, %s1964_s7  ;;  %964 = vrot.lane.b32.xlu0 %v956_v36, %s1964_s7  ;;  %v561_v36 = vmul.f32 %v557_v54, %v2374_v26 }
 0x18f   : > { %v2470_v48 = vpop.permute.xlu1 %581 }
 0x190   : > { %982 = vrot.lane.b32.xlu1 %v978_v40, %s1963_s25  ;;  %984 = vrot.lane.b32.xlu0 %v979_v41, %s1963_s25  ;;  %v585_v54 = vmul.f32 %v2470_v48, %v2361_v19 }
 0x194   : > { %1003 = vrot.lane.b32.xlu1 %v997_v44, %s2000_s15  ;;  %1005 = vrot.lane.b32.xlu0 %v998_v45, %s2000_s15  ;;  %v2478_v10 = vpop.permute.xlu1 %601  ;;  %v584_v44 = vmul.f32 %v2470_v48, %v2354_v13  ;;  %v704_v48 = vmul.f32 %v701_v23, %v2417_v57 }
 0x198   : > { %1007 = vrot.lane.b32.xlu1 %v999_v49, %s2000_s15  ;;  %1028 = vrot.lane.b32.xlu0 %v1022_v50, %s2001_s29  ;;  %v1172_v50 = vmul.f32 %v2481_v59, %v2417_v57 }
 0x199   : > { %v2488_v62 = vpop.permute.xlu1 %1194 }
 0x19c   : > { %1030 = vrot.lane.b32.xlu1 %v1023_v55, %s2001_s29  ;;  %1032 = vrot.lane.b32.xlu0 %v1024_v56, %s2001_s29  ;;  %s1555_s29 = sshll.u32 %s2068_s24, 8  ;;  %s2014_s24 = smov [#allocation11]  }
 0x19e   : > { %v2497_v5 = vpop.permute.xlu1 %1219 }
 0x1a0   : > { %1053 = vrot.lane.b32.xlu1 %v1047_v60, %s2002_s22  ;;  %1055 = vrot.lane.b32.xlu0 %v1048_v61, %s2002_s22  ;;  %v1174_v60 = vmul.f32 %v2481_v59, %v2486_v9  ;;  %v703_v59 = vmul.f32 %v701_v23, %v2403_v51  ;;  %v604_v9 = vmul.f32 %v2478_v10, %v2387_v38 }
 0x1a3   : > { %v2505_v3 = vpop.permute.xlu1 %651 }
 0x1a4   : > { %1057 = vrot.lane.b32.xlu1 %v1049_v0, %s2002_s22  ;;  %1078 = vrot.lane.b32.xlu0 %v1072_v1, %s2003_s23  ;;  %v705_v1 = vmul.f32 %v701_v23, %v2420_v58  ;;  %v605_v58 = vmul.f32 %v2478_v10, %v2390_v39 }
 0x1a8   : > { %1080 = vrot.lane.b32.xlu1 %v1073_v63, %s2003_s23  ;;  %1082 = vrot.lane.b32.xlu0 %v1074_v6, %s2003_s23  ;;  %v2514_v17 = vpop.permute.xlu1 %675 }
 0x1ac   : > { %1103 = vrot.lane.b32.xlu1 %v1097_v8, %s2004_s8  ;;  %1105 = vrot.lane.b32.xlu0 %v1098_v12, %s2004_s8 }
 0x1ad   : > { %v2525_v24 = vpop.permute.xlu1 %1269 }
 0x1b0   : > { %1107 = vrot.lane.b32.xlu1 %v1099_v14, %s2004_s8  ;;  %540 = vrot.lane.b32.xlu0 %v534_v15, %s1991_s11 }
 0x1b4   : > { %542 = vrot.lane.b32.xlu1 %v535_v20, %s1991_s11  ;;  %544 = vrot.lane.b32.xlu0 %v536_v21, %s1991_s11  ;;  %s2006_s11 = smov 76  }
 0x1b8   : > { %1128 = vrot.lane.b32.xlu1 %v1122_v33, %s2005_s30  ;;  %1130 = vrot.lane.b32.xlu0 %v1123_v27, %s2005_s30 }
 0x1ba   : > { %v2531_v22 = vpop.permute.xlu0 %515  ;;  %v2533_v29 = vpop.permute.xlu1 %517 }
 0x1bc   : > { %1132 = vrot.lane.b32.xlu1 %v1124_v28, %s2005_s30  ;;  %565 = vrot.lane.b32.xlu0 %v559_v30, %s1994_s12  ;;  %v606_v30 = vmul.f32 %v2478_v10, %v2468_v47  ;;  %v1198_v10 = vmul.f32 %v2488_v62, %v2374_v26  ;;  %s2784_s30 = scalar_lea.hbm %s2836_s5, %s1555_s29 }
 0x1be   : > { %v717_v32 = vpop.permute.xlu1 %716  ;;  %v2538_v35 = vpop.permute.xlu0 %519 }
 0x1c0   : > { %567 = vrot.lane.b32.xlu1 %v560_v31, %s1994_s12  ;;  %569 = vrot.lane.b32.xlu0 %v561_v36, %s1994_s12  ;;  %s2007_s12 = smov 64   ;;  %v1197_v31 = vmul.f32 %v2488_v62, %v2371_v25 }
 0x1c2   : > { %v719_v40 = vpop.permute.xlu1 %718  ;;  %v721_v41 = vpop.permute.xlu0 %720 }
 0x1c3   : > { %v723_v63 = vsel %vm521_vm4, %v719_v40, %v721_v41  ;;  %v722_v6 = vsel %vm521_vm4, %v717_v32, %v719_v40  ;;  %v729_v8 = vadd.f32 %v721_v41, %v705_v1  ;;  %v629_v1 = vmul.f32 %v2495_v4, %v2371_v25 }
 0x1c4   : > { %1153 = vrot.lane.b32.xlu1 %v1147_v34, %s2006_s11  ;;  %1155 = vrot.lane.b32.xlu0 %v1148_v37, %s2006_s11  ;;  %v728_v14 = vadd.f32 %v723_v63, %v704_v48  ;;  %v727_v27 = vadd.f32 %v722_v6, %v703_v59  ;;  %v630_v63 = vmul.f32 %v2495_v4, %v2374_v26 }
 0x1c5   : > { %v1222_v59 = vmul.f32 %v2497_v5, %v2354_v13 }
 0x1c6   : > { %v741_v45 = vpop.permute.xlu1 %740  ;;  %v743_v49 = vpop.permute.xlu0 %742 }
 0x1c7   : > { %v746_v20 = vsel %vm546_vm5, %v741_v45, %v743_v49 }
 0x1c8   : > { %1157 = vrot.lane.b32.xlu1 %v1149_v43, %s2006_s11  ;;  %588 = vrot.lane.b32.xlu0 %v584_v44, %s1995_s14  ;;  %v751_v32 = vadd.f32 %v746_v20, %v727_v27  ;;  %v1223_v20 = vmul.f32 %v2497_v5, %v2361_v19  ;;  %s1406_s11 = scalar_lea.sflag [#allocation4], %s2272_s26 }
 0x1ca   : > { %v745_v55 = vpop.permute.xlu1 %744  ;;  %v765_v56 = vpop.permute.xlu0 %764 }
 0x1cb   : > { %v747_v12 = vsel %vm546_vm5, %v743_v49, %v745_v55  ;;  %v753_v21 = vadd.f32 %v745_v55, %v729_v8  ;;  %v1199_v49 = vmul.f32 %v2488_v62, %v2493_v2 }
 0x1cc   : > { %590 = vrot.lane.b32.xlu1 %v585_v54, %s1995_s14  ;;  %1178 = vrot.lane.b32.xlu0 %v1172_v50, %s2007_s12  ;;  %v752_v28 = vadd.f32 %v747_v12, %v728_v14  ;;  %s2008_s14 = smov 63   ;;  %v631_v12 = vmul.f32 %v2495_v4, %v2493_v2 }
 0x1ce   : > { %v767_v61 = vpop.permute.xlu1 %766  ;;  %v769_v0 = vpop.permute.xlu0 %768 }
 0x1cf   : > { %v772_v33 = vsel %vm770_vm6, %v767_v61, %v769_v0  ;;  %v771_v51 = vsel %vm770_vm6, %v765_v56, %v767_v61  ;;  %v778_v23 = vadd.f32 %v769_v0, %v753_v21  ;;  %v1224_v21 = vmul.f32 0.0, %v2497_v5 }
 0x1d0   : > { %1180 = vrot.lane.b32.xlu1 %v1173_v42, %s2007_s12  ;;  %1182 = vrot.lane.b32.xlu0 %v1174_v60, %s2007_s12  ;;  %v777_v36 = vadd.f32 %v772_v33, %v752_v28  ;;  %v776_v44 = vadd.f32 %v771_v51, %v751_v32  ;;  %vm1109_vm6 = vcmask 637952  }
 0x1d2   : > { %v790_v15 = vpop.permute.xlu1 %789  ;;  %v792_v57 = vpop.permute.xlu0 %791 }
 0x1d3   : > { %v796_v40 = vsel %vm795_vm7, %v790_v15, %v792_v57 }
 0x1d4   : > { %610 = vrot.lane.b32.xlu1 %v604_v9, %s1996_s16  ;;  %612 = vrot.lane.b32.xlu0 %v605_v58, %s1996_s16  ;;  %v801_v50 = vadd.f32 %v796_v40, %v776_v44  ;;  %v656_v40 = vmul.f32 0.0, %v2505_v3 }
 0x1d6   : > { %v794_v34 = vpop.permute.xlu1 %793  ;;  %v815_v37 = vpop.permute.xlu0 %814 }
 0x1d7   : > { %v797_v41 = vsel %vm795_vm7, %v792_v57, %v794_v34  ;;  %v803_v43 = vadd.f32 %v794_v34, %v778_v23  ;;  %vm1134_vm7 = vcmask 629760  }
 0x1d8   : > { %v802_v45 = vadd.f32 %v797_v41, %v777_v36  ;;  %614 = vrot.lane.b32.xlu1 %v606_v30, %s1996_s16  ;;  %1203 = vrot.lane.b32.xlu0 %v1197_v31, %s2008_s14  ;;  %s2009_s16 = smov 62   ;;  %v654_v30 = vmul.f32 %v2505_v3, %v2354_v13  ;;  %v655_v31 = vmul.f32 %v2505_v3, %v2361_v19 }
 0x1da   : > { %v817_v54 = vpop.permute.xlu1 %816  ;;  %v819_v55 = vpop.permute.xlu0 %818 }
 0x1db   : > { %v820_v56 = vsel %vm571_vm8, %v815_v37, %v817_v54  ;;  %v821_v42 = vsel %vm571_vm8, %v817_v54, %v819_v55  ;;  %v827_v60 = vadd.f32 %v819_v55, %v803_v43  ;;  %v1247_v37 = vmul.f32 %v2501_v7, %v2387_v38 }
 0x1dc   : > { %v825_v61 = vadd.f32 %v820_v56, %v801_v50  ;;  %v826_v0 = vadd.f32 %v821_v42, %v802_v45  ;;  %1205 = vrot.lane.b32.xlu1 %v1198_v10, %s2008_s14  ;;  %1207 = vrot.lane.b32.xlu0 %v1199_v49, %s2008_s14  ;;  %v1248_v10 = vmul.f32 %v2501_v7, %v2390_v39  ;;  %s1880_s14 = sshll.u32 %s2014_s24, 4  ;;  %s1881_s14 = int_to_ptr.vmem [resolvable:$false] %s1880_s14 }
 0x1dd   : > { %v1249_v49 = vmul.f32 %v2501_v7, %v2468_v47 }
 0x1de   : > { %v839_v62 = vpop.permute.xlu1 %838  ;;  %v841_v48 = vpop.permute.xlu0 %840 }
 0x1df   : > { %v844_v6 = vsel %vm592_vm9, %v839_v62, %v841_v48 }
 0x1e0   : > { %v849_v8 = vadd.f32 %v844_v6, %v825_v61  ;;  %635 = vrot.lane.b32.xlu1 %v629_v1, %s1999_s28  ;;  %637 = vrot.lane.b32.xlu0 %v630_v63, %s1999_s28  ;;  %v678_v61 = vmul.f32 %v2514_v17, %v2387_v38  ;;  %v1272_v6 = vmul.f32 %v2525_v24, %v2397_v46 }
 0x1e2   : > { %v843_v9 = vpop.permute.xlu1 %842  ;;  %v863_v58 = vpop.permute.xlu0 %862 }
 0x1e3   : > { %v845_v14 = vsel %vm592_vm9, %v841_v48, %v843_v9  ;;  %v851_v15 = vadd.f32 %v843_v9, %v827_v60  ;;  %v680_v48 = vmul.f32 %v2514_v17, %v2468_v47  ;;  %v1273_v9 = vmul.f32 %v2525_v24, %v2406_v52 }
 0x1e4   : > { %v850_v57 = vadd.f32 %v845_v14, %v826_v0  ;;  %639 = vrot.lane.b32.xlu1 %v631_v12, %s1999_s28  ;;  %1228 = vrot.lane.b32.xlu0 %v1222_v59, %s2009_s16  ;;  %v679_v0 = vmul.f32 %v2514_v17, %v2390_v39  ;;  %s2013_s28 = smov 34  }
 0x1e6   : > { %v865_v2 = vpop.permute.xlu1 %864  ;;  %v867_v4 = vpop.permute.xlu0 %866 }
 0x1e7   : > { %v868_v33 = vsel %vm616_vm10, %v863_v58, %v865_v2  ;;  %v869_v27 = vsel %vm616_vm10, %v865_v2, %v867_v4  ;;  %v875_v28 = vadd.f32 %v867_v4, %v851_v15  ;;  %v1274_v58 = vmul.f32 %v2525_v24, %v2475_v53 }
 0x1e8   : > { %v873_v51 = vadd.f32 %v868_v33, %v849_v8  ;;  %v874_v23 = vadd.f32 %v869_v27, %v850_v57  ;;  %1230 = vrot.lane.b32.xlu1 %v1223_v20, %s2009_s16  ;;  %1232 = vrot.lane.b32.xlu0 %v1224_v21, %s2009_s16  ;;  %s1882_s16 = scalar_lea.vmem %s1881_s14, 512 }
 0x1ea   : > { %v887_v32 = vpop.permute.xlu1 %886  ;;  %v889_v5 = vpop.permute.xlu0 %888 }
 0x1eb   : > { %v893_v36 = vsel %vm892_vm11, %v887_v32, %v889_v5 }
 0x1ec   : > { %v898_v34 = vadd.f32 %v893_v36, %v873_v51  ;;  %660 = vrot.lane.b32.xlu1 %v654_v30, %s1964_s7  ;;  %662 = vrot.lane.b32.xlu0 %v655_v31, %s1964_s7 }
 0x1ee   : > { %v891_v41 = vpop.permute.xlu1 %890  ;;  %v912_v43 = vpop.permute.xlu0 %911 }
 0x1ef   : > { %v894_v44 = vsel %vm892_vm11, %v889_v5, %v891_v41  ;;  %v900_v13 = vadd.f32 %v891_v41, %v875_v28  ;;  %vm1209_vm11 = vcmask 515072  }
 0x1f0   : > { %v899_v45 = vadd.f32 %v894_v44, %v874_v23  ;;  %664 = vrot.lane.b32.xlu1 %v656_v40, %s1964_s7  ;;  %1253 = vrot.lane.b32.xlu0 %v1247_v37, %s2010_s17  ;;  %s2011_s7 = smov 60  }
 0x1f2   : > { %v914_v50 = vpop.permute.xlu1 %913  ;;  %v916_v54 = vpop.permute.xlu0 %915 }
 0x1f3   : > { %v918_v55 = vsel %vm917_vm12, %v912_v43, %v914_v50  ;;  %v919_v3 = vsel %vm917_vm12, %v914_v50, %v916_v54  ;;  %v925_v56 = vadd.f32 %v916_v54, %v900_v13  ;;  %vm1234_vm12 = vcmask 506880  }
 0x1f4   : > { %v923_v42 = vadd.f32 %v918_v55, %v898_v34  ;;  %v924_v60 = vadd.f32 %v919_v3, %v899_v45  ;;  %1255 = vrot.lane.b32.xlu1 %v1248_v10, %s2010_s17  ;;  %1257 = vrot.lane.b32.xlu0 %v1249_v49, %s2010_s17 }
 0x1f6   : > { %v937_v1 = vpop.permute.xlu1 %936  ;;  %v939_v63 = vpop.permute.xlu0 %938 }
 0x1f7   : > { %v942_v7 = vsel %vm641_vm13, %v937_v1, %v939_v63 }
 0x1f8   : > { %v947_v62 = vadd.f32 %v942_v7, %v923_v42  ;;  %684 = vrot.lane.b32.xlu1 %v678_v61, %s1963_s25  ;;  %686 = vrot.lane.b32.xlu0 %v679_v0, %s1963_s25 }
 0x1fa   : > { %v941_v8 = vpop.permute.xlu1 %940  ;;  %v961_v38 = vpop.permute.xlu0 %960 }
 0x1fb   : > { %v943_v12 = vsel %vm641_vm13, %v939_v63, %v941_v8  ;;  %v949_v39 = vadd.f32 %v941_v8, %v925_v56 }
 0x1fc   : > { %v948_v59 = vadd.f32 %v943_v12, %v924_v60  ;;  %688 = vrot.lane.b32.xlu1 %v680_v48, %s1963_s25  ;;  %1278 = vrot.lane.b32.xlu0 %v1272_v6, %s2011_s7  ;;  %s2012_s25 = smov 17  }
 0x1fe   : > { %v963_v47 = vpop.permute.xlu1 %962  ;;  %v965_v17 = vpop.permute.xlu0 %964 }
 0x1ff   : > { %v966_v46 = vsel %vm385_vm0, %v961_v38, %v963_v47  ;;  %v967_v14 = vsel %vm385_vm0, %v963_v47, %v965_v17  ;;  %v973_v15 = vadd.f32 %v965_v17, %v949_v39 }
 0x200   : > { %v971_v57 = vadd.f32 %v966_v46, %v947_v62  ;;  %v972_v20 = vadd.f32 %v967_v14, %v948_v59  ;;  %1280 = vrot.lane.b32.xlu1 %v1273_v9, %s2011_s7  ;;  %1282 = vrot.lane.b32.xlu0 %v1274_v58, %s2011_s7 }
 0x202   : > { %v983_v21 = vpop.permute.xlu1 %982  ;;  %v985_v2 = vpop.permute.xlu0 %984 }
 0x203   : > { %v990_v4 = vadd.f32 %v983_v21, %v971_v57  ;;  %v986_v33 = vsel %vm338_vm3, %v983_v21, %v985_v2  ;;  %v992_v52 = vadd.f32 %v985_v2, %v973_v15 }
 0x204   : > { %v991_v27 = vadd.f32 %v986_v33, %v972_v20 }
 0x206   : > { %v1004_v53 = vpop.permute.xlu1 %1003  ;;  %v1006_v24 = vpop.permute.xlu0 %1005 }
 0x207   : > { %v1015_v28 = vadd.f32 %v1004_v53, %v990_v4  ;;  %v1010_v51 = vsel %vm1009_vm14, %v1004_v53, %v1006_v24 }
 0x208   : > { %v1016_v23 = vadd.f32 %v1010_v51, %v991_v27 }
 0x20a   : > { %v1008_v30 = vpop.permute.xlu1 %1007  ;;  %v1029_v31 = vpop.permute.xlu0 %1028 }
 0x20b   : > { %v1011_v32 = vsel %vm1009_vm14, %v1006_v24, %v1008_v30  ;;  %v1040_v5 = vadd.f32 %v1029_v31, %v1015_v28  ;;  %vm1311_vm14 = vcmask 11272  }
 0x20c   : > { %v1017_v36 = vadd.f32 %v1011_v32, %v992_v52 }
 0x20e   : > { %v1031_v34 = vpop.permute.xlu1 %1030  ;;  %v1033_v37 = vpop.permute.xlu0 %1032 }
 0x20f   : > { %v1035_v40 = vsel %vm1034_vm15, %v1029_v31, %v1031_v34  ;;  %v1036_v41 = vsel %vm1034_vm15, %v1031_v34, %v1033_v37 }
 0x210   : > { %v1041_v43 = vadd.f32 %v1035_v40, %v1016_v23  ;;  %v1042_v44 = vadd.f32 %v1036_v41, %v1017_v36  ;;  %v522_v40 = vsel %vm521_vm4, %v2531_v22, %v2533_v29  ;;  %v504_v22 = vmul.f32 %v2351_v11, %v2374_v26 }
 0x212   : > { %v1054_v13 = vpop.permute.xlu1 %1053  ;;  %v1056_v45 = vpop.permute.xlu0 %1055 }
 0x213   : > { %v1065_v10 = vadd.f32 %v1054_v13, %v1040_v5  ;;  %v1060_v49 = vsel %vm1059_vm1, %v1054_v13, %v1056_v45  ;;  %v523_v13 = vsel %vm521_vm4, %v2533_v29, %v2538_v35  ;;  %vm1159_vm4 = vcmask 621568  }
 0x214   : > { %v1066_v50 = vadd.f32 %v1060_v49, %v1041_v43 }
 0x216   : > { %v1058_v54 = vpop.permute.xlu1 %1057  ;;  %v1079_v55 = vpop.permute.xlu0 %1078 }
 0x217   : > { %v1061_v3 = vsel %vm1059_vm1, %v1056_v45, %v1058_v54  ;;  %v1090_v56 = vadd.f32 %v1079_v55, %v1065_v10  ;;  %v503_v45 = vmul.f32 %v2351_v11, %v2371_v25 }
 0x218   : > { %v1067_v42 = vadd.f32 %v1061_v3, %v1042_v44  ;;  %v502_v44 = vmul.f32 %v2351_v11, %v2357_v18 }
 0x219   : > { %v528_v54 = vadd.f32 %v523_v13, %v503_v45 }
 0x21a   : > { %v1081_v60 = vpop.permute.xlu1 %1080  ;;  %v1083_v61 = vpop.permute.xlu0 %1082  ;;  %v527_v49 = vadd.f32 %v522_v40, %v502_v44 }
 0x21b   : > { %v1085_v0 = vsel %vm1084_vm2, %v1079_v55, %v1081_v60  ;;  %v1086_v1 = vsel %vm1084_vm2, %v1081_v60, %v1083_v61 }
 0x21c   : > { %v1091_v63 = vadd.f32 %v1085_v0, %v1066_v50  ;;  %v1092_v7 = vadd.f32 %v1086_v1, %v1067_v42  ;;  %v529_v42 = vadd.f32 %v2538_v35, %v504_v22 }
 0x21e   : > { %v1104_v62 = vpop.permute.xlu1 %1103  ;;  %v1106_v48 = vpop.permute.xlu0 %1105 }
 0x21f   : > { %v1115_v6 = vadd.f32 %v1104_v62, %v1090_v56  ;;  %v1110_v8 = vsel %vm1109_vm6, %v1104_v62, %v1106_v48 }
 0x220   : > { %v2639_v38 = vadd.f32 %v1110_v8, %v1091_v63 }
 0x222   : > { %v1108_v12 = vpop.permute.xlu1 %1107  ;;  %v541_v39 = vpop.permute.xlu0 %540 }
 0x223   : > { %v1111_v59 = vsel %vm1109_vm6, %v1106_v48, %v1108_v12 }
 0x224   : > { %v2641_v9 = vadd.f32 %v1111_v59, %v1092_v7 }
 0x226   : > { %v543_v58 = vpop.permute.xlu1 %542  ;;  %v545_v47 = vpop.permute.xlu0 %544 }
 0x227   : > { %v547_v10 = vsel %vm546_vm5, %v541_v39, %v543_v58  ;;  %v548_v50 = vsel %vm546_vm5, %v543_v58, %v545_v47  ;;  %vm1184_vm5 = vcmask 523264   ;;  %v554_v8 = vadd.f32 %v545_v47, %v529_v42 }
 0x228   : > { %v552_v56 = vadd.f32 %v547_v10, %v527_v49  ;;  %v553_v25 = vadd.f32 %v548_v50, %v528_v54 }
 0x22a   : > { %v1129_v17 = vpop.permute.xlu1 %1128  ;;  %v1131_v46 = vpop.permute.xlu0 %1130 }
 0x22b   : > { %v1135_v60 = vsel %vm1134_vm7, %v1129_v17, %v1131_v46  ;;  %v1140_v11 = vadd.f32 %v1129_v17, %v1115_v6 }
 0x22c   : > { %v1141_v12 = vadd.f32 %v1135_v60, %v2639_v38 }
 0x22e   : > { %v1133_v14 = vpop.permute.xlu1 %1132  ;;  %v566_v15 = vpop.permute.xlu0 %565 }
 0x22f   : > { %v1136_v7 = vsel %vm1134_vm7, %v1131_v46, %v1133_v14 }
 0x232   : > { %v568_v57 = vpop.permute.xlu1 %567  ;;  %v570_v20 = vpop.permute.xlu0 %569 }
 0x233   : > { %v572_v55 = vsel %vm571_vm8, %v566_v15, %v568_v57  ;;  %v573_v29 = vsel %vm571_vm8, %v568_v57, %v570_v20  ;;  %vm1259_vm8 = vcmask 498688   ;;  %v1142_v15 = vadd.f32 %v1136_v7, %v2641_v9 }
 0x234   : > { %v577_v61 = vadd.f32 %v572_v55, %v552_v56  ;;  %v578_v26 = vadd.f32 %v573_v29, %v553_v25  ;;  %v579_v57 = vadd.f32 %v570_v20, %v554_v8 }
 0x236   : > { %v1154_v21 = vpop.permute.xlu1 %1153  ;;  %v1156_v2 = vpop.permute.xlu0 %1155 }
 0x237   : > { %v1160_v62 = vsel %vm1159_vm4, %v1154_v21, %v1156_v2  ;;  %v1165_v59 = vadd.f32 %v1154_v21, %v1140_v11 }
 0x238   : > { %v1166_v46 = vadd.f32 %v1160_v62, %v1141_v12 }
 0x23a   : > { %v1158_v4 = vpop.permute.xlu1 %1157  ;;  %v589_v33 = vpop.permute.xlu0 %588 }
 0x23b   : > { %v597_v35 = vadd.f32 %v589_v33, %v577_v61  ;;  %v1161_v6 = vsel %vm1159_vm4, %v1156_v2, %v1158_v4 }
 0x23c   : > { %v1167_v21 = vadd.f32 %v1161_v6, %v1142_v15 }
 0x23e   : > { %v2643_v52 = vpop.permute.xlu1 %590  ;;  %v2645_v27 = vpop.permute.xlu0 %1178 }
 0x23f   : > { %v593_v0 = vsel %vm592_vm9, %v589_v33, %v2643_v52  ;;  %v1190_v44 = vadd.f32 %v2645_v27, %v1165_v59  ;;  %v599_v2 = vadd.f32 %v2643_v52, %v579_v57  ;;  %vm1293_vm9 = vcmask 1043456  }
 0x240   : > { %v598_v39 = vadd.f32 %v593_v0, %v578_v26 }
 0x242   : > { %v2647_v53 = vpop.permute.xlu1 %1180  ;;  %v2649_v24 = vpop.permute.xlu0 %1182 }
 0x243   : > { %v1185_v4 = vsel %vm1184_vm5, %v2645_v27, %v2647_v53  ;;  %v1186_v20 = vsel %vm1184_vm5, %v2647_v53, %v2649_v24 }
 0x244   : > { %v1192_v22 = vadd.f32 %v1186_v20, %v1167_v21 }
 0x246   : > { %v611_v28 = vpop.permute.xlu1 %610  ;;  %v613_v51 = vpop.permute.xlu0 %612 }
 0x247   : > { %v617_v48 = vsel %vm616_vm10, %v611_v28, %v613_v51  ;;  %v622_v58 = vadd.f32 %v611_v28, %v597_v35 }
 0x248   : > { %v623_v14 = vadd.f32 %v617_v48, %v598_v39 }
 0x24a   : > { %v615_v23 = vpop.permute.xlu1 %614  ;;  %v2651_v30 = vpop.permute.xlu0 %1203 }
 0x24b   : > { %v618_v47 = vsel %vm616_vm10, %v613_v51, %v615_v23  ;;  %v1215_v28 = vadd.f32 %v2651_v30, %v1190_v44  ;;  %vm1368_vm10 = vcmask 277504  }
 0x24c   : > { %v624_v23 = vadd.f32 %v618_v47, %v599_v2 }
 0x24e   : > { %v2653_v31 = vpop.permute.xlu1 %1205  ;;  %v2655_v32 = vpop.permute.xlu0 %1207 }
 0x24f   : > { %v1211_v52 = vsel %vm1209_vm11, %v2653_v31, %v2655_v32 }
 0x252   : > { %v636_v5 = vpop.permute.xlu1 %635  ;;  %v638_v36 = vpop.permute.xlu0 %637 }
 0x253   : > { %v642_v17 = vsel %vm641_vm13, %v636_v5, %v638_v36  ;;  %v647_v38 = vadd.f32 %v636_v5, %v622_v58  ;;  %v1210_v5 = vsel %vm1209_vm11, %v2651_v30, %v2653_v31 }
 0x254   : > { %v648_v9 = vadd.f32 %v642_v17, %v623_v14 }
 0x256   : > { %v640_v34 = vpop.permute.xlu1 %639  ;;  %v2657_v37 = vpop.permute.xlu0 %1228 }
 0x257   : > { %v643_v45 = vsel %vm641_vm13, %v638_v36, %v640_v34  ;;  %v1240_v50 = vadd.f32 %v2657_v37, %v1215_v28  ;;  %v1191_v34 = vadd.f32 %v1185_v4, %v1166_v46  ;;  %v1733_v46 = vld [vmem:[%s2275_s9] sm:$0xff]  ;;  %s1548_s9 = sshll.u32 %s2272_s26, 4  ;;  %vm1309_vm13 = vcmask 3072  }
 0x258   : > { %v649_v54 = vadd.f32 %v643_v45, %v624_v23  ;;  %v495_v14 = vmul.f32 %v1733_v46, %v2512_v16  ;;  %s2750_s15 = scalar_lea.vmem [#allocation11], %s1548_s9 }
 0x259   : > { %s1419_s22 = sshll.u32 %s2750_s15, 4  ;;  %s2786_s22 = int_to_ptr.vmem [resolvable:$true] %s1419_s22 }
 0x25a   : > { %v2662_v41 = vpop.permute.xlu1 %1230  ;;  %v2664_v43 = vpop.permute.xlu0 %1232  ;;  %v1294_v4 = vsel %vm1293_vm9, %v495_v14, 0.0  ;;  %s1876_s12 = scalar_lea.vmem %s2786_s22, 256  ;;  %p1883_p8 = scmp.lt.s32.totalorder %s2786_s22, %s1881_s14 }
 0x25b   : > { %v1235_v30 = vsel %vm1234_vm12, %v2657_v37, %v2662_v41  ;;  %v1236_v31 = vsel %vm1234_vm12, %v2662_v41, %v2664_v43  ;;  %p1877_p4 = scmp.ne.s32.totalorder %s2786_s22, %s1876_s12  ;;  %p1884_p7 = scmp.lt.s32.totalorder %s1882_s16, %s1876_s12 }
 0x25d   : > { %p1878_p0 = pnand %p1877_p4, %p2855_p12  ;;  %p1885_p11 = por %p1884_p7, %p1883_p8 }
 0x25e   : > { %v661_v18 = vpop.permute.xlu1 %660  ;;  %v663_v3 = vpop.permute.xlu0 %662 }
 0x25f   : > { %v666_v13 = vsel %vm385_vm0, %v661_v18, %v663_v3  ;;  %v671_v51 = vadd.f32 %v661_v18, %v647_v38  ;;  %v1216_v18 = vadd.f32 %v1210_v5, %v1191_v34  ;;  %p1879_p3 = pneg %p1878_p0 }
 0x260   : > { %v672_v27 = vadd.f32 %v666_v13, %v648_v9 }
 0x261   : > { %v1241_v43 = vadd.f32 %v1235_v30, %v1216_v18  ;;  %p1886_p13 = pnand %p1885_p11, %p1879_p3 }
 0x262   : > { %v665_v1 = vpop.permute.xlu1 %664  ;;  %v1254_v63 = vpop.permute.xlu0 %1253 }
 0x263   : > { %v667_v53 = vsel %vm385_vm0, %v663_v3, %v665_v1  ;;  %v1265_v32 = vadd.f32 %v1254_v63, %v1240_v50  ;;  %v1217_v3 = vadd.f32 %v1211_v52, %v1192_v22  ;;  %vm1284_vm0 = vcmask 490496  }
 0x264   : > { %v673_v56 = vadd.f32 %v667_v53, %v649_v54 }
 0x265   : > { %v1242_v61 = vadd.f32 %v1236_v31, %v1217_v3 }
 0x266   : > { %v1256_v40 = vpop.permute.xlu1 %1255  ;;  %v1258_v33 = vpop.permute.xlu0 %1257 }
 0x267   : > { %v1260_v25 = vsel %vm1259_vm8, %v1254_v63, %v1256_v40  ;;  %v1261_v37 = vsel %vm1259_vm8, %v1256_v40, %v1258_v33  ;;  %v496_v40 = vmul.f32 %v2512_v16, %v2361_v19 }
 0x268   : > { %v1266_v11 = vadd.f32 %v1260_v25, %v1241_v43  ;;  %v1267_v26 = vadd.f32 %v1261_v37, %v1242_v61 }
 0x269   : > { %v1295_v9 = vsel %vm1293_vm9, %v496_v40, 0.0 }
 0x26a   : > { %v685_v10 = vpop.permute.xlu1 %684  ;;  %v687_v49 = vpop.permute.xlu0 %686  ;;  %v1296_v20 = vadd.f32 %v1295_v9, %v1294_v4 }
 0x26b   : > { %v2710_v24 = vadd.f32 %v685_v10, %v671_v51  ;;  %v690_v36 = vsel %vm338_vm3, %v685_v10, %v687_v49 }
 0x26c   : > { %v2713_v55 = vadd.f32 %v690_v36, %v672_v27 }
 0x26d   : > { %1316 = vrot.lane.b32.xlu1 %v2710_v24, %s2012_s25 }
 0x26e   : > { %v689_v29 = vpop.permute.xlu1 %688  ;;  %1318 = vrot.lane.b32.xlu0 %v2713_v55, %s2012_s25  ;;  %v1279_v42 = vpop.permute.xlu0 %1278 }
 0x26f   : > { %v691_v60 = vsel %vm338_vm3, %v687_v49, %v689_v29  ;;  %v2728_v41 = vadd.f32 %v1279_v42, %v1265_v32  ;;  %vm1322_vm3 = vcmask 138240  }
 0x270   : > { %v697_v0 = vadd.f32 %v691_v60, %v673_v56 }
 0x272   : > { %v1281_v1 = vpop.permute.xlu1 %1280  ;;  %1320 = vrot.lane.b32.xlu1 %v697_v0, %s2012_s25  ;;  %1362 = vrot.lane.b32.xlu0 %v2728_v41, %s2013_s28  ;;  %v1283_v63 = vpop.permute.xlu0 %1282 }
 0x273   : > { %v1285_v7 = vsel %vm1284_vm0, %v1279_v42, %v1281_v1  ;;  %v1286_v62 = vsel %vm1284_vm0, %v1281_v1, %v1283_v63 }
 0x274   : > { %v1291_v35 = vadd.f32 %v1285_v7, %v1266_v11  ;;  %v1292_v48 = vadd.f32 %v1286_v62, %v1267_v26 }
 0x276   : > { %1364 = vrot.lane.b32.xlu1 %v1291_v35, %s2013_s28  ;;  %1366 = vrot.lane.b32.xlu0 %v1292_v48, %s2013_s28 }
 0x2df   : > { %v1317_v8 = vpop.permute.xlu1 %1316 }
 0x2e0   : > { %v1319_v12 = vpop.permute.xlu0 %1318 }
 0x2e1   : > { %v1323_v39 = vsel %vm1322_vm3, %v1317_v8, %v1319_v12 }
 0x2e2   : > { %v1327_v17 = vsel %vm1293_vm9, %v1323_v39, 0.0 }
 0x2e4   : > { %v1321_v59 = vpop.permute.xlu1 %1320  ;;  %v1363_v6 = vpop.permute.xlu0 %1362 }
 0x2e5   : > { %v1324_v58 = vsel %vm1322_vm3, %v1319_v12, %v1321_v59 }
 0x2e6   : > { %v1328_v15 = vsel %vm1293_vm9, %v1324_v58, 0.0 }
 0x2e7   : > { %v1329_v57 = vadd.f32 %v1328_v15, %v1327_v17 }
 0x2e8   : > { %v1365_v33 = vpop.permute.xlu1 %1364  ;;  %v1367_v44 = vpop.permute.xlu0 %1366 }
 0x2e9   : > { %v1369_v47 = vsel %vm1368_vm10, %v1363_v6, %v1365_v33  ;;  %v1370_v38 = vsel %vm1368_vm10, %v1365_v33, %v1367_v44  ;;  %1330 = vadd.xlane.f32.xlu1 %v1329_v57 }
 0x2ea   : > { %v1373_v13 = vsel %vm1293_vm9, %v1369_v47, 0.0  ;;  %v1374_v21 = vsel %vm1293_vm9, %v1370_v38, 0.0 }
 0x2eb   : > { %v1375_v2 = vadd.f32 %v1374_v21, %v1373_v13 }
 0x2ed   : > { %1376 = vadd.xlane.f32.xlu0 %v1375_v2 }
 0x2f1   : > { %1297 = vadd.xlane.f32.xlu0 %v1296_v20 }
 0x376   : > { %v1331_v19 = vpop.xlane.xlu1 %1330 }
 0x377   : > { %v1332_v16 = vmul.f32 0.00390625, %v1331_v19 }
 0x379   : > { %1357 = vst.msk [vmem:[%s2750_s15 + $0x4] sm:$0xf] %vm1309_vm13, %v1332_v16  ;;  %v1333_v28 = vsub.f32 %v2710_v24, %v1332_v16  ;;  %v1334_v45 = vsub.f32 %v2713_v55, %v1332_v16  ;;  %v1335_v27 = vsub.f32 %v697_v0, %v1332_v16 }
 0x37a   : > { %v1377_v51 = vpop.xlane.xlu0 %1376 }
 0x37b   : > { %v1378_v23 = vmul.f32 0.00390625, %v1377_v51  ;;  %v1336_v5 = vmul.f32 %v1333_v28, %v1333_v28  ;;  %v1337_v52 = vmul.f32 %v1334_v45, %v1334_v45  ;;  %v1338_v53 = vmul.f32 %v1335_v27, %v1335_v27 }
 0x37d   : > { %1403 = vst.msk [vmem:[%s2750_s15 + $0x8] sm:$0xf] %vm1309_vm13, %v1378_v23  ;;  %1342 = vrot.lane.b32.xlu1 %v1336_v5, %s2012_s25  ;;  %1344 = vrot.lane.b32.xlu0 %v1337_v52, %s2012_s25  ;;  %v1380_v10 = vsub.f32 %v1291_v35, %v1378_v23  ;;  %v1379_v24 = vsub.f32 %v2728_v41, %v1378_v23 }
 0x37e   : > { %v1298_v49 = vpop.xlane.xlu0 %1297  ;;  %v1381_v22 = vsub.f32 %v1292_v48, %v1378_v23 }
 0x37f   : > { %v1299_v50 = vmul.f32 0.00390625, %v1298_v49  ;;  %v1383_v36 = vmul.f32 %v1380_v10, %v1380_v10  ;;  %v1382_v34 = vmul.f32 %v1379_v24, %v1379_v24 }
 0x380   : > { %v1384_v54 = vmul.f32 %v1381_v22, %v1381_v22 }
 0x381   : > { %1310 = vst.msk [vmem:[%s2750_s15] sm:$0xf] %vm1309_vm13, %v1299_v50  ;;  %1346 = vrot.lane.b32.xlu1 %v1338_v53, %s2012_s25  ;;  %1390 = vrot.lane.b32.xlu0 %v1383_v36, %s2013_s28  ;;  %v1300_v55 = vsub.f32 %v495_v14, %v1299_v50  ;;  %v1301_v30 = vsub.f32 %v496_v40, %v1299_v50 }
 0x383   : > { %v1302_v31 = vmul.f32 %v1300_v55, %v1300_v55  ;;  %v1303_v32 = vmul.f32 %v1301_v30, %v1301_v30 }
 0x385   : > { %1388 = vrot.lane.b32.xlu1 %v1382_v34, %s2013_s28  ;;  %v1304_v18 = vsel %vm1293_vm9, %v1302_v31, 0.0  ;;  %v1305_v3 = vsel %vm1293_vm9, %v1303_v32, 0.0 }
 0x386   : > { %v1306_v56 = vadd.f32 %v1305_v3, %v1304_v18 }
 0x389   : > { %1392 = vrot.lane.b32.xlu1 %v1384_v54, %s2013_s28 }
 0x3a0   : > { %1307 = vadd.xlane.f32.xlu0 %v1306_v56 }
 0x3ef   : > { %v1343_v29 = vpop.permute.xlu1 %1342  ;;  %v1345_v42 = vpop.permute.xlu0 %1344 }
 0x3f0   : > { %v1348_v25 = vsel %vm1322_vm3, %v1343_v29, %v1345_v42 }
 0x3f1   : > { %v1352_v41 = vsel %vm1293_vm9, %v1348_v25, 0.0 }
 0x3f3   : > { %v1347_v37 = vpop.permute.xlu1 %1346  ;;  %v1391_v11 = vpop.permute.xlu0 %1390 }
 0x3f4   : > { %v1349_v60 = vsel %vm1322_vm3, %v1345_v42, %v1347_v37 }
 0x3f5   : > { %v1353_v43 = vsel %vm1293_vm9, %v1349_v60, 0.0 }
 0x3f6   : > { %v1354_v61 = vadd.f32 %v1353_v43, %v1352_v41 }
 0x3f7   : > { %v1389_v0 = vpop.permute.xlu1 %1388 }
 0x3f8   : > { %1355 = vadd.xlane.f32.xlu1 %v1354_v61  ;;  %v1394_v26 = vsel %vm1368_vm10, %v1389_v0, %v1391_v11 }
 0x3f9   : > { %v1398_v7 = vsel %vm1293_vm9, %v1394_v26, 0.0 }
 0x3fb   : > { %v1393_v1 = vpop.permute.xlu1 %1392 }
 0x3fc   : > { %v1395_v63 = vsel %vm1368_vm10, %v1391_v11, %v1393_v1 }
 0x3fd   : > { %v1399_v62 = vsel %vm1293_vm9, %v1395_v63, 0.0 }
 0x3fe   : > { %v1400_v35 = vadd.f32 %v1399_v62, %v1398_v7 }
 0x400   : > { %1401 = vadd.xlane.f32.xlu0 %v1400_v35 }
 0x42d   : > { %v1308_v48 = vpop.xlane.xlu0 %1307 }
 0x42e   : > { %1312 = vst.msk [vmem:[%s2750_s15] sm:$0xf] %vm1311_vm14, %v1308_v48 }
 0x485   : > { %v1356_v8 = vpop.xlane.xlu1 %1355 }
 0x486   : > { %1358 = vst.msk [vmem:[%s2750_s15 + $0x4] sm:$0xf] %vm1311_vm14, %v1356_v8 }
 0x48d   : > { %v1402_v12 = vpop.xlane.xlu0 %1401 }
 0x48e   : > { %1404 = vst.msk [vmem:[%s2750_s15 + $0x8] sm:$0xf] %vm1311_vm14, %v1402_v12 }
 0x48f   : > { %1889 = shalt.err (!%p1886_p13)
}
 0x490   : > { %s1890_s17 = scalar_lea.hbm %s2784_s30, 256  ;;  %s1894_s28 = scalar_lea.hbm %s2836_s5, 512 }
 0x491   : > { %p1891_p9 = scmp.ne.s32.totalorder %s2784_s30, %s1890_s17  ;;  %p1895_p1 = scmp.lt.u32.totalorder %s2784_s30, %s2836_s5 }
 0x492   : > { %p1896_p2 = scmp.lt.u32.totalorder %s1894_s28, %s1890_s17  ;;  %p1898_p4 = scmp.lt.u32.totalorder %s1890_s17, %s2784_s30 }
 0x493   : > { %p1892_p10 = pnand %p1891_p9, %p2855_p12 }
 0x494   : > { %p1897_p6 = por %p1896_p2, %p1895_p1 }
 0x495   : > { %p1893_p5 = pneg %p1892_p10 }
 0x496   : > { %p1899_p0 = por %p1898_p4, %p1897_p6 }
 0x498   : > { %p1900_p3 = pnand %p1899_p0, %p1893_p5 }
 0x49a   : > { %1903 = shalt.err (!%p1900_p3)
}
 0x49b   : > { %s2015_s29 = smov 128   ;;  %s2016_s23 = smov 8  }
 0x49c   : > { %1574 = dma.vmem_to_hbm [thread:$0]  (%p2855_p12), %s2786_s22, 256, %s2784_s30, %s1406_s11, %s2015_s29, %s2015_s29, %s2016_s23  }
 0x49d PF: > { %s1434_s8 = sand.u32 1, %s1942_s18   ;;  %p2856_p8 = scmp.ne.s32.totalorder %s2846_s10, 0 }
 0x49e   : > { %p2857_p7 = scmp.ge.s32.totalorder %s1954_s21, 2  ;;  %s1435_s12 = scalar_lea.sflag [#allocation4], %s1434_s8 }
 0x4a0   : > { %p1594_p11 = pnand %p2857_p7, %p2856_p8 }
 0x4a2   : > { %1937 = dma.done.wait (!%p1594_p11), %s1435_s12, 256  }
 0x4a3   : > { %1939 = vsyncadd (!%p1594_p11), %s1435_s12, 4294967040  ;;  %p20_p13 = scmp.ge.s32.totalorder %s2195_s13, 4   ;;  %s2858_s18 = smov %s1946_s19 }
 0x4a4   : > { %s2859_s19 = smov %s1950_s20  ;;  %s2860_s20 = smov %s2212_s27 }
 0x4a5   : > { %s2861_s21 = smov %s2195_s13  ;;  %22 = sbr.rel (!%p20_p13) target bundleno = 7 (0x7), region = 102 }
 0x4ac   :  { %1440 = vsyncpa [#allocation3], 1 }
 0x4ad   :  { %1442 = vsyncpa [#allocation3 + $0x1], 1 }
 0x4ae   :  { %1443 = vsyncpa [#allocation6], 1 }
 0x4af   :  { %1445 = vsyncpa [#allocation6 + $0x1], 1 }
 0x4b0   :  { %1446 = vsyncpa [#allocation9], 1 }
 0x4b1   :  { %1447 = vsyncpa [#allocation4], 1 }
 0x4b2   :  { %1449 = vsyncpa [#allocation4 + $0x1], 1 }

// kernel: mspdc_forward.3
= control target key start
LH: loop header
LB: loop body
LE: loop exit
PB: predicated region body
PF: predicated region fallthrough
CT: control target
= control target key end

     0   :  { %11 = vsyncpa [#allocation3], 0  ;;  %s3088_s0 = inlined_call_operand.hbm [shape: f32[4,320], index: 0, kind: input, shape index: {}]   ;;  %s3089_s1 = inlined_call_operand.hbm [shape: f32[2,4,256], index: 1, kind: input, shape index: {}]   ;;  %s3090_s2 = inlined_call_operand.hbm [shape: f32[4,1], index: 2, kind: input, shape index: {}]   ;;  %s3091_s3 = inlined_call_operand.hbm [shape: f32[4,9], index: 3, kind: input, shape index: {}]   ;;  %s3092_s4 = inlined_call_operand.hbm [shape: f32[4,25], index: 4, kind: input, shape index: {}]   ;;  %s3093_s5 = inlined_call_operand.hbm [shape: f32[12,1], index: 5, kind: input, shape index: {}]   ;;  %s3094_s6 = inlined_call_operand.hbm [shape: f32[2,12,256], index: 6, kind: output, shape index: {}]  }
   0x1   :  { %12 = vsyncpa [#allocation6], 0 }
   0x2   :  { %14 = vsyncpa [#allocation6 + $0x1], 0 }
   0x3   :  { %15 = vsyncpa [#allocation9], 0 }
   0x4   :  { %16 = vsyncpa [#allocation12], 0 }
   0x5   :  { %17 = vsyncpa [#allocation4], 0 }
   0x6   :  { %19 = vsyncpa [#allocation4 + $0x1], 0  ;;  %s2274_s21 = smov 0   ;;  %s2276_s22 = smov 0  }
   0x7   :  { %s2278_s23 = smov 0   ;;  %s2280_s24 = smov 0  }
   0x8 LB: > { %s2174_s25 = smov [#allocation7]   ;;  %s2295_s27 = sadd.s32 4294967295, %s2172_s24   ;;  %s2172_s24 = sphi %s2280_s24, %s3123_s24   ;;  %s2168_s23 = sphi %s2278_s23, %s3122_s23   ;;  %s2164_s22 = sphi %s2276_s22, %s3121_s22   ;;  %s2160_s21 = sphi %s2274_s21, %s3120_s21  }
   0x9   : > { %s211_s26 = sshll.u32 %s2174_s25, 4  ;;  %p1691_p0 = scmp.ge.s32.totalorder %s2172_s24, 1  ;;  %s2300_s26 = int_to_ptr.vmem [resolvable:$true] %s211_s26 }
   0xa   : > { %p3095_p1 = scmp.eq.s32.totalorder %s2295_s27, 0  ;;  %p187_p2 = scmp.lt.s32.totalorder %s2172_s24, 3 }
   0xb   : > { %s2175_s29 = smov [#allocation8]   ;;  %s2176_s7 = smov [#allocation2]  }
   0xc   : > { %p2302_p3 = pnand %p1691_p0, %p187_p2  ;;  %s222_s30 = sshll.u32 %s2175_s29, 4  ;;  %s2309_s30 = int_to_ptr.vmem [resolvable:$true] %s222_s30 }
   0xd   : > { %s200_s8 = sshll.u32 %s2176_s7, 4  ;;  %s2177_s10 = smov [#allocation10]   ;;  %s2317_s8 = int_to_ptr.vmem [resolvable:$true] %s200_s8 }
   0xe   : > { %s3098_s28 = scalar_select %p2302_p3, 1, 0 }
   0xf   : > { %p1751_p5 = pneg %p2302_p3  ;;  %s2319_s11 = sshll.u32 %s2177_s10, 4  ;;  %s234_s11 = int_to_ptr.vmem [resolvable:$true] %s2319_s11 }
  0x10   : > { %s1920_s14 = scalar_lea.hbm %s3090_s2, 64 }
  0x11   : > { %p2313_p6 = pnand %p1751_p5, %p3095_p1  ;;  %p1921_p7 = scmp.ne.s32.totalorder %s3090_s2, %s1920_s14 }
  0x12   : > { %p1927_p11 = scmp.lt.u32.totalorder %s1920_s14, %s3090_s2 }
  0x13   : > { %p2329_p8 = pneg %p2313_p6 }
  0x15   : > { %p1923_p9 = pnand %p2329_p8, %p1921_p7 }
  0x17   : > { %p1924_p10 = pneg %p1923_p9 }
  0x19   : > { %p1929_p12 = pnand %p1927_p11, %p1924_p10 }
  0x1b   : > { %1932 = shalt.err (!%p1929_p12)
}
  0x1c   : > { %s1933_s20 = scalar_lea.vmem %s2300_s26, 64  ;;  %p1941_p5 = scmp.lt.s32.totalorder %s2300_s26, %s2300_s26 }
  0x1d   : > { %p1934_p13 = scmp.ne.s32.totalorder %s2300_s26, %s1933_s20  ;;  %p1942_p4 = scmp.lt.s32.totalorder %s1933_s20, %s1933_s20 }
  0x1f   : > { %p1936_p0 = pnand %p1934_p13, %p2329_p8  ;;  %p1943_p7 = por %p1942_p4, %p1941_p5 }
  0x21   : > { %p1937_p2 = pneg %p1936_p0 }
  0x23   : > { %p1944_p9 = pnand %p1943_p7, %p1937_p2 }
  0x25   : > { %1947 = shalt.err (!%p1944_p9)
}
  0x26   : > { %1757 = dma.hbm_to_vmem [thread:$0]  (!%p2313_p6), %s3090_s2, 64, %s2300_s26, [#allocation6]  }
  0x27   : > { %s1948_s12 = scalar_lea.hbm %s3091_s3, 64 }
  0x28   : > { %p1949_p10 = scmp.ne.s32.totalorder %s3091_s3, %s1948_s12  ;;  %p1955_p12 = scmp.lt.u32.totalorder %s1948_s12, %s3091_s3 }
  0x2a   : > { %p1951_p4 = pnand %p1949_p10, %p2329_p8 }
  0x2c   : > { %p1952_p11 = pneg %p1951_p4 }
  0x2e   : > { %p1957_p13 = pnand %p1955_p12, %p1952_p11 }
  0x30   : > { %1960 = shalt.err (!%p1957_p13)
}
  0x31   : > { %s1961_s26 = scalar_lea.vmem %s2309_s30, 64  ;;  %p1969_p7 = scmp.lt.s32.totalorder %s2309_s30, %s2309_s30 }
  0x32   : > { %p1962_p0 = scmp.ne.s32.totalorder %s2309_s30, %s1961_s26  ;;  %p1970_p9 = scmp.lt.s32.totalorder %s1961_s26, %s1961_s26 }
  0x34   : > { %p1964_p2 = pnand %p1962_p0, %p2329_p8  ;;  %p1971_p10 = por %p1970_p9, %p1969_p7 }
  0x36   : > { %p1965_p5 = pneg %p1964_p2 }
  0x38   : > { %p1972_p4 = pnand %p1971_p10, %p1965_p5 }
  0x3a   : > { %1975 = shalt.err (!%p1972_p4)
}
  0x3b   : > { %1760 = dma.hbm_to_vmem [thread:$0]  (!%p2313_p6), %s3091_s3, 64, %s2309_s30, [#allocation9]  }
  0x3c   : > { %s1976_s29 = scalar_lea.hbm %s3088_s0, 192 }
  0x3d   : > { %p1977_p11 = scmp.ne.s32.totalorder %s3088_s0, %s1976_s29  ;;  %p1983_p0 = scmp.lt.u32.totalorder %s1976_s29, %s3088_s0 }
  0x3f   : > { %p1979_p12 = pnand %p1977_p11, %p2329_p8 }
  0x41   : > { %p1980_p13 = pneg %p1979_p12 }
  0x43   : > { %p1985_p2 = pnand %p1983_p0, %p1980_p13 }
  0x45   : > { %1988 = shalt.err (!%p1985_p2)
}
  0x46   : > { %s1989_s30 = scalar_lea.vmem %s2317_s8, 192  ;;  %p1997_p10 = scmp.lt.s32.totalorder %s2317_s8, %s2317_s8 }
  0x47   : > { %p1990_p5 = scmp.ne.s32.totalorder %s2317_s8, %s1989_s30  ;;  %p1998_p4 = scmp.lt.s32.totalorder %s1989_s30, %s1989_s30 }
  0x49   : > { %p1992_p7 = pnand %p1990_p5, %p2329_p8  ;;  %p1999_p11 = por %p1998_p4, %p1997_p10 }
  0x4b   : > { %p1993_p9 = pneg %p1992_p7 }
  0x4d   : > { %p2000_p12 = pnand %p1999_p11, %p1993_p9 }
  0x4f   : > { %2003 = shalt.err (!%p2000_p12)
}
  0x50   : > { %1754 = dma.hbm_to_vmem [thread:$0]  (!%p2313_p6), %s3088_s0, 192, %s2317_s8, [#allocation3]  }
  0x51   : > { %s2178_s16 = smov [#allocation11]   ;;  %s2004_s20 = scalar_lea.hbm %s3092_s4, 64 }
  0x52   : > { %s243_s26 = sshll.u32 %s2178_s16, 4  ;;  %p2005_p13 = scmp.ne.s32.totalorder %s3092_s4, %s2004_s20  ;;  %s244_s26 = int_to_ptr.vmem [resolvable:$true] %s243_s26 }
  0x53   : > { %p2011_p5 = scmp.lt.u32.totalorder %s2004_s20, %s3092_s4 }
  0x54   : > { %p2007_p0 = pnand %p2005_p13, %p2329_p8 }
  0x56   : > { %p2008_p2 = pneg %p2007_p0 }
  0x58   : > { %p2013_p7 = pnand %p2011_p5, %p2008_p2 }
  0x5a   : > { %2016 = shalt.err (!%p2013_p7)
}
  0x5b   : > { %s2017_s8 = scalar_lea.vmem %s234_s11, 64  ;;  %p2025_p11 = scmp.lt.s32.totalorder %s234_s11, %s234_s11 }
  0x5c   : > { %p2018_p9 = scmp.ne.s32.totalorder %s234_s11, %s2017_s8  ;;  %p2026_p12 = scmp.lt.s32.totalorder %s2017_s8, %s2017_s8 }
  0x5e   : > { %p2020_p10 = pnand %p2018_p9, %p2329_p8  ;;  %p2027_p1 = por %p2026_p12, %p2025_p11 }
  0x60   : > { %p2021_p4 = pneg %p2020_p10 }
  0x62   : > { %p2028_p3 = pnand %p2027_p1, %p2021_p4 }
  0x64   : > { %2031 = shalt.err (!%p2028_p3)
}
  0x65   : > { %1763 = dma.hbm_to_vmem [thread:$0]  (!%p2313_p6), %s3092_s4, 64, %s234_s11, [#allocation9]  }
  0x66   : > { %s2032_s15 = scalar_lea.hbm %s3093_s5, 256 }
  0x67   : > { %p2033_p13 = scmp.ne.s32.totalorder %s3093_s5, %s2032_s15  ;;  %p2039_p3 = scmp.lt.u32.totalorder %s2032_s15, %s3093_s5 }
  0x69   : > { %p2035_p0 = pnand %p2033_p13, %p2329_p8 }
  0x6b   : > { %p2036_p1 = pneg %p2035_p0 }
  0x6d   : > { %p2041_p2 = pnand %p2039_p3, %p2036_p1 }
  0x6f   : > { %2044 = shalt.err (!%p2041_p2)
}
  0x70   : > { %s2045_s25 = scalar_lea.vmem %s244_s26, 256  ;;  %p2053_p10 = scmp.lt.s32.totalorder %s244_s26, %s244_s26 }
  0x71   : > { %p2046_p5 = scmp.ne.s32.totalorder %s244_s26, %s2045_s25  ;;  %p2054_p4 = scmp.lt.s32.totalorder %s2045_s25, %s2045_s25 }
  0x73   : > { %p2048_p7 = pnand %p2046_p5, %p2329_p8  ;;  %p2055_p11 = por %p2054_p4, %p2053_p10 }
  0x75   : > { %p2049_p9 = pneg %p2048_p7 }
  0x77   : > { %p2056_p12 = pnand %p2055_p11, %p2049_p9 }
  0x79   : > { %2059 = shalt.err (!%p2056_p12)
}
  0x7a   : > { %s2179_s11 = smov 128   ;;  %s2180_s17 = smov 8  }
  0x7b   : > { %1766 = dma.hbm_to_vmem [thread:$0]  (!%p2313_p6), %s3093_s5, 256, %s244_s26, [#allocation12], %s2179_s11, %s2179_s11, %s2180_s17  }
  0x7c   : > { %s1690_s10 = sadd.s32 4294967294, %s2172_s24   ;;  %s2435_s8 = sadd.s32 1, %s2172_s24  }
  0x7d   : > { %s53_s12 = sadd.s32 1, %s2168_s23  ;;  %s50_s13 = ssub.s32 %s2172_s24, %s2435_s8 }
  0x7e   : > { %p60_p8 = scmp.ne.s32.totalorder %s2168_s23, %s2164_s22  ;;  %p51_p13 = scmp.eq.s32.totalorder %s50_s13, 0 }
  0x7f   : > { %p61_p0 = scmp.eq.s32.totalorder %s2172_s24, 0  ;;  %p66_p1 = scmp.ne.s32.totalorder %s2164_s22, %s2160_s21 }
  0x80   : > { %p174_p3 = scmp.eq.s32.totalorder %s2295_s27, 1  ;;  %p3101_p5 = scmp.eq.s32.totalorder %s2295_s27, 0 }
  0x81   : > { %s2447_s9 = scalar_select %p51_p13, %s2168_s23, %s53_s12  }
  0x82   : > { %p62_p2 = por %p61_p0, %p60_p8  ;;  %p2451_p7 = por %p3101_p5, %p66_p1 }
  0x83   : > { %p2455_p6 = por %p174_p3, %p60_p8  ;;  %p180_p9 = scmp.eq.s32.totalorder %s1690_s10, 1 }
  0x84   : > { %p1780_p10 = scmp.lt.s32.totalorder %s2172_s24, 2  ;;  %s257_s14 = sand.u32 1, %s2172_s24  }
  0x85   : > { %s3103_s30 = scalar_select %p2455_p6, 1, 0 }
  0x86   : > { %p2461_p4 = por %p180_p9, %p66_p1  ;;  %s259_s16 = sand.u32 1, %s2168_s23  }
  0x87   : > { %s1725_s18 = sshll.u32 %s2172_s24, 7  ;;  %s1698_s19 = sshll.u32 %s259_s16, 3 }
  0x88   : > { %s3104_s15 = scalar_select %p2461_p4, 1, 0 }
  0x89   : > { %s2470_s11 = scalar_lea.hbm %s3089_s1, %s1725_s18  ;;  %p2472_p11 = pnand %p1780_p10, %p62_p2 }
  0x8a   : > { %s261_s29 = scalar_lea.vmem [#allocation5], %s1698_s19  ;;  %s258_s10 = scalar_lea.sflag [#allocation6], %s257_s14 }
  0x8b   : > { %s269_s7 = sshll.u32 %s261_s29, 4  ;;  %s2060_s12 = scalar_lea.hbm %s2470_s11, 128  ;;  %s2476_s7 = int_to_ptr.vmem [resolvable:$true] %s269_s7 }
  0x8c   : > { %p2061_p12 = scmp.ne.s32.totalorder %s2470_s11, %s2060_s12  ;;  %p2062_p8 = pneg %p2472_p11 }
  0x8d   : > { %s2065_s18 = scalar_lea.hbm %s3089_s1, 256  ;;  %p2066_p1 = scmp.lt.u32.totalorder %s2470_s11, %s3089_s1 }
  0x8e   : > { %p2063_p13 = pnand %p2062_p8, %p2061_p12  ;;  %p2067_p3 = scmp.lt.u32.totalorder %s2065_s18, %s2060_s12 }
  0x8f   : > { %p2069_p5 = scmp.lt.u32.totalorder %s2060_s12, %s2470_s11 }
  0x90   : > { %p2064_p0 = pneg %p2063_p13  ;;  %p2068_p2 = por %p2067_p3, %p2066_p1 }
  0x92   : > { %p2070_p9 = por %p2069_p5, %p2068_p2 }
  0x94   : > { %p2071_p10 = pnand %p2070_p9, %p2064_p0 }
  0x96   : > { %2074 = shalt.err (!%p2071_p10)
}
  0x97   : > { %s2075_s14 = scalar_lea.vmem %s2476_s7, 128  ;;  %s2181_s19 = smov [#allocation5]  }
  0x98   : > { %p2076_p12 = scmp.ne.s32.totalorder %s2476_s7, %s2075_s14  ;;  %s2080_s29 = sshll.u32 %s2181_s19, 4  ;;  %s2081_s29 = int_to_ptr.vmem [resolvable:$false] %s2080_s29 }
  0x99   : > { %s2082_s13 = scalar_lea.vmem %s2081_s29, 256  ;;  %p2083_p6 = scmp.lt.s32.totalorder %s2476_s7, %s2081_s29 }
  0x9a   : > { %p2078_p13 = pnand %p2076_p12, %p2062_p8  ;;  %p2084_p1 = scmp.lt.s32.totalorder %s2082_s13, %s2075_s14 }
  0x9c   : > { %p2079_p4 = pneg %p2078_p13  ;;  %p2085_p3 = por %p2084_p1, %p2083_p6 }
  0x9e   : > { %p2086_p2 = pnand %p2085_p3, %p2079_p4 }
  0xa0   : > { %2089 = shalt.err (!%p2086_p2)
}
  0xa1   : > { %1770 = dma.hbm_to_vmem [thread:$0]  (!%p2472_p11), %s2470_s11, 128, %s2476_s7, %s258_s10  }
  0xa2   : > { %p3106_p0 = scmp.ne.s32.totalorder %s3098_s28, 0 }
  0xa3   : > { %p3107_p8 = scmp.eq.s32.totalorder (!%p3106_p0), %s2295_s27, 0 }
  0xa4   : > { %278 = sbr.rel (%p3106_p0) target bundleno = 886 (0x376), region = 44 }
  0xab   : > { %2135 = dma.done.wait (%p3107_p8), [#allocation3], 192   ;;  %p3108_p5 = pmov %p3107_p8 }
  0xac   : > { %s284_s12 = sand.u32 1, %s2295_s27   ;;  %s2511_s16 = sand.u32 1, %s2164_s22  }
  0xad   : > { %2137 = vsyncadd (%p3108_p5), [#allocation3], 4294967104  ;;  %s1703_s17 = sshll.u32 %s2511_s16, 3  ;;  %s285_s18 = scalar_lea.sflag [#allocation6], %s284_s12 }
  0xae   : > { %s2514_s20 = scalar_lea.vmem [#allocation5], %s1703_s17 }
  0xaf   : > { %2139 = dma.done.wait (%p2451_p7), %s285_s18, 128  }
  0xb0   : > { %2141 = vsyncadd (%p2451_p7), %s285_s18, 4294967168  ;;  %p3109_p6 = pmov %p3108_p5 }
  0xb1   : > { %p3110_p4 = pmov %p3108_p5 }
  0xb2   : > { %2143 = dma.done.wait (%p3109_p6), [#allocation6], 64  }
  0xb3   : > { %2145 = vsyncadd (%p3110_p4), [#allocation6], 4294967232  ;;  %p3111_p11 = pmov %p3110_p4 }
  0xb4   : > { %p3112_p9 = pmov %p3110_p4 }
  0xb5   : > { %2147 = dma.done.wait (%p3111_p11), [#allocation9], 128  }
  0xb6   : > { %2149 = vsyncadd (%p3112_p9), [#allocation9], 4294967168  ;;  %p3113_p10 = pmov %p3110_p4 }
  0xb7   : > { %p3114_p12 = pmov %p3110_p4 }
  0xb8   : > { %2151 = dma.done.wait (%p3113_p10), [#allocation12], 256  }
  0xb9   : > { %2153 = vsyncadd (%p3114_p12), [#allocation12], 4294967040  ;;  %v344_v0 = vlaneseq  ;;  %v2182_v1 = vmov 5   ;;  %v2183_v2 = vmov 0   ;;  %v338_v7 = vld [vmem:[#allocation2 + $0x8] sm:$0xf] }
  0xba   : > { %1887 = vset.pattern.permute.xlu0 %v2182_v1  ;;  %1882 = vset.pattern.permute.xlu1 %v2183_v2  ;;  %v337_v8 = vld [vmem:[#allocation2] sm:$0xff]  ;;  %s2184_s28 = smov 94   ;;  %s2185_s26 = smov 95   ;;  %v2188_v40 = vmov 1   ;;  %v2189_v41 = vmov 4   ;;  %v2190_v42 = vmov 2  }
  0xbb   : > { %v2535_v3 = vshrl.u32 %v344_v0, 7  ;;  %s2186_s11 = smov 97   ;;  %s2187_s7 = smov 98   ;;  %v335_v38 = vld [vmem:[#allocation8] sm:$0xf]  ;;  %v2191_v43 = vmov 7  }
  0xbc   : > { %v2551_v39 = vld [vmem:[#allocation10] sm:$0xf]  ;;  %v2192_v44 = vmov 3   ;;  %v2193_v45 = vmov 10   ;;  %v2194_v46 = vmov 13   ;;  %v2195_v47 = vmov 6  }
  0xbd   : > { %v346_v4 = vsub.s32 0, %v2535_v3  ;;  %v393_v5 = vsub.s32 1, %v2535_v3  ;;  %v350_v6 = vsub.s32 4, %v2535_v3  ;;  %v397_v9 = vsub.s32 5, %v2535_v3  ;;  %s2202_s10 = smov 127   ;;  %s2203_s25 = smov 126  }
  0xbe   : > { %v444_v17 = vsub.s32 6, %v2535_v3  ;;  %v440_v21 = vsub.s32 2, %v2535_v3  ;;  %v487_v26 = vsub.s32 3, %v2535_v3  ;;  %v491_v31 = vsub.s32 7, %v2535_v3  ;;  %s2204_s14 = smov 112   ;;  %s2205_s19 = smov 111  }
  0xbf   : > { %v355_v10 = vrot.slane %v338_v7, %v346_v4  ;;  %v347_v11 = vrot.slane %v337_v8, %v346_v4  ;;  %v394_v12 = vrot.slane %v337_v8, %v393_v5  ;;  %v351_v13 = vrot.slane %v337_v8, %v350_v6  ;;  %s2206_s29 = smov 110   ;;  %s2207_s13 = smov 96  }
  0xc0   : > { %v402_v16 = vrot.slane %v338_v7, %v393_v5  ;;  %v398_v20 = vrot.slane %v337_v8, %v397_v9  ;;  %v445_v22 = vrot.slane %v337_v8, %v444_v17  ;;  %v441_v25 = vrot.slane %v337_v8, %v440_v21  ;;  %s2217_s12 = smov 125   ;;  %s2218_s17 = smov 124  }
  0xc1   : > { %v370_v14 = vrot.slane %v355_v10, %v346_v4  ;;  %v362_v15 = vrot.slane %v347_v11, %v346_v4  ;;  %v409_v18 = vrot.slane %v394_v12, %v393_v5  ;;  %v366_v19 = vrot.slane %v351_v13, %v346_v4  ;;  %v2584_v4 = vld [vmem:[%s2514_s20] sm:$0xff]  ;;  %s2219_s18 = smov 109   ;;  %p3117_p13 = scmp.ne.s32.totalorder %s3103_s30, 0 }
  0xc2   : > { %v417_v23 = vrot.slane %v402_v16, %v393_v5  ;;  %v413_v24 = vrot.slane %v398_v20, %v393_v5  ;;  %v460_v27 = vrot.slane %v445_v22, %v440_v21  ;;  %v456_v28 = vrot.slane %v441_v25, %v440_v21 }
  0xc3   : > { %378 = vrot.lane.b32.xlu1 %v370_v14, %s2184_s28  ;;  %374 = vrot.lane.b32.xlu0 %v362_v15, %s2184_s28  ;;  %v488_v29 = vrot.slane %v337_v8, %v487_v26  ;;  %v449_v30 = vrot.slane %v338_v7, %v440_v21  ;;  %v496_v32 = vrot.slane %v338_v7, %v487_v26  ;;  %v2196_v48 = vmov 8  }
  0xc4   : > { %v492_v35 = vrot.slane %v337_v8, %v491_v31  ;;  %v2197_v49 = vmov 9   ;;  %v2198_v50 = vmov 11   ;;  %v2199_v51 = vmov 16  }
  0xc5   : > { %v503_v33 = vrot.slane %v488_v29, %v487_v26  ;;  %v464_v34 = vrot.slane %v449_v30, %v440_v21  ;;  %v511_v36 = vrot.slane %v496_v32, %v487_v26  ;;  %v2200_v52 = vmov 12  }
  0xc6   : > { %v507_v37 = vrot.slane %v492_v35, %v487_v26  ;;  %v2201_v53 = vmov 14   ;;  %vm474_vm0 = vcmask 793600   ;;  %v2590_v9 = vcombine.high %v2584_v4, %v2584_v4 }
  0xc7   : > { %421 = vrot.lane.b32.xlu1 %v409_v18, %s2185_s26  ;;  %376 = vrot.lane.b32.xlu0 %v366_v19, %s2184_s28  ;;  %vm427_vm1 = vcmask 777216   ;;  %vm521_vm2 = vcmask 801792   ;;  %vm380_vm3 = vcmask 769024   ;;  %vm563_vm4 = vcmask 1039360  }
  0xc8   : > { %vm588_vm5 = vcmask 1031168   ;;  %vm613_vm6 = vcmask 916480   ;;  %vm634_vm7 = vcmask 908288   ;;  %vm658_vm8 = vcmask 900096  }
  0xc9   : > { %vm683_vm9 = vcmask 785408   ;;  %vm812_vm10 = vcmask 1022976   ;;  %vm837_vm11 = vcmask 1014784   ;;  %vm934_vm12 = vcmask 891904  }
  0xca   : > { %vm959_vm13 = vcmask 883712   ;;  %vm1051_vm14 = vcmask 760832   ;;  %vm1076_vm15 = vcmask 752640  }
  0xcb   : > { %425 = vrot.lane.b32.xlu1 %v417_v23, %s2185_s26  ;;  %423 = vrot.lane.b32.xlu0 %v413_v24, %s2185_s26 }
  0xcf   : > { %470 = vrot.lane.b32.xlu1 %v460_v27, %s2186_s11  ;;  %468 = vrot.lane.b32.xlu0 %v456_v28, %s2186_s11 }
  0xd3   : > { %515 = vrot.lane.b32.xlu1 %v503_v33, %s2187_s7  ;;  %472 = vrot.lane.b32.xlu0 %v464_v34, %s2186_s11  ;;  %s2220_s11 = smov 108  }
  0xd7   : > { %519 = vrot.lane.b32.xlu1 %v511_v36, %s2187_s7  ;;  %517 = vrot.lane.b32.xlu0 %v507_v37, %s2187_s7  ;;  %s2223_s7 = smov 80  }
  0xdb   : > { %643 = vperm.xlu0 %1887, %v335_v38   ;;  %541 = vperm.xlu1 %1882, %v335_v38  }
  0xdf   : > { %1892 = vset.pattern.permute.xlu0 %v2188_v40  ;;  %1883 = vset.pattern.permute.xlu1 %v2188_v40 }
  0xe0   : > { %749 = vperm.xlu0 %1892, %v2551_v39   ;;  %548 = vperm.xlu1 %1883, %v335_v38  }
  0xe4   : > { %1895 = vset.pattern.permute.xlu0 %v2189_v41  ;;  %1884 = vset.pattern.permute.xlu1 %v2190_v42 }
  0xe5   : > { %822 = vperm.xlu0 %1895, %v2551_v39   ;;  %573 = vperm.xlu1 %1884, %v335_v38  }
  0xe9   : > { %1898 = vset.pattern.permute.xlu0 %v2191_v43  ;;  %1885 = vset.pattern.permute.xlu1 %v2192_v44 }
  0xea   : > { %895 = vperm.xlu0 %1898, %v2551_v39   ;;  %598 = vperm.xlu1 %1885, %v335_v38  }
  0xee   : > { %1901 = vset.pattern.permute.xlu0 %v2193_v45  ;;  %1886 = vset.pattern.permute.xlu1 %v2189_v41 }
  0xef   : > { %969 = vperm.xlu0 %1901, %v2551_v39   ;;  %623 = vperm.xlu1 %1886, %v335_v38  }
  0xf3   : > { %1904 = vset.pattern.permute.xlu0 %v2194_v46  ;;  %1888 = vset.pattern.permute.xlu1 %v2195_v47 }
  0xf4   : > { %1036 = vperm.xlu0 %1904, %v2551_v39   ;;  %668 = vperm.xlu1 %1888, %v335_v38  }
  0xf8   : > { %1889 = vset.pattern.permute.xlu1 %v2191_v43  ;;  %1907 = vset.pattern.permute.xlu0 %v2199_v51 }
  0xf9   : > { %693 = vperm.xlu1 %1889, %v335_v38  }
  0xfd   : > { %1890 = vset.pattern.permute.xlu1 %v2196_v48 }
  0xfe   : > { %717 = vperm.xlu1 %1890, %v335_v38  }
 0x102   : > { %1891 = vset.pattern.permute.xlu1 %v2183_v2 }
 0x103   : > { %742 = vperm.xlu1 %1891, %v2551_v39  }
 0x107   : > { %1893 = vset.pattern.permute.xlu1 %v2190_v42 }
 0x108   : > { %773 = vperm.xlu1 %1893, %v2551_v39  }
 0x10c   : > { %1894 = vset.pattern.permute.xlu1 %v2192_v44 }
 0x10d   : > { %797 = vperm.xlu1 %1894, %v2551_v39  }
 0x111   : > { %1896 = vset.pattern.permute.xlu1 %v2182_v1 }
 0x112   : > { %847 = vperm.xlu1 %1896, %v2551_v39  }
 0x116   : > { %1897 = vset.pattern.permute.xlu1 %v2195_v47 }
 0x117   : > { %871 = vperm.xlu1 %1897, %v2551_v39  }
 0x11b   : > { %1899 = vset.pattern.permute.xlu1 %v2196_v48 }
 0x11c   : > { %919 = vperm.xlu1 %1899, %v2551_v39  }
 0x120   : > { %1900 = vset.pattern.permute.xlu1 %v2197_v49 }
 0x121   : > { %944 = vperm.xlu1 %1900, %v2551_v39  }
 0x125   : > { %1902 = vset.pattern.permute.xlu1 %v2198_v50 }
 0x126   : > { %993 = vperm.xlu1 %1902, %v2551_v39  }
 0x12a   : > { %1903 = vset.pattern.permute.xlu1 %v2200_v52 }
 0x12b   : > { %1017 = vperm.xlu1 %1903, %v2551_v39  }
 0x12f   : > { %1905 = vset.pattern.permute.xlu1 %v2201_v53 }
 0x135   : > { %v2569_v54 = vpop.permute.xlu1 %378  ;;  %v2573_v58 = vpop.permute.xlu0 %374 }
 0x139   : > { %v422_v55 = vpop.permute.xlu1 %421  ;;  %v2577_v60 = vpop.permute.xlu0 %376 }
 0x13a   : > { %v2618_v25 = vmul.f32 0.0, %v422_v55 }
 0x13d   : > { %v2571_v56 = vpop.permute.xlu1 %425  ;;  %v424_v62 = vpop.permute.xlu0 %423 }
 0x13e   : > { %v428_v14 = vsel %vm427_vm1, %v422_v55, %v424_v62  ;;  %v429_v27 = vsel %vm427_vm1, %v424_v62, %v2571_v56  ;;  %v2648_v45 = vmul.f32 0.0, %v2571_v56 }
 0x13f   : > { %v2606_v18 = vmul.f32 %v428_v14, %v2584_v4  ;;  %v2627_v31 = vmul.f32 %v429_v27, %v2590_v9 }
 0x141   : > { %v471_v57 = vpop.permute.xlu1 %470  ;;  %v469_v1 = vpop.permute.xlu0 %468 }
 0x142   : > { %v475_v6 = vsel %vm474_vm0, %v469_v1, %v471_v57  ;;  %v2600_v16 = vmul.f32 0.0, %v469_v1 }
 0x143   : > { %v2595_v10 = vmul.f32 %v475_v6, %v2584_v4 }
 0x145   : > { %v2575_v59 = vpop.permute.xlu1 %515  ;;  %v473_v11 = vpop.permute.xlu0 %472 }
 0x146   : > { %v476_v17 = vsel %vm474_vm0, %v471_v57, %v473_v11  ;;  %v2635_v36 = vmul.f32 0.0, %v473_v11  ;;  %v2210_v11 = vmov 18   ;;  %vm1101_vm0 = vcmask 654336  }
 0x147   : > { %v2610_v21 = vmul.f32 %v476_v17, %v2590_v9  ;;  %v2214_v17 = vmov 22  }
 0x149   : > { %v2579_v61 = vpop.permute.xlu1 %519  ;;  %v2614_v23 = vpop.permute.xlu0 %517 }
 0x15a   : > { %v2581_v63 = vpop.permute.xlu1 %541  ;;  %v644_v29 = vpop.permute.xlu0 %643 }
 0x15b   : > { %v646_v32 = vmul.f32 %v644_v29, %v2595_v10  ;;  %v647_v35 = vmul.f32 %v644_v29, %v2610_v21  ;;  %v648_v41 = vmul.f32 %v644_v29, %v2635_v36 }
 0x15f   : > { %v549_v5 = vpop.permute.xlu1 %548  ;;  %v750_v47 = vpop.permute.xlu0 %749 }
 0x160   : > { %v551_v7 = vmul.f32 0.0, %v549_v5  ;;  %v552_v8 = vmul.f32 %v549_v5, %v2584_v4  ;;  %v553_v13 = vmul.f32 %v549_v5, %v2590_v9  ;;  %v752_v49 = vmul.f32 %v750_v47, %v2618_v25 }
 0x161   : > { %v753_v52 = vmul.f32 %v750_v47, %v2606_v18  ;;  %v754_v1 = vmul.f32 %v750_v47, %v2627_v31  ;;  %v2208_v5 = vmov 15  }
 0x162   : > { %557 = vrot.lane.b32.xlu0 %v551_v7, %s2202_s10  ;;  %559 = vrot.lane.b32.xlu1 %v552_v8, %s2202_s10  ;;  %v2209_v7 = vmov 17  }
 0x164   : > { %v574_v12 = vpop.permute.xlu1 %573 }
 0x165   : > { %v577_v15 = vmul.f32 %v574_v12, %v2595_v10  ;;  %v576_v19 = vmul.f32 %v574_v12, %v2600_v16  ;;  %v578_v24 = vmul.f32 %v574_v12, %v2610_v21  ;;  %v2211_v12 = vmov 20  }
 0x166   : > { %561 = vrot.lane.b32.xlu0 %v553_v13, %s2202_s10  ;;  %v2212_v13 = vmov 19  }
 0x167   : > { %584 = vrot.lane.b32.xlu1 %v577_v15, %s2203_s25  ;;  %v2213_v15 = vmov 21  }
 0x169   : > { %v599_v20 = vpop.permute.xlu1 %598 }
 0x16a   : > { %582 = vrot.lane.b32.xlu0 %v576_v19, %s2203_s25  ;;  %v602_v22 = vmul.f32 %v599_v20, %v2606_v18  ;;  %v601_v30 = vmul.f32 %v599_v20, %v2618_v25  ;;  %v603_v33 = vmul.f32 %v599_v20, %v2627_v31  ;;  %v2215_v20 = vmov 23  }
 0x16c   : > { %609 = vrot.lane.b32.xlu1 %v602_v22, %s2204_s14  ;;  %v334_v22 = vld [vmem:[#allocation7] sm:$0xf] }
 0x16e   : > { %v624_v26 = vpop.permute.xlu1 %623  ;;  %586 = vrot.lane.b32.xlu0 %v578_v24, %s2203_s25  ;;  %v2216_v24 = vmov 24  }
 0x16f   : > { %v627_v28 = vmul.f32 %v624_v26, %v2590_v9  ;;  %v626_v37 = vmul.f32 %v624_v26, %v2584_v4 }
 0x171   : > { %632 = vrot.lane.b32.xlu1 %v627_v28, %s2205_s19  ;;  %v522_v28 = vsel %vm521_vm2, %v2575_v59, %v2614_v23 }
 0x172   : > { %607 = vrot.lane.b32.xlu0 %v601_v30, %s2204_s14  ;;  %v823_v30 = vpop.permute.xlu0 %822 }
 0x173   : > { %v669_v34 = vpop.permute.xlu1 %668 }
 0x174   : > { %v672_v40 = vmul.f32 %v669_v34, %v2627_v31  ;;  %v671_v44 = vmul.f32 %v669_v34, %v2606_v18  ;;  %v673_v48 = vmul.f32 %v669_v34, %v2648_v45  ;;  %v523_v34 = vsel %vm521_vm2, %v2614_v23, %v2579_v61 }
 0x175   : > { %652 = vrot.lane.b32.xlu1 %v646_v32, %s2206_s29  ;;  %v381_v23 = vsel %vm380_vm3, %v2573_v58, %v2577_v60  ;;  %vm1151_vm2 = vcmask 637952  }
 0x176   : > { %611 = vrot.lane.b32.xlu0 %v603_v33, %s2204_s14  ;;  %v528_v33 = vmul.f32 0.0, %v2575_v59  ;;  %v2704_v59 = vmul.f32 0.0, %v2573_v58 }
 0x178   : > { %v694_v38 = vpop.permute.xlu1 %693 }
 0x179   : > { %654 = vrot.lane.b32.xlu1 %v647_v35, %s2206_s29  ;;  %v697_v42 = vmul.f32 %v694_v38, %v2590_v9  ;;  %v696_v51 = vmul.f32 %v694_v38, %v2584_v4  ;;  %v698_v55 = vmul.f32 0.0, %v694_v38  ;;  %v2696_v35 = vmul.f32 %v522_v28, %v2584_v4 }
 0x17a   : > { %630 = vrot.lane.b32.xlu0 %v626_v37, %s2205_s19  ;;  %v825_v37 = vmul.f32 %v823_v30, %v528_v33 }
 0x17b   : > { %v826_v38 = vmul.f32 %v823_v30, %v2696_v35 }
 0x17d   : > { %679 = vrot.lane.b32.xlu1 %v672_v40, %s2207_s13  ;;  %v718_v43 = vpop.permute.xlu1 %717  ;;  %v2701_v40 = vmul.f32 %v523_v34, %v2590_v9 }
 0x17e   : > { %656 = vrot.lane.b32.xlu0 %v648_v41, %s2206_s29  ;;  %v721_v46 = vmul.f32 %v718_v43, %v2610_v21  ;;  %v720_v57 = vmul.f32 %v718_v43, %v2595_v10  ;;  %v722_v62 = vmul.f32 %v718_v43, %v2635_v36  ;;  %v2715_v43 = vmul.f32 %v381_v23, %v2584_v4 }
 0x17f   : > { %v827_v41 = vmul.f32 %v823_v30, %v2701_v40 }
 0x181   : > { %704 = vrot.lane.b32.xlu1 %v697_v42, %s2185_s26 }
 0x182   : > { %677 = vrot.lane.b32.xlu0 %v671_v44, %s2207_s13  ;;  %v2656_v50 = vpop.permute.xlu1 %742  ;;  %v896_v44 = vpop.permute.xlu0 %895 }
 0x185   : > { %728 = vrot.lane.b32.xlu1 %v721_v46, %s2184_s28 }
 0x186   : > { %681 = vrot.lane.b32.xlu0 %v673_v48, %s2207_s13 }
 0x187   : > { %v774_v53 = vpop.permute.xlu1 %773 }
 0x188   : > { %v777_v56 = vmul.f32 %v774_v53, %v2584_v4  ;;  %v776_v6 = vmul.f32 0.0, %v774_v53  ;;  %v778_v8 = vmul.f32 %v774_v53, %v2590_v9  ;;  %v898_v53 = vmul.f32 0.0, %v896_v44 }
 0x189   : > { %758 = vrot.lane.b32.xlu1 %v752_v49, %s2202_s10 }
 0x18a   : > { %702 = vrot.lane.b32.xlu0 %v696_v51, %s2185_s26 }
 0x18c   : > { %v798_v14 = vpop.permute.xlu1 %797 }
 0x18d   : > { %760 = vrot.lane.b32.xlu1 %v753_v52, %s2202_s10  ;;  %v800_v26 = vmul.f32 %v798_v14, %v2600_v16  ;;  %v801_v29 = vmul.f32 %v798_v14, %v2595_v10  ;;  %v802_v32 = vmul.f32 %v798_v14, %v2610_v21 }
 0x18e   : > { %706 = vrot.lane.b32.xlu0 %v698_v55, %s2185_s26 }
 0x191   : > { %784 = vrot.lane.b32.xlu1 %v777_v56, %s2203_s25  ;;  %v848_v19 = vpop.permute.xlu1 %847 }
 0x192   : > { %726 = vrot.lane.b32.xlu0 %v720_v57, %s2184_s28  ;;  %v850_v42 = vmul.f32 %v848_v19, %v2704_v59  ;;  %v851_v58 = vmul.f32 %v848_v19, %v2715_v43  ;;  %v899_v57 = vmul.f32 %v896_v44, %v2584_v4 }
 0x195   : > { %1061 = vperm.xlu1 %1905, %v2551_v39  }
 0x196   : > { %730 = vrot.lane.b32.xlu0 %v722_v62, %s2184_s28  ;;  %v872_v27 = vpop.permute.xlu1 %871 }
 0x197   : > { %v874_v51 = vmul.f32 %v872_v27, %v2618_v25  ;;  %v875_v52 = vmul.f32 %v872_v27, %v2606_v18  ;;  %v876_v56 = vmul.f32 %v872_v27, %v2627_v31 }
 0x199   : > { %1906 = vset.pattern.permute.xlu1 %v2208_v5 }
 0x19a   : > { %1086 = vperm.xlu1 %1906, %v2551_v39   ;;  %762 = vrot.lane.b32.xlu0 %v754_v1, %s2202_s10  ;;  %v900_v1 = vmul.f32 %v896_v44, %v2590_v9  ;;  %s2224_s10 = smov 79  }
 0x19e   : > { %1908 = vset.pattern.permute.xlu1 %v2209_v7  ;;  %782 = vrot.lane.b32.xlu0 %v776_v6, %s2203_s25 }
 0x19f   : > { %1136 = vperm.xlu1 %1908, %v2551_v39  }
 0x1a2   : > { %786 = vrot.lane.b32.xlu0 %v778_v8, %s2203_s25  ;;  %s2225_s25 = smov 78  }
 0x1a3   : > { %1909 = vset.pattern.permute.xlu1 %v2210_v11 }
 0x1a4   : > { %1161 = vperm.xlu1 %1909, %v2551_v39  }
 0x1a6   : > { %1111 = vperm.xlu0 %1907, %v2551_v39  }
 0x1a8   : > { %1911 = vset.pattern.permute.xlu1 %v2211_v12 }
 0x1a9   : > { %1211 = vperm.xlu1 %1911, %v2551_v39  }
 0x1aa   : > { %1910 = vset.pattern.permute.xlu0 %v2212_v13 }
 0x1ab   : > { %1186 = vperm.xlu0 %1910, %v2551_v39  }
 0x1ad   : > { %1912 = vset.pattern.permute.xlu1 %v2213_v15 }
 0x1ae   : > { %1236 = vperm.xlu1 %1912, %v2551_v39  }
 0x1af   : > { %1913 = vset.pattern.permute.xlu0 %v2214_v17 }
 0x1b0   : > { %1261 = vperm.xlu0 %1913, %v2551_v39  }
 0x1b2   : > { %1915 = vset.pattern.permute.xlu1 %v2215_v20 }
 0x1b3   : > { %1286 = vperm.xlu1 %1915, %v2551_v39  }
 0x1b4   : > { %1914 = vset.pattern.permute.xlu0 %v2183_v2 }
 0x1b5   : > { %534 = vperm.xlu0 %1914, %v334_v22  }
 0x1b7   : > { %1916 = vset.pattern.permute.xlu1 %v2216_v24 }
 0x1b8   : > { %1311 = vperm.xlu1 %1916, %v2551_v39   ;;  %v920_v39 = vpop.permute.xlu1 %919 }
 0x1b9   : > { %806 = vrot.lane.b32.xlu0 %v800_v26, %s2217_s12  ;;  %v922_v7 = vmul.f32 %v920_v39, %v2600_v16  ;;  %v923_v8 = vmul.f32 %v920_v39, %v2595_v10  ;;  %v924_v13 = vmul.f32 %v920_v39, %v2610_v21 }
 0x1bc   : > { %808 = vrot.lane.b32.xlu1 %v801_v29, %s2217_s12  ;;  %v945_v46 = vpop.permute.xlu1 %944 }
 0x1bd   : > { %810 = vrot.lane.b32.xlu0 %v802_v32, %s2217_s12  ;;  %1917 = vset.pattern.permute.xlu1 %v2183_v2  ;;  %v382_v2 = vsel %vm380_vm3, %v2577_v60, %v2569_v54  ;;  %v970_v60 = vpop.permute.xlu0 %969  ;;  %v947_v14 = vmul.f32 %v945_v46, %v528_v33  ;;  %v948_v17 = vmul.f32 %v945_v46, %v2696_v35  ;;  %s2230_s12 = smov 62  }
 0x1be   : > { %v2718_v47 = vmul.f32 %v382_v2, %v2590_v9  ;;  %v949_v16 = vmul.f32 %v945_v46, %v2701_v40  ;;  %v972_v22 = vmul.f32 %v970_v60, %v2704_v59  ;;  %v973_v26 = vmul.f32 %v970_v60, %v2715_v43 }
 0x1bf   : > { %v544_v46 = vmul.f32 %v2581_v63, %v2618_v25 }
 0x1c0   : > { %831 = vrot.lane.b32.xlu1 %v825_v37, %s2218_s17  ;;  %v852_v48 = vmul.f32 %v848_v19, %v2718_v47  ;;  %v994_v49 = vpop.permute.xlu1 %993  ;;  %v974_v28 = vmul.f32 %v970_v60, %v2718_v47 }
 0x1c1   : > { %833 = vrot.lane.b32.xlu0 %v826_v38, %s2218_s17  ;;  %v2731_v62 = vpop.permute.xlu0 %1036  ;;  %v996_v30 = vmul.f32 %v994_v49, %v2618_v25  ;;  %v997_v33 = vmul.f32 %v994_v49, %v2606_v18  ;;  %v998_v39 = vmul.f32 %v994_v49, %v2627_v31  ;;  %v545_v49 = vmul.f32 %v2581_v63, %v2606_v18 }
 0x1c2   : > { %v1040_v60 = vmul.f32 %v2731_v62, %v2610_v21  ;;  %v1041_v25 = vmul.f32 %v2731_v62, %v2635_v36 }
 0x1c4   : > { %835 = vrot.lane.b32.xlu1 %v827_v41, %s2218_s17  ;;  %v1018_v55 = vpop.permute.xlu1 %1017  ;;  %s2231_s17 = smov 61  }
 0x1c5   : > { %856 = vrot.lane.b32.xlu0 %v850_v42, %s2204_s14  ;;  %v1020_v38 = vmul.f32 %v1018_v55, %v2584_v4  ;;  %v1021_v23 = vmul.f32 %v1018_v55, %v2590_v9  ;;  %v1039_v42 = vmul.f32 %v2731_v62, %v2595_v10 }
 0x1c8   : > { %858 = vrot.lane.b32.xlu1 %v851_v58, %s2204_s14 }
 0x1c9   : > { %860 = vrot.lane.b32.xlu0 %v852_v48, %s2204_s14  ;;  %s2226_s14 = smov 77  }
 0x1cc   : > { %880 = vrot.lane.b32.xlu1 %v874_v51, %s2205_s19 }
 0x1cd   : > { %882 = vrot.lane.b32.xlu0 %v875_v52, %s2205_s19 }
 0x1d0   : > { %884 = vrot.lane.b32.xlu1 %v876_v56, %s2205_s19  ;;  %s2227_s19 = smov 76  }
 0x1d1   : > { %904 = vrot.lane.b32.xlu0 %v898_v53, %s2206_s29 }
 0x1d4   : > { %v558_v5 = vpop.permute.xlu0 %557  ;;  %v560_v6 = vpop.permute.xlu1 %559  ;;  %906 = vrot.lane.b32.xlu1 %v899_v57, %s2206_s29 }
 0x1d5   : > { %908 = vrot.lane.b32.xlu0 %v900_v1, %s2206_s29  ;;  %v564_v44 = vsel %vm563_vm4, %v558_v5, %v560_v6  ;;  %s2228_s29 = smov 64  }
 0x1d6   : > { %v569_v53 = vadd.f32 %v564_v44, %v544_v46 }
 0x1d8   : > { %v2740_v11 = vpop.permute.xlu0 %561  ;;  %928 = vrot.lane.b32.xlu1 %v922_v7, %s2219_s18  ;;  %v546_v7 = vmul.f32 %v2581_v63, %v2627_v31 }
 0x1d9   : > { %v585_v12 = vpop.permute.xlu1 %584  ;;  %930 = vrot.lane.b32.xlu0 %v923_v8, %s2219_s18  ;;  %v565_v58 = vsel %vm563_vm4, %v560_v6, %v2740_v11 }
 0x1da   : > { %v570_v56 = vadd.f32 %v565_v58, %v545_v49  ;;  %v571_v62 = vadd.f32 %v2740_v11, %v546_v7  ;;  %v746_v7 = vmul.f32 %v2656_v50, %v2715_v43 }
 0x1dc   : > { %v583_v15 = vpop.permute.xlu0 %582  ;;  %932 = vrot.lane.b32.xlu1 %v924_v13, %s2219_s18  ;;  %s2232_s18 = smov 60  }
 0x1dd   : > { %953 = vrot.lane.b32.xlu0 %v947_v14, %s2220_s11  ;;  %v589_v51 = vsel %vm588_vm5, %v583_v15, %v585_v12 }
 0x1de   : > { %v610_v19 = vpop.permute.xlu1 %609  ;;  %v594_v1 = vadd.f32 %v589_v51, %v569_v53 }
 0x1e0   : > { %v587_v20 = vpop.permute.xlu0 %586  ;;  %955 = vrot.lane.b32.xlu1 %v948_v17, %s2220_s11 }
 0x1e1   : > { %957 = vrot.lane.b32.xlu0 %v949_v16, %s2220_s11  ;;  %v590_v55 = vsel %vm588_vm5, %v585_v12, %v587_v20  ;;  %s2234_s11 = smov 17  }
 0x1e2   : > { %v595_v8 = vadd.f32 %v590_v55, %v570_v56 }
 0x1e3   : > { %v2746_v24 = vpop.permute.xlu1 %632 }
 0x1e4   : > { %v608_v27 = vpop.permute.xlu0 %607  ;;  %978 = vrot.lane.b32.xlu1 %v972_v22, %s2207_s13  ;;  %v596_v22 = vadd.f32 %v587_v20, %v571_v62 }
 0x1e5   : > { %980 = vrot.lane.b32.xlu0 %v973_v26, %s2207_s13  ;;  %v614_v57 = vsel %vm613_vm6, %v608_v27, %v610_v19 }
 0x1e6   : > { %v619_v14 = vadd.f32 %v614_v57, %v594_v1 }
 0x1e7   : > { %v653_v29 = vpop.permute.xlu1 %652 }
 0x1e8   : > { %v612_v32 = vpop.permute.xlu0 %611  ;;  %982 = vrot.lane.b32.xlu1 %v974_v28, %s2207_s13  ;;  %s2229_s13 = smov 63  }
 0x1e9   : > { %1002 = vrot.lane.b32.xlu0 %v996_v30, %s2185_s26  ;;  %v615_v5 = vsel %vm613_vm6, %v610_v19, %v612_v32  ;;  %v621_v27 = vadd.f32 %v612_v32, %v596_v22 }
 0x1ea   : > { %v620_v15 = vadd.f32 %v615_v5, %v595_v8  ;;  %v747_v8 = vmul.f32 %v2656_v50, %v2718_v47 }
 0x1eb   : > { %v655_v34 = vpop.permute.xlu1 %654  ;;  %v641_v32 = vadd.f32 %v2746_v24, %v621_v27 }
 0x1ec   : > { %v631_v37 = vpop.permute.xlu0 %630  ;;  %1004 = vrot.lane.b32.xlu1 %v997_v33, %s2185_s26  ;;  %v659_v63 = vsel %vm658_vm8, %v653_v29, %v655_v34  ;;  %v745_v33 = vmul.f32 %v2656_v50, %v2704_v59 }
 0x1ed   : > { %1006 = vrot.lane.b32.xlu0 %v998_v39, %s2185_s26  ;;  %v635_v12 = vsel %vm634_vm7, %v631_v37, %v2746_v24  ;;  %v639_v17 = vadd.f32 %v631_v37, %v619_v14  ;;  %s2222_s26 = smov 92  }
 0x1ee   : > { %v640_v26 = vadd.f32 %v635_v12, %v620_v15 }
 0x1ef   : > { %v680_v2 = vpop.permute.xlu1 %679  ;;  %v664_v28 = vadd.f32 %v653_v29, %v639_v17 }
 0x1f0   : > { %v657_v41 = vpop.permute.xlu0 %656  ;;  %1024 = vrot.lane.b32.xlu1 %v1020_v38, %s2184_s28  ;;  %v665_v38 = vadd.f32 %v659_v63, %v640_v26 }
 0x1f1   : > { %1026 = vrot.lane.b32.xlu0 %v1021_v23, %s2184_s28  ;;  %s2221_s28 = smov 93   ;;  %v660_v20 = vsel %vm658_vm8, %v655_v34, %v657_v41 }
 0x1f3   : > { %v705_v48 = vpop.permute.xlu1 %704 }
 0x1f4   : > { %v678_v52 = vpop.permute.xlu0 %677  ;;  %1045 = vrot.lane.b32.xlu1 %v1039_v42, %s2221_s28 }
 0x1f5   : > { %1047 = vrot.lane.b32.xlu0 %v1040_v60, %s2221_s28  ;;  %v684_v30 = vsel %vm683_vm9, %v678_v52, %v680_v2  ;;  %v689_v23 = vadd.f32 %v678_v52, %v664_v28  ;;  %v666_v60 = vadd.f32 %v660_v20, %v641_v32  ;;  %v2822_v28 = vmul.f32 0.0, %v2569_v54 }
 0x1f6   : > { %v690_v46 = vadd.f32 %v684_v30, %v665_v38 }
 0x1f7   : > { %v729_v6 = vpop.permute.xlu1 %728 }
 0x1f8   : > { %v682_v13 = vpop.permute.xlu0 %681  ;;  %1049 = vrot.lane.b32.xlu1 %v1041_v25, %s2221_s28 }
 0x1f9   : > { %v685_v29 = vsel %vm683_vm9, %v680_v2, %v682_v13 }
 0x1fa   : > { %v691_v34 = vadd.f32 %v685_v29, %v666_v60 }
 0x1fb   : > { %v759_v16 = vpop.permute.xlu1 %758 }
 0x1fc   : > { %v703_v19 = vpop.permute.xlu0 %702 }
 0x1fd   : > { %v708_v42 = vsel %vm427_vm1, %v703_v19, %v705_v48  ;;  %v713_v58 = vadd.f32 %v703_v19, %v689_v23  ;;  %v2817_v19 = vmul.f32 0.0, %v2579_v61 }
 0x1fe   : > { %v714_v49 = vadd.f32 %v708_v42, %v690_v46 }
 0x1ff   : > { %v761_v39 = vpop.permute.xlu1 %760 }
 0x200   : > { %v764_v11 = vsel %vm563_vm4, %v759_v16, %v761_v39  ;;  %v707_v37 = vpop.permute.xlu0 %706 }
 0x201   : > { %v769_v44 = vadd.f32 %v764_v11, %v745_v33  ;;  %v709_v51 = vsel %vm427_vm1, %v705_v48, %v707_v37 }
 0x202   : > { %v715_v52 = vadd.f32 %v709_v51, %v691_v34 }
 0x203   : > { %v785_v1 = vpop.permute.xlu1 %784 }
 0x204   : > { %v727_v59 = vpop.permute.xlu0 %726 }
 0x205   : > { %v732_v53 = vsel %vm380_vm3, %v727_v59, %v729_v6  ;;  %v2796_v55 = vadd.f32 %v727_v59, %v713_v58 }
 0x206   : > { %v2798_v41 = vadd.f32 %v732_v53, %v714_v49 }
 0x208   : > { %v731_v25 = vpop.permute.xlu0 %730 }
 0x209   : > { %v733_v24 = vsel %vm380_vm3, %v729_v6, %v731_v25 }
 0x20a   : > { %v2801_v56 = vadd.f32 %v733_v24, %v715_v52 }
 0x20c   : > { %v763_v2 = vpop.permute.xlu0 %762 }
 0x20d   : > { %v765_v57 = vsel %vm563_vm4, %v761_v39, %v763_v2  ;;  %v771_v12 = vadd.f32 %v763_v2, %v747_v8  ;;  %vm1201_vm4 = vcmask 621568  }
 0x20e   : > { %v770_v14 = vadd.f32 %v765_v57, %v746_v7 }
 0x210   : > { %v783_v5 = vpop.permute.xlu0 %782 }
 0x211   : > { %v788_v48 = vsel %vm588_vm5, %v783_v5, %v785_v1 }
 0x212   : > { %v2809_v13 = vadd.f32 %v788_v48, %v769_v44 }
 0x214   : > { %v1062_v6 = vpop.permute.xlu1 %1061  ;;  %v787_v62 = vpop.permute.xlu0 %786 }
 0x215   : > { %v1064_v15 = vmul.f32 %v1062_v6, %v2696_v35  ;;  %v1065_v17 = vmul.f32 %v1062_v6, %v2701_v40  ;;  %v789_v16 = vsel %vm588_vm5, %v785_v1, %v787_v62  ;;  %v795_v26 = vadd.f32 %v787_v62, %v771_v12 }
 0x216   : > { %v2814_v22 = vadd.f32 %v789_v16, %v770_v14  ;;  %v1066_v50 = vmul.f32 %v1062_v6, %v2817_v19  ;;  %vm1226_vm5 = vcmask 523264  }
 0x217   : > { %1072 = vrot.lane.b32.xlu1 %v1065_v17, %s2222_s26  ;;  %1070 = vrot.lane.b32.xlu0 %v1064_v15, %s2222_s26 }
 0x219   : > { %v1087_v27 = vpop.permute.xlu1 %1086 }
 0x21a   : > { %v1089_v63 = vmul.f32 %v1087_v27, %v2715_v43  ;;  %v1090_v30 = vmul.f32 %v1087_v27, %v2718_v47  ;;  %v1091_v33 = vmul.f32 %v1087_v27, %v2822_v28 }
 0x21b   : > { %1074 = vrot.lane.b32.xlu0 %v1066_v50, %s2222_s26  ;;  %s2235_s26 = smov 34  }
 0x21c   : > { %1095 = vrot.lane.b32.xlu1 %v1089_v63, %s2223_s7 }
 0x21e   : > { %v1137_v61 = vpop.permute.xlu1 %1136 }
 0x21f   : > { %1097 = vrot.lane.b32.xlu0 %v1090_v30, %s2223_s7  ;;  %v1139_v20 = vmul.f32 %v1137_v61, %v2584_v4  ;;  %v1140_v32 = vmul.f32 %v1137_v61, %v2590_v9  ;;  %v1141_v46 = vmul.f32 0.0, %v1137_v61 }
 0x220   : > { %1099 = vrot.lane.b32.xlu1 %v1091_v33, %s2223_s7  ;;  %s1726_s7 = sshll.u32 %s2295_s27, 9 }
 0x221   : > { %s3034_s27 = scalar_lea.hbm %s3094_s6, %s1726_s7 }
 0x223   : > { %v1162_v39 = vpop.permute.xlu1 %1161 }
 0x224   : > { %v1164_v58 = vmul.f32 %v1162_v39, %v2595_v10  ;;  %v1165_v60 = vmul.f32 %v1162_v39, %v2610_v21  ;;  %v1166_v51 = vmul.f32 %v1162_v39, %v2635_v36 }
 0x225   : > { %v1112_v38 = vpop.permute.xlu0 %1111 }
 0x226   : > { %v1114_v11 = vmul.f32 %v1112_v38, %v2606_v18  ;;  %v1115_v37 = vmul.f32 %v1112_v38, %v2627_v31  ;;  %v1116_v54 = vmul.f32 %v1112_v38, %v2648_v45 }
 0x228   : > { %v1212_v23 = vpop.permute.xlu1 %1211  ;;  %1122 = vrot.lane.b32.xlu1 %v1115_v37, %s2224_s10  ;;  %1120 = vrot.lane.b32.xlu0 %v1114_v11, %s2224_s10 }
 0x229   : > { %v1214_v8 = vmul.f32 %v1212_v23, %v2715_v43  ;;  %v1215_v14 = vmul.f32 %v1212_v23, %v2718_v47  ;;  %v1216_v17 = vmul.f32 %v1212_v23, %v2822_v28  ;;  %v1391_v23 = vld [vmem:[#allocation11 + $0x4] sm:$0xf] }
 0x22a   : > { %v1187_v42 = vpop.permute.xlu0 %1186 }
 0x22b   : > { %v1189_v53 = vmul.f32 %v1187_v42, %v2696_v35  ;;  %v1190_v25 = vmul.f32 %v1187_v42, %v2701_v40  ;;  %v1191_v24 = vmul.f32 %v1187_v42, %v2817_v19 }
 0x22c   : > { %1145 = vrot.lane.b32.xlu1 %v1139_v20, %s2225_s25  ;;  %1124 = vrot.lane.b32.xlu0 %v1116_v54, %s2224_s10  ;;  %v1472_v20 = vld [vmem:[#allocation11 + $0x8] sm:$0xf] }
 0x22d   : > { %v1237_v44 = vpop.permute.xlu1 %1236 }
 0x22e   : > { %v1239_v16 = vmul.f32 %v1237_v44, %v2606_v18  ;;  %v1241_v63 = vmul.f32 %v1237_v44, %v2648_v45 }
 0x22f   : > { %v2831_v29 = vpop.permute.xlu0 %1261 }
 0x230   : > { %1149 = vrot.lane.b32.xlu1 %v1141_v46, %s2225_s25  ;;  %1147 = vrot.lane.b32.xlu0 %v1140_v32, %s2225_s25  ;;  %v1264_v33 = vmul.f32 %v2831_v29, %v2584_v4  ;;  %v1265_v18 = vmul.f32 %v2831_v29, %v2590_v9 }
 0x232   : > { %v2835_v49 = vpop.permute.xlu1 %1286 }
 0x234   : > { %v2837_v59 = vpop.permute.xlu0 %534  ;;  %1172 = vrot.lane.b32.xlu1 %v1165_v60, %s2226_s14  ;;  %1170 = vrot.lane.b32.xlu0 %v1164_v58, %s2226_s14  ;;  %v1266_v60 = vmul.f32 0.0, %v2831_v29  ;;  %v1291_v29 = vmul.f32 %v2835_v49, %v2635_v36 }
 0x237   : > { %v2841_v34 = vpop.permute.xlu1 %1311 }
 0x238   : > { %v807_v52 = vpop.permute.xlu0 %806  ;;  %1195 = vrot.lane.b32.xlu1 %v1189_v53, %s2227_s19  ;;  %1174 = vrot.lane.b32.xlu0 %v1166_v51, %s2226_s14  ;;  %v1289_v51 = vmul.f32 %v2835_v49, %v2595_v10 }
 0x23b   : > { %v809_v2 = vpop.permute.xlu1 %808 }
 0x23c   : > { %v813_v57 = vsel %vm812_vm10, %v807_v52, %v809_v2  ;;  %v811_v1 = vpop.permute.xlu0 %810  ;;  %1199 = vrot.lane.b32.xlu1 %v1191_v24, %s2227_s19  ;;  %1197 = vrot.lane.b32.xlu0 %v1190_v25, %s2227_s19  ;;  %s1554_s19 = scalar_lea.sflag [#allocation4], %s2511_s16 }
 0x23d   : > { %v818_v5 = vadd.f32 %v813_v57, %v2809_v13  ;;  %v814_v48 = vsel %vm812_vm10, %v809_v2, %v811_v1  ;;  %v820_v7 = vadd.f32 %v811_v1, %v795_v26  ;;  %v1290_v1 = vmul.f32 %v2835_v49, %v2610_v21 }
 0x23e   : > { %v819_v12 = vadd.f32 %v814_v48, %v2814_v22  ;;  %v1240_v22 = vmul.f32 %v1237_v44, %v2627_v31  ;;  %vm2987_vm10 = vcmp.lt.s32.totalorder %v344_v0, 256 }
 0x23f   : > { %v832_v6 = vpop.permute.xlu1 %831 }
 0x240   : > { %v834_v62 = vpop.permute.xlu0 %833  ;;  %1222 = vrot.lane.b32.xlu1 %v1215_v14, %s2228_s29  ;;  %1220 = vrot.lane.b32.xlu0 %v1214_v8, %s2228_s29  ;;  %v1314_v8 = vmul.f32 %v2841_v34, %v2696_v35  ;;  %v1315_v14 = vmul.f32 %v2841_v34, %v2701_v40 }
 0x241   : > { %v838_v15 = vsel %vm837_vm11, %v832_v6, %v834_v62 }
 0x242   : > { %v843_v13 = vadd.f32 %v838_v15, %v818_v5  ;;  %v1335_v15 = vld [vmem:[#allocation11] sm:$0xf] }
 0x243   : > { %v836_v50 = vpop.permute.xlu1 %835 }
 0x244   : > { %v839_v26 = vsel %vm837_vm11, %v834_v62, %v836_v50  ;;  %v845_v27 = vadd.f32 %v836_v50, %v820_v7  ;;  %v857_v43 = vpop.permute.xlu0 %856  ;;  %1245 = vrot.lane.b32.xlu1 %v1239_v16, %s2229_s13  ;;  %1224 = vrot.lane.b32.xlu0 %v1216_v17, %s2228_s29  ;;  %v1316_v17 = vmul.f32 %v2841_v34, %v2817_v19  ;;  %vm1432_vm11 = vcmask 138240  }
 0x245   : > { %v844_v47 = vadd.f32 %v839_v26, %v819_v12 }
 0x247   : > { %v859_v30 = vpop.permute.xlu1 %858 }
 0x248   : > { %v862_v28 = vsel %vm613_vm6, %v857_v43, %v859_v30  ;;  %1249 = vrot.lane.b32.xlu1 %v1241_v63, %s2229_s13  ;;  %1247 = vrot.lane.b32.xlu0 %v1240_v22, %s2229_s13  ;;  %v861_v61 = vpop.permute.xlu0 %860  ;;  %s2236_s13 = smov [#allocation13]  }
 0x249   : > { %v867_v39 = vadd.f32 %v862_v28, %v843_v13  ;;  %v863_v38 = vsel %vm613_vm6, %v859_v30, %v861_v61  ;;  %v869_v11 = vadd.f32 %v861_v61, %v845_v27  ;;  %vm1251_vm6 = vcmask 515072  }
 0x24a   : > { %v868_v37 = vadd.f32 %v863_v38, %v844_v47 }
 0x24b   : > { %v881_v31 = vpop.permute.xlu1 %880 }
 0x24c   : > { %1272 = vrot.lane.b32.xlu1 %v1265_v18, %s2230_s12  ;;  %1270 = vrot.lane.b32.xlu0 %v1264_v33, %s2230_s12  ;;  %v883_v45 = vpop.permute.xlu0 %882 }
 0x24d   : > { %v886_v4 = vsel %vm634_vm7, %v881_v31, %v883_v45 }
 0x24e   : > { %v891_v54 = vadd.f32 %v886_v4, %v867_v39 }
 0x24f   : > { %v885_v42 = vpop.permute.xlu1 %884 }
 0x250   : > { %v887_v44 = vsel %vm634_vm7, %v883_v45, %v885_v42  ;;  %v893_v32 = vadd.f32 %v885_v42, %v869_v11  ;;  %1475 = vperm.xlu1 %1917, %v1472_v20   ;;  %1394 = vperm.xlu0 %1914, %v1391_v23   ;;  %v905_v46 = vpop.permute.xlu0 %904  ;;  %vm1276_vm7 = vcmask 506880  }
 0x251   : > { %v892_v58 = vadd.f32 %v887_v44, %v868_v37 }
 0x253   : > { %v907_v53 = vpop.permute.xlu1 %906 }
 0x254   : > { %v910_v52 = vsel %vm658_vm8, %v905_v46, %v907_v53  ;;  %1274 = vrot.lane.b32.xlu1 %v1266_v60, %s2230_s12  ;;  %1295 = vrot.lane.b32.xlu0 %v1289_v51, %s2231_s17  ;;  %v909_v25 = vpop.permute.xlu0 %908  ;;  %s2094_s12 = sshll.u32 %s2236_s13, 4  ;;  %s2095_s12 = int_to_ptr.vmem [resolvable:$false] %s2094_s12 }
 0x255   : > { %v915_v24 = vadd.f32 %v910_v52, %v891_v54  ;;  %v911_v2 = vsel %vm658_vm8, %v907_v53, %v909_v25  ;;  %v917_v57 = vadd.f32 %v909_v25, %v893_v32  ;;  %vm1301_vm8 = vcmask 498688  }
 0x256   : > { %v916_v5 = vadd.f32 %v911_v2, %v892_v58 }
 0x257   : > { %v929_v10 = vpop.permute.xlu1 %928 }
 0x258   : > { %1297 = vrot.lane.b32.xlu1 %v1290_v1, %s2231_s17  ;;  %1299 = vrot.lane.b32.xlu0 %v1291_v29, %s2231_s17  ;;  %v931_v48 = vpop.permute.xlu0 %930  ;;  %s2096_s17 = scalar_lea.vmem %s2095_s12, 1024 }
 0x259   : > { %v935_v7 = vsel %vm934_vm12, %v929_v10, %v931_v48 }
 0x25a   : > { %v940_v12 = vadd.f32 %v935_v7, %v915_v24 }
 0x25b   : > { %v933_v6 = vpop.permute.xlu1 %932 }
 0x25c   : > { %v936_v62 = vsel %vm934_vm12, %v931_v48, %v933_v6  ;;  %v942_v21 = vadd.f32 %v933_v6, %v917_v57  ;;  %1320 = vrot.lane.b32.xlu1 %v1314_v8, %s2232_s18  ;;  %1322 = vrot.lane.b32.xlu0 %v1315_v14, %s2232_s18  ;;  %v954_v36 = vpop.permute.xlu0 %953  ;;  %vm1513_vm12 = vcmask 277504  }
 0x25d   : > { %v941_v49 = vadd.f32 %v936_v62, %v916_v5 }
 0x25f   : > { %v956_v16 = vpop.permute.xlu1 %955 }
 0x260   : > { %v960_v13 = vsel %vm959_vm13, %v954_v36, %v956_v16  ;;  %1324 = vrot.lane.b32.xlu1 %v1316_v17, %s2232_s18  ;;  %1338 = vperm.xlu0 %1914, %v1335_v15   ;;  %v958_v35 = vpop.permute.xlu0 %957 }
 0x261   : > { %v965_v40 = vadd.f32 %v960_v13, %v940_v12  ;;  %v961_v50 = vsel %vm959_vm13, %v956_v16, %v958_v35  ;;  %v967_v8 = vadd.f32 %v958_v35, %v942_v21  ;;  %v2233_v13 = vmov 1966171168  }
 0x262   : > { %v966_v26 = vadd.f32 %v961_v50, %v941_v49 }
 0x263   : > { %v979_v27 = vpop.permute.xlu1 %978 }
 0x264   : > { %v981_v43 = vpop.permute.xlu0 %980 }
 0x265   : > { %v984_v25 = vsel %vm683_vm9, %v979_v27, %v981_v43 }
 0x266   : > { %v989_v2 = vadd.f32 %v984_v25, %v965_v40  ;;  %v1349_v40 = vunpack.c.l.s4 %v2233_v13 }
 0x267   : > { %v983_v47 = vpop.permute.xlu1 %982 }
 0x268   : > { %v1003_v22 = vpop.permute.xlu0 %1002  ;;  %v985_v57 = vsel %vm683_vm9, %v981_v43, %v983_v47  ;;  %v991_v62 = vadd.f32 %v983_v47, %v967_v8  ;;  %vm1326_vm9 = vcmask 490496  }
 0x269   : > { %v990_v48 = vadd.f32 %v985_v57, %v966_v26 }
 0x26b   : > { %v1005_v63 = vpop.permute.xlu1 %1004 }
 0x26c   : > { %v1007_v30 = vpop.permute.xlu0 %1006  ;;  %v1008_v24 = vsel %vm427_vm1, %v1003_v22, %v1005_v63 }
 0x26d   : > { %v1013_v1 = vadd.f32 %v1008_v24, %v989_v2  ;;  %v1009_v10 = vsel %vm427_vm1, %v1005_v63, %v1007_v30  ;;  %v1015_v50 = vadd.f32 %v1007_v30, %v991_v62  ;;  %vm1126_vm1 = vcmask 646144  }
 0x26e   : > { %v1014_v14 = vadd.f32 %v1009_v10, %v990_v48 }
 0x26f   : > { %v1025_v33 = vpop.permute.xlu1 %1024 }
 0x270   : > { %v1027_v18 = vpop.permute.xlu0 %1026  ;;  %v1032_v12 = vadd.f32 %v1025_v33, %v1013_v1 }
 0x271   : > { %v1028_v7 = vsel %vm380_vm3, %v1025_v33, %v1027_v18  ;;  %v1034_v43 = vadd.f32 %v1027_v18, %v1015_v50  ;;  %vm1176_vm3 = vcmask 629760  }
 0x272   : > { %v1033_v36 = vadd.f32 %v1028_v7, %v1014_v14 }
 0x273   : > { %v1046_v28 = vpop.permute.xlu1 %1045 }
 0x274   : > { %v1048_v61 = vpop.permute.xlu0 %1047  ;;  %v1057_v49 = vadd.f32 %v1046_v28, %v1032_v12 }
 0x275   : > { %v1052_v6 = vsel %vm1051_vm14, %v1046_v28, %v1048_v61  ;;  %v1350_v28 = vunpack.c.0.s8 %v1349_v40 }
 0x276   : > { %v1058_v26 = vadd.f32 %v1052_v6, %v1033_v36 }
 0x277   : > { %v1050_v39 = vpop.permute.xlu1 %1049 }
 0x278   : > { %v1053_v21 = vsel %vm1051_vm14, %v1048_v61, %v1050_v39 }
 0x279   : > { %v1059_v25 = vadd.f32 %v1053_v21, %v1034_v43 }
 0x289   : > { %v1073_v19 = vpop.permute.xlu1 %1072  ;;  %v1071_v34 = vpop.permute.xlu0 %1070 }
 0x28a   : > { %v1077_v16 = vsel %vm1076_vm15, %v1071_v34, %v1073_v19  ;;  %v1082_v27 = vadd.f32 %v1071_v34, %v1057_v49 }
 0x28b   : > { %v1083_v47 = vadd.f32 %v1077_v16, %v1058_v26 }
 0x28d   : > { %v1075_v38 = vpop.permute.xlu0 %1074 }
 0x28e   : > { %v1096_v11 = vpop.permute.xlu1 %1095  ;;  %v1078_v63 = vsel %vm1076_vm15, %v1073_v19, %v1075_v38 }
 0x28f   : > { %v1107_v22 = vadd.f32 %v1096_v11, %v1082_v27  ;;  %v1084_v39 = vadd.f32 %v1078_v63, %v1059_v25 }
 0x291   : > { %v1098_v37 = vpop.permute.xlu0 %1097 }
 0x292   : > { %v1100_v31 = vpop.permute.xlu1 %1099  ;;  %v1102_v35 = vsel %vm1101_vm0, %v1096_v11, %v1098_v37 }
 0x293   : > { %v1108_v24 = vadd.f32 %v1102_v35, %v1083_v47  ;;  %v1103_v61 = vsel %vm1101_vm0, %v1098_v37, %v1100_v31 }
 0x294   : > { %v1109_v37 = vadd.f32 %v1103_v61, %v1084_v39 }
 0x29a   : > { %v2876_v45 = vpop.permute.xlu1 %1122  ;;  %v1121_v4 = vpop.permute.xlu0 %1120 }
 0x29b   : > { %v1127_v33 = vsel %vm1126_vm1, %v1121_v4, %v2876_v45  ;;  %v1132_v30 = vadd.f32 %v1121_v4, %v1107_v22  ;;  %v2930_v4 = vsub.s32 %v1350_v28, %v2535_v3 }
 0x29c   : > { %v1133_v11 = vadd.f32 %v1127_v33, %v1108_v24 }
 0x29e   : > { %v1146_v20 = vpop.permute.xlu1 %1145  ;;  %v2878_v23 = vpop.permute.xlu0 %1124 }
 0x29f   : > { %v1157_v57 = vadd.f32 %v1146_v20, %v1132_v30  ;;  %v1128_v19 = vsel %vm1126_vm1, %v2876_v45, %v2878_v23 }
 0x2a0   : > { %v1134_v8 = vadd.f32 %v1128_v19, %v1109_v37 }
 0x2a2   : > { %v2880_v54 = vpop.permute.xlu1 %1149  ;;  %v2882_v42 = vpop.permute.xlu0 %1147 }
 0x2a3   : > { %v1152_v18 = vsel %vm1151_vm2, %v1146_v20, %v2882_v42  ;;  %v1153_v31 = vsel %vm1151_vm2, %v2882_v42, %v2880_v54 }
 0x2a4   : > { %v1158_v1 = vadd.f32 %v1152_v18, %v1133_v11  ;;  %v1919_v11 = vld [vmem:[%s2514_s20] sm:$0xff]  ;;  %s1708_s20 = sshll.u32 %s2511_s16, 5 }
 0x2a5   : > { %s2992_s28 = scalar_lea.vmem [#allocation13], %s1708_s20 }
 0x2a6   : > { %v2884_v44 = vpop.permute.xlu1 %1172  ;;  %v2886_v32 = vpop.permute.xlu0 %1170  ;;  %s1567_s10 = sshll.u32 %s2992_s28, 4  ;;  %s3036_s10 = int_to_ptr.vmem [resolvable:$true] %s1567_s10 }
 0x2a7   : > { %v1177_v38 = vsel %vm1176_vm3, %v2886_v32, %v2884_v44  ;;  %v1182_v20 = vadd.f32 %v2886_v32, %v1157_v57  ;;  %s2090_s29 = scalar_lea.vmem %s3036_s10, 512  ;;  %p2097_p2 = scmp.lt.s32.totalorder %s3036_s10, %s2095_s12 }
 0x2a8   : > { %v1183_v14 = vadd.f32 %v1177_v38, %v1158_v1  ;;  %v538_v38 = vmul.f32 %v2837_v59, %v2590_v9  ;;  %p2091_p7 = scmp.ne.s32.totalorder %s3036_s10, %s2090_s29  ;;  %p2098_p0 = scmp.lt.s32.totalorder %s2096_s17, %s2090_s29 }
 0x2aa   : > { %v2888_v46 = vpop.permute.xlu1 %1195  ;;  %v2890_v58 = vpop.permute.xlu0 %1174  ;;  %p2092_p1 = pnand %p2091_p7, %p3117_p13  ;;  %p2099_p8 = por %p2098_p0, %p2097_p2 }
 0x2ab   : > { %v1207_v54 = vadd.f32 %v2888_v46, %v1182_v20  ;;  %v1178_v42 = vsel %vm1176_vm3, %v2884_v44, %v2890_v58 }
 0x2ac   : > { %p2093_p3 = pneg %p2092_p1 }
 0x2ae   : > { %v2892_v60 = vpop.permute.xlu1 %1199  ;;  %v2894_v51 = vpop.permute.xlu0 %1197  ;;  %p2100_p5 = pnand %p2099_p8, %p2093_p3 }
 0x2af   : > { %v1202_v45 = vsel %vm1201_vm4, %v2888_v46, %v2894_v51  ;;  %v1203_v46 = vsel %vm1201_vm4, %v2894_v51, %v2892_v60 }
 0x2b0   : > { %v1208_v36 = vadd.f32 %v1202_v45, %v1183_v14 }
 0x2b2   : > { %v2896_v53 = vpop.permute.xlu1 %1222  ;;  %v2898_v52 = vpop.permute.xlu0 %1220 }
 0x2b3   : > { %v1227_v32 = vsel %vm1226_vm5, %v2898_v52, %v2896_v53 }
 0x2b4   : > { %v1233_v13 = vadd.f32 %v1227_v32, %v1208_v36 }
 0x2b6   : > { %v2903_v29 = vpop.permute.xlu1 %1245  ;;  %v2905_v5 = vpop.permute.xlu0 %1224 }
 0x2ba   : > { %v2910_v15 = vpop.permute.xlu1 %1249  ;;  %v2912_v17 = vpop.permute.xlu0 %1247 }
 0x2bb   : > { %v1252_v44 = vsel %vm1251_vm6, %v2903_v29, %v2912_v17  ;;  %v1253_v27 = vsel %vm1251_vm6, %v2912_v17, %v2910_v15 }
 0x2bc   : > { %v1258_v21 = vadd.f32 %v1252_v44, %v1233_v13 }
 0x2be   : > { %v1273_v34 = vpop.permute.xlu1 %1272  ;;  %v1271_v2 = vpop.permute.xlu0 %1270 }
 0x2bf   : > { %v1277_v50 = vsel %vm1276_vm7, %v1271_v2, %v1273_v34 }
 0x2cf   : > { %v2936_v10 = vpop.permute.xlu1 %1475  ;;  %v1395_v48 = vpop.permute.xlu0 %1394 }
 0x2d0   : > { %v1397_v23 = vadd.f32 %v1395_v48, %v2796_v55  ;;  %v1398_v3 = vadd.f32 %v1395_v48, %v2798_v41  ;;  %v1399_v7 = vadd.f32 %v1395_v48, %v2801_v56  ;;  %v1159_v55 = vadd.f32 %v1153_v31, %v1134_v8 }
 0x2d1   : > { %v1232_v41 = vadd.f32 %v2898_v52, %v1207_v54  ;;  %v1228_v52 = vsel %vm1226_vm5, %v2896_v53, %v2905_v5  ;;  %v1283_v5 = vadd.f32 %v1277_v50, %v1258_v21 }
 0x2d2   : > { %v1400_v12 = vmax.f32 %v1397_v23, 0.0  ;;  %v1401_v6 = vmax.f32 %v1398_v3, 0.0  ;;  %v1402_v62 = vmax.f32 %v1399_v7, 0.0  ;;  %v1184_v16 = vadd.f32 %v1178_v42, %v1159_v55 }
 0x2d3   : > { %v1275_v56 = vpop.permute.xlu1 %1274  ;;  %v1296_v49 = vpop.permute.xlu0 %1295  ;;  %v1257_v40 = vadd.f32 %v2903_v29, %v1232_v41 }
 0x2d4   : > { %v1406_v58 = vcombine.low %v1400_v12, %v1401_v6  ;;  %v1420_v60 = vrot.slane %v1402_v62, %v2930_v4  ;;  %v1209_v51 = vadd.f32 %v1203_v46, %v1184_v16  ;;  %v1278_v33 = vsel %vm1276_vm7, %v1273_v34, %v1275_v56 }
 0x2d5   : > { %v1282_v29 = vadd.f32 %v1271_v2, %v1257_v40  ;;  %v537_v34 = vmul.f32 %v1919_v11, %v2837_v59 }
 0x2d6   : > { %v1413_v26 = vrot.slane %v1406_v58, %v2930_v4  ;;  %v1234_v53 = vadd.f32 %v1228_v52, %v1209_v51 }
 0x2d7   : > { %v1298_v35 = vpop.permute.xlu1 %1297  ;;  %v1300_v43 = vpop.permute.xlu0 %1299  ;;  %v1307_v28 = vadd.f32 %v1296_v49, %v1282_v29 }
 0x2d8   : > { %v1421_v47 = vcombine.low %v1413_v26, %v1420_v60  ;;  %v1438_v22 = vcombine.high %v1413_v26, %v1420_v60  ;;  %v1302_v63 = vsel %vm1301_vm8, %v1296_v49, %v1298_v35  ;;  %v1259_v15 = vadd.f32 %v1253_v27, %v1234_v53 }
 0x2d9   : > { %v1308_v17 = vadd.f32 %v1302_v63, %v1283_v5  ;;  %v1303_v2 = vsel %vm1301_vm8, %v1298_v35, %v1300_v43 }
 0x2da   : > { %v1445_v25 = vrot.slane %v1438_v22, %v2930_v4  ;;  %v1428_v24 = vrot.slane %v1421_v47, %v2930_v4  ;;  %v1284_v57 = vadd.f32 %v1278_v33, %v1259_v15 }
 0x2db   : > { %v1321_v30 = vpop.permute.xlu1 %1320  ;;  %v1323_v61 = vpop.permute.xlu0 %1322 }
 0x2dc   : > { %v1332_v18 = vadd.f32 %v1321_v30, %v1307_v28  ;;  %v1327_v39 = vsel %vm1326_vm9, %v1321_v30, %v1323_v61  ;;  %1446 = vrot.lane.b32.xlu0 %v1445_v25, %s2234_s11  ;;  %1429 = vrot.lane.b32.xlu1 %v1428_v24, %s2234_s11  ;;  %v1463_v31 = vcombine.high %v1445_v25, %v1445_v25 }
 0x2dd   : > { %v1333_v19 = vadd.f32 %v1327_v39, %v1308_v17  ;;  %v1454_v1 = vcombine.high %v1428_v24, %v1428_v24  ;;  %v1309_v20 = vadd.f32 %v1303_v2, %v1284_v57 }
 0x2de   : > { %v1478_v37 = vadd.f32 %v2936_v10, %v1332_v18 }
 0x2df   : > { %v1479_v48 = vadd.f32 %v2936_v10, %v1333_v19  ;;  %v1325_v45 = vpop.permute.xlu1 %1324  ;;  %v1339_v23 = vpop.permute.xlu0 %1338 }
 0x2e0   : > { %v1481_v3 = vmax.f32 %v1478_v37, 0.0  ;;  %v1328_v7 = vsel %vm1326_vm9, %v1323_v61, %v1325_v45  ;;  %v1341_v8 = vadd.f32 %v1339_v23, %v537_v34  ;;  %v1342_v14 = vadd.f32 %v1339_v23, %v538_v38  ;;  %1464 = vrot.lane.b32.xlu0 %v1463_v31, %s2234_s11  ;;  %1455 = vrot.lane.b32.xlu1 %v1454_v1, %s2234_s11 }
 0x2e1   : > { %v1482_v54 = vmax.f32 %v1479_v48, 0.0  ;;  %v1334_v42 = vadd.f32 %v1328_v7, %v1309_v20 }
 0x2e2   : > { %v1343_v9 = vmax.f32 %v1341_v8, 0.0  ;;  %v1344_v59 = vmax.f32 %v1342_v14, 0.0 }
 0x2e3   : > { %v1487_v32 = vcombine.low %v1481_v3, %v1482_v54  ;;  %v1480_v12 = vadd.f32 %v2936_v10, %v1334_v42 }
 0x2e4   : > { %v1347_v6 = vcombine.low %v1343_v9, %v1344_v59 }
 0x2e5   : > { %v1483_v62 = vmax.f32 %v1480_v12, 0.0  ;;  %v1494_v36 = vrot.slane %v1487_v32, %v2930_v4 }
 0x2e6   : > { %v1354_v55 = vrot.slane %v1347_v6, %v2930_v4 }
 0x2e7   : > { %v1501_v41 = vrot.slane %v1483_v62, %v2930_v4 }
 0x2e8   : > { %v1361_v49 = vrot.slane %v1354_v55, %v2930_v4  ;;  %v1369_v46 = vcombine.high %v1354_v55, %v1354_v55 }
 0x2e9   : > { %v1502_v44 = vcombine.low %v1494_v36, %v1501_v41  ;;  %v1519_v58 = vcombine.high %v1494_v36, %v1501_v41 }
 0x2ea   : > { %1367 = vst.msk [vmem:[%s2992_s28] ss:$8 sm:$0x3] %vm2987_vm10, %v1361_v49  ;;  %v1376_v10 = vrot.slane %v1369_v46, %v2930_v4  ;;  %v1381_v0 = vcombine.high %v1361_v49, %v1361_v49 }
 0x2eb   : > { %v1526_v16 = vrot.slane %v1519_v58, %v2930_v4  ;;  %v1509_v13 = vrot.slane %v1502_v44, %v2930_v4 }
 0x2ec   : > { %1709 = vst.msk [vmem:[%s2992_s28 + $0x4] ss:$8 sm:$0x3] %vm2987_vm10, %v1376_v10  ;;  %1710 = vst.msk [vmem:[%s2992_s28 + $0x10] ss:$8 sm:$0x3] %vm2987_vm10, %v1381_v0  ;;  %v1386_v40 = vcombine.high %v1376_v10, %v1376_v10 }
 0x2ed   : > { %1527 = vrot.lane.b32.xlu0 %v1526_v16, %s2235_s26  ;;  %1510 = vrot.lane.b32.xlu1 %v1509_v13, %s2235_s26  ;;  %v1544_v52 = vcombine.high %v1526_v16, %v1526_v16  ;;  %v1535_v50 = vcombine.high %v1509_v13, %v1509_v13 }
 0x2ee   : > { %1711 = vst.msk [vmem:[%s2992_s28 + $0x1] ss:$8 sm:$0x3] %vm2987_vm10, %v1386_v40 }
 0x2f1   : > { %1545 = vrot.lane.b32.xlu0 %v1544_v52, %s2235_s26  ;;  %1536 = vrot.lane.b32.xlu1 %v1535_v50, %s2235_s26 }
 0x34e   : > { %v1430_v4 = vpop.permute.xlu1 %1429  ;;  %v1447_v26 = vpop.permute.xlu0 %1446 }
 0x34f   : > { %v1431_v60 = vrot.slane %v1430_v4, 1  ;;  %v1448_v51 = vrot.slane %v1447_v26, 1 }
 0x351   : > { %v1433_v27 = vsel %vm1432_vm11, %v1430_v4, %v1431_v60  ;;  %v1449_v21 = vsel %vm1432_vm11, %v1447_v26, %v1448_v51 }
 0x352   : > { %1712 = vst.msk [vmem:[%s2992_s28 + $0x5] ss:$8 sm:$0x3] %vm2987_vm10, %v1433_v27  ;;  %1713 = vst.msk [vmem:[%s2992_s28 + $0x11] ss:$8 sm:$0x3] %vm2987_vm10, %v1449_v21  ;;  %v1456_v35 = vpop.permute.xlu1 %1455  ;;  %v1465_v43 = vpop.permute.xlu0 %1464 }
 0x353   : > { %v1457_v29 = vrot.slane %v1456_v35, 1  ;;  %v1466_v47 = vrot.slane %v1465_v43, 1 }
 0x355   : > { %v1458_v22 = vsel %vm1432_vm11, %v1456_v35, %v1457_v29  ;;  %v1467_v63 = vsel %vm1432_vm11, %v1465_v43, %v1466_v47 }
 0x356   : > { %1714 = vst.msk [vmem:[%s2992_s28 + $0x2] ss:$8 sm:$0x3] %vm2987_vm10, %v1458_v22  ;;  %1715 = vst.msk [vmem:[%s2992_s28 + $0x6] ss:$8 sm:$0x3] %vm2987_vm10, %v1467_v63 }
 0x35f   : > { %v1528_v53 = vpop.permute.xlu0 %1527  ;;  %v1511_v5 = vpop.permute.xlu1 %1510 }
 0x360   : > { %v1529_v33 = vrot.slane %v1528_v53, 1  ;;  %v1512_v28 = vrot.slane %v1511_v5, 1 }
 0x362   : > { %v1530_v25 = vsel %vm1513_vm12, %v1528_v53, %v1529_v33  ;;  %v1514_v24 = vsel %vm1513_vm12, %v1511_v5, %v1512_v28 }
 0x363   : > { %1717 = vst.msk [vmem:[%s2992_s28 + $0x3] ss:$8 sm:$0x3] %vm2987_vm10, %v1530_v25  ;;  %1716 = vst.msk [vmem:[%s2992_s28 + $0x12] ss:$8 sm:$0x3] %vm2987_vm10, %v1514_v24  ;;  %v1546_v15 = vpop.permute.xlu0 %1545  ;;  %v1537_v17 = vpop.permute.xlu1 %1536 }
 0x364   : > { %v1547_v30 = vrot.slane %v1546_v15, 1  ;;  %v1538_v61 = vrot.slane %v1537_v17, 1 }
 0x366   : > { %v1548_v2 = vsel %vm1513_vm12, %v1546_v15, %v1547_v30  ;;  %v1539_v18 = vsel %vm1513_vm12, %v1537_v17, %v1538_v61 }
 0x367   : > { %1719 = vst.msk [vmem:[%s2992_s28 + $0x13] ss:$8 sm:$0x3] %vm2987_vm10, %v1548_v2  ;;  %1718 = vst.msk [vmem:[%s2992_s28 + $0x7] ss:$8 sm:$0x3] %vm2987_vm10, %v1539_v18 }
 0x368   : > { %2103 = shalt.err (!%p2100_p5)
}
 0x369   : > { %s2104_s18 = scalar_lea.hbm %s3034_s27, 512  ;;  %s2108_s28 = scalar_lea.hbm %s3094_s6, 1024 }
 0x36a   : > { %p2105_p6 = scmp.ne.s32.totalorder %s3034_s27, %s2104_s18  ;;  %p2109_p9 = scmp.lt.u32.totalorder %s3034_s27, %s3094_s6 }
 0x36b   : > { %p2110_p10 = scmp.lt.u32.totalorder %s2108_s28, %s2104_s18  ;;  %p2112_p7 = scmp.lt.u32.totalorder %s2104_s18, %s3034_s27 }
 0x36c   : > { %p2106_p4 = pnand %p2105_p6, %p3117_p13 }
 0x36d   : > { %p2111_p12 = por %p2110_p10, %p2109_p9 }
 0x36e   : > { %p2107_p11 = pneg %p2106_p4 }
 0x36f   : > { %p2113_p1 = por %p2112_p7, %p2111_p12 }
 0x371   : > { %p2114_p3 = pnand %p2113_p1, %p2107_p11 }
 0x373   : > { %2117 = shalt.err (!%p2114_p3)
}
 0x374   : > { %s2237_s25 = smov 256   ;;  %s2238_s14 = smov 16  }
 0x375   : > { %1749 = dma.vmem_to_hbm [thread:$0]  (%p3117_p13), %s3036_s10, 512, %s3034_s27, %s1554_s19, %s2237_s25, %s2237_s25, %s2238_s14  }
 0x376 PF: > { %s1582_s29 = sand.u32 1, %s2160_s21   ;;  %p3118_p2 = scmp.ne.s32.totalorder %s3104_s15, 0 }
 0x377   : > { %p3119_p0 = scmp.ge.s32.totalorder %s2172_s24, 2  ;;  %s1583_s13 = scalar_lea.sflag [#allocation4], %s1582_s29 }
 0x379   : > { %p1772_p8 = pnand %p3119_p0, %p3118_p2 }
 0x37b   : > { %2155 = dma.done.wait (!%p1772_p8), %s1583_s13, 512  }
 0x37c   : > { %2157 = vsyncadd (!%p1772_p8), %s1583_s13, 4294966784  ;;  %p22_p5 = scmp.ge.s32.totalorder %s2435_s8, 4   ;;  %s3120_s21 = smov %s2164_s22 }
 0x37d   : > { %s3121_s22 = smov %s2168_s23  ;;  %s3122_s23 = smov %s2447_s9 }
 0x37e   : > { %s3123_s24 = smov %s2435_s8  ;;  %24 = sbr.rel (!%p22_p5) target bundleno = 8 (0x8), region = 121 }
 0x385   :  { %1588 = vsyncpa [#allocation3], 1 }
 0x386   :  { %1590 = vsyncpa [#allocation3 + $0x1], 1 }
 0x387   :  { %1591 = vsyncpa [#allocation6], 1 }
 0x388   :  { %1593 = vsyncpa [#allocation6 + $0x1], 1 }
 0x389   :  { %1594 = vsyncpa [#allocation9], 1 }
 0x38a   :  { %1595 = vsyncpa [#allocation12], 1 }
 0x38b   :  { %1596 = vsyncpa [#allocation4], 1 }
 0x38c   :  { %1598 = vsyncpa [#allocation4 + $0x1], 1 }

</bundles_post_ra>
